<compile_context>
chip_gen: v7x
topology: tpu7x:2x2x1
jax: 0.10.0
libtpu: 0.0.40
codegen_flags: <defaults>
</compile_context>

<pallas_src>
import jax
import jax.numpy as jnp
from jax import lax
from jax.experimental import pallas as pl
from jax.experimental.pallas import tpu as pltpu


def _round_up(x, m):
    return (x + m - 1) // m * m


# ----------------------------------------------------------------------------
# Kernel factory (all shape constants are baked in as Python ints).
# Grid = (batch, row-tile); one conv3-output row tile (+ recomputed halo) per
# step, fully fused conv1 -> conv2 -> conv3 -> Haar DWT.
# ----------------------------------------------------------------------------
def _make_kernel(*, H, W, Wp, TR, C):
    R1, R2, R3 = TR + 4, TR + 2, TR          # rows computed per conv stage
    M1, M2, M3 = R1 * Wp, R2 * Wp, R3 * Wp   # flat pixels per conv stage
    Wh = W // 2
    C3 = 3 * C

    def kernel(x_ref, w1_ref, b1_ref, w2_ref, b2_ref, w3_ref, b3_ref,
               o_ref, a_scr, b_scr):
        t = pl.program_id(1)
        r0 = t * TR                          # first image row of this tile

        def valid_mask(rows, g0):
            # Real columns (< W) and in-image rows; built in-kernel (no DMA).
            col = lax.broadcasted_iota(jnp.int32, (rows, Wp, C), 1)
            row = lax.broadcasted_iota(jnp.int32, (rows, Wp, C), 0) + g0
            ok = (col < W) & (row >= 0) & (row < H)
            return ok.reshape(rows * Wp, C)

        def store_replicated(a, buf, m):
            # buf[j] = [a[j-1] | a[j] | a[j+1]] on the channel axis (bf16), so
            # the next conv needs only 3 row-aligned K=3C tap loads.  The zero
            # boundary rows give the correct left/right zero padding.
            z = jnp.zeros((1, C), jnp.bfloat16)
            left = jnp.concatenate([z, a[:m - 1, :]], axis=0)
            right = jnp.concatenate([a[1:, :], z], axis=0)
            buf[pl.ds(0, m), 0:C] = left
            buf[pl.ds(0, m), C:2 * C] = a
            buf[pl.ds(0, m), 2 * C:C3] = right

        def conv3x3(buf, w_ref, b_ref, m):
            # 3 matmuls, K = 3*C = 192, bf16 operands, f32 accumulation.
            acc = None
            for ky in range(3):
                p = buf[pl.ds(ky * Wp, m), :]                    # (m, 3C) bf16
                d = jnp.dot(p, w_ref[ky], preferred_element_type=jnp.float32)
                acc = d if acc is None else acc + d
            return acc + b_ref[...]

        # ---- conv1: single matmul on the wrapper-im2col'ed input ----------
        acc1 = jnp.dot(x_ref[0, 0], w1_ref[...],
                       preferred_element_type=jnp.float32)
        a1 = jnp.maximum(acc1 + b1_ref[...], 0.0)
        a1 = jnp.where(valid_mask(R1, r0 - 2), a1, 0.0).astype(jnp.bfloat16)
        store_replicated(a1, a_scr, M1)

        # ---- conv2 --------------------------------------------------------
        a2 = jnp.maximum(conv3x3(a_scr, w2_ref, b2_ref, M2), 0.0)
        a2 = jnp.where(valid_mask(R2, r0 - 1), a2, 0.0).astype(jnp.bfloat16)
        store_replicated(a2, b_scr, M2)

        # ---- conv3 (weights/bias pre-scaled by 0.5 => relu(conv3)/2) ------
        # No mask needed: the DWT epilogue only reads valid rows/columns.
        a3 = jnp.maximum(conv3x3(b_scr, w3_ref, b3_ref, M3), 0.0)

        # ---- Haar DWT epilogue (MWCNN dwt_init), band-packed channels -----
        y = a3.reshape(R3 // 2, 2, Wp // 2, 2, C)
        x1 = y[:, 0, :Wh, 0, :]      # even row, even col
        x2 = y[:, 1, :Wh, 0, :]      # odd  row, even col
        x3 = y[:, 0, :Wh, 1, :]      # even row, odd col
        x4 = y[:, 1, :Wh, 1, :]      # odd  row, odd col
        ll = x1 + x2 + x3 + x4
        hl = -x1 - x2 + x3 + x4
        lh = -x1 + x2 - x3 + x4
        hh = x1 - x2 - x3 + x4
        o_ref[0] = jnp.concatenate([ll, hl, lh, hh], axis=-1)

    return kernel


# ----------------------------------------------------------------------------
# Wrapper: PyTorch-style NCHW in / NCHW out.
# ----------------------------------------------------------------------------
def block_forward(x_nchw, params, tile_rows=8):
    N, Cin, H, W = x_nchw.shape
    C = params['w1'].shape[-1]
    if H % 2 or W % 2:
        raise ValueError("DWT requires even spatial dimensions")

    TR = tile_rows
    if TR % 2 or H % TR:
        TR = H                          # fall back to one row-tile per image
    nt = H // TR
    Hh, Wh, TRh = H // 2, W // 2, TR // 2

    Wp = _round_up(W + 1, 16)           # row pitch: >= W+1 pad col, bf16-tile aligned
    K1 = 9 * Cin
    K1p = _round_up(K1, 8)
    R1 = TR + 4
    M1, M2 = R1 * Wp, (TR + 2) * Wp
    C3 = 3 * C

    # --- conv1 im2col in the wrapper (bf16): one K=9*Cin matmul in-kernel ---
    x = jnp.transpose(x_nchw, (0, 2, 3, 1)).astype(jnp.float32)      # NHWC
    xp = jnp.pad(x, ((0, 0), (3, 3), (1, 1), (0, 0)))
    taps = [xp[:, ky:ky + H + 4, kx:kx + W, :]
            for ky in range(3) for kx in range(3)]
    im2 = jnp.concatenate(taps, axis=-1)                             # (N, H+4, W, 9*Cin)
    im2 = jnp.pad(im2, ((0, 0), (0, 0), (0, Wp - W), (0, K1p - K1)))
    im2 = im2.astype(jnp.bfloat16)
    # Per-tile rows with a 2-row halo on each side (conv1 rows r0-2 .. r0+TR+1).
    x_t = jnp.stack([im2[:, t * TR: t * TR + R1] for t in range(nt)], axis=1)
    x_t = x_t.reshape(N, nt, M1, K1p)
    # TODO(synk): for very large images, replace the wrapper-side im2col + halo
    # duplication with in-kernel gathers (scalar-prefetch row offsets) to avoid
    # the ~9x HBM inflation of the conv1 input stream.

    # --- weights: bf16, matmul-ready layouts; DWT /2 folded into conv3 ------
    w1 = jnp.pad(params['w1'].reshape(K1, C),
                 ((0, K1p - K1), (0, 0))).astype(jnp.bfloat16)       # (K1p, C)
    w2 = params['w2'].reshape(3, C3, C).astype(jnp.bfloat16)         # (3, 3C, C)
    w3 = (params['w3'] * 0.5).reshape(3, C3, C).astype(jnp.bfloat16)
    b1 = params['b1'].reshape(1, C).astype(jnp.float32)
    b2 = params['b2'].reshape(1, C).astype(jnp.float32)
    b3 = (params['b3'] * 0.5).reshape(1, C).astype(jnp.float32)

    kernel = _make_kernel(H=H, W=W, Wp=Wp, TR=TR, C=C)

    # Scoped-VMEM budget from the actual buffer sizes (capped so it also stays
    # well inside v7x's 64 MiB physical VMEM).
    est = (2 * M1 * max(K1p, 128) * 2            # input block, double-buffered
           + 2 * TRh * Wh * 4 * C * 4            # output block, double-buffered
           + (M1 + M2) * _round_up(C3, 256) * 2  # bf16 activation scratch
           + 2 * (K1p * C + 2 * 3 * C3 * C) * 2)  # weights
    vmem_limit = int(min(max(4 * est, 32 * 1024 * 1024), 48 * 1024 * 1024))

    out = pl.pallas_call(
        kernel,
        out_shape=jax.ShapeDtypeStruct((N, Hh, Wh, 4 * C), jnp.float32),
        grid_spec=pltpu.PrefetchScalarGridSpec(
            num_scalar_prefetch=0,
            grid=(N, nt),
            in_specs=[
                pl.BlockSpec((1, 1, M1, K1p), lambda n, t: (n, t, 0, 0)),
                pl.BlockSpec((K1p, C), lambda n, t: (0, 0)),
                pl.BlockSpec((1, C), lambda n, t: (0, 0)),
                pl.BlockSpec((3, C3, C), lambda n, t: (0, 0, 0)),
                pl.BlockSpec((1, C), lambda n, t: (0, 0)),
                pl.BlockSpec((3, C3, C), lambda n, t: (0, 0, 0)),
                pl.BlockSpec((1, C), lambda n, t: (0, 0)),
            ],
            out_specs=pl.BlockSpec((1, TRh, Wh, 4 * C),
                                   lambda n, t: (n, t, 0, 0)),
            scratch_shapes=[
                pltpu.VMEM((M1, C3), jnp.bfloat16),   # conv1 acts, col-replicated
                pltpu.VMEM((M2, C3), jnp.bfloat16),   # conv2 acts, col-replicated
            ],
        ),
        compiler_params=pltpu.CompilerParams(
            dimension_semantics=("parallel", "arbitrary"),
            vmem_limit_bytes=vmem_limit),
    )(x_t, w1, b1, w2, b2, w3, b3)

    # band-packed NHWC -> NCHW: (N, 4*C, H/2, W/2), channels [LL, HL, LH, HH]
    return jnp.transpose(out, (0, 3, 1, 2))


block_forward_jit = jax.jit(block_forward, static_argnames=("tile_rows",))


# ----------------------------------------------------------------------------
# Pure-JAX reference (PyTorch semantics, emulating the kernel's bf16 matmul
# inputs with f32 accumulation) for verification.
# ----------------------------------------------------------------------------
def _ref_forward(x_nchw, params):
    def conv(x, w, b):
        wt = jnp.transpose(w, (3, 2, 0, 1)).astype(jnp.bfloat16)     # OIHW
        y = jax.lax.conv_general_dilated(
            x.astype(jnp.bfloat16), wt, window_strides=(1, 1),
            padding=((1, 1), (1, 1)),
            dimension_numbers=('NCHW', 'OIHW', 'NCHW'),
            preferred_element_type=jnp.float32)
        return jax.nn.relu(y + b[None, :, None, None])

    x = conv(x_nchw, params['w1'], params['b1'])
    x = conv(x, params['w2'], params['b2'])
    x = conv(x, params['w3'], params['b3'])
    x01 = x[:, :, 0::2, :] / 2
    x02 = x[:, :, 1::2, :] / 2
    x1 = x01[:, :, :, 0::2]
    x2 = x02[:, :, :, 0::2]
    x3 = x01[:, :, :, 1::2]
    x4 = x02[:, :, :, 1::2]
    ll = x1 + x2 + x3 + x4
    hl = -x1 - x2 + x3 + x4
    lh = -x1 + x2 - x3 + x4
    hh = x1 - x2 - x3 + x4
    return jnp.concatenate([ll, hl, lh, hh], axis=1)


if __name__ == "__main__":
    N, Cin, Cout, H, W = 2, 3, 64, 16, 16
    key = jax.random.PRNGKey(0)
    kx, k1, k2, k3, k4, k5, k6 = jax.random.split(key, 7)
    x = jax.random.normal(kx, (N, Cin, H, W), jnp.float32)
    params = {
        'w1': jax.random.normal(k1, (3, 3, Cin, Cout), jnp.float32) * 0.10,
        'b1': jax.random.normal(k2, (Cout,), jnp.float32) * 0.01,
        'w2': jax.random.normal(k3, (3, 3, Cout, Cout), jnp.float32) * 0.05,
        'b2': jax.random.normal(k4, (Cout,), jnp.float32) * 0.01,
        'w3': jax.random.normal(k5, (3, 3, Cout, Cout), jnp.float32) * 0.05,
        'b3': jax.random.normal(k6, (Cout,), jnp.float32) * 0.01,
    }

    out = jax.block_until_ready(block_forward_jit(x, params))
    assert out.shape == (N, 4 * Cout, H // 2, W // 2), out.shape

    ref = jax.block_until_ready(_ref_forward(x, params))
    err = float(jnp.max(jnp.abs(out - ref)))
    assert err < 3e-2, f"max abs err {err}"

    print("KERNEL_OK")
</pallas_src>

<mosaic_0001>
module attributes {stable_mosaic.version = 11 : i64} {
  func.func @kernel(%arg0: i32, %arg1: i32, %arg2: memref<1x1x384x32xbf16, #tpu.memory_space<vmem>>, %arg3: memref<32x64xbf16, #tpu.memory_space<vmem>>, %arg4: memref<1x64xf32, #tpu.memory_space<vmem>>, %arg5: memref<3x192x64xbf16, #tpu.memory_space<vmem>>, %arg6: memref<1x64xf32, #tpu.memory_space<vmem>>, %arg7: memref<3x192x64xbf16, #tpu.memory_space<vmem>>, %arg8: memref<1x64xf32, #tpu.memory_space<vmem>>, %arg9: memref<1x4x8x256xf32, #tpu.memory_space<vmem>>, %arg10: memref<384x192xbf16, #tpu.memory_space<vmem>>, %arg11: memref<320x192xbf16, #tpu.memory_space<vmem>>) attributes {dimension_semantics = [#tpu.dimension_semantics<parallel>, #tpu.dimension_semantics<arbitrary>], iteration_bounds = array<i64: 2, 2>, scalar_prefetch = 0 : i64, scratch_operands = 2 : i64, tpu.core_type = #tpu.core_type<tc>, window_params = [{transform_indices = @transform_0, window_bounds = array<i64: 1, 1, 384, 32>}, {pipeline_mode = #tpu.pipeline_mode<synchronous>, transform_indices = @transform_1, window_bounds = array<i64: 32, 64>}, {pipeline_mode = #tpu.pipeline_mode<synchronous>, transform_indices = @transform_2, window_bounds = array<i64: 1, 64>}, {pipeline_mode = #tpu.pipeline_mode<synchronous>, transform_indices = @transform_3, window_bounds = array<i64: 3, 192, 64>}, {pipeline_mode = #tpu.pipeline_mode<synchronous>, transform_indices = @transform_4, window_bounds = array<i64: 1, 64>}, {pipeline_mode = #tpu.pipeline_mode<synchronous>, transform_indices = @transform_5, window_bounds = array<i64: 3, 192, 64>}, {pipeline_mode = #tpu.pipeline_mode<synchronous>, transform_indices = @transform_6, window_bounds = array<i64: 1, 64>}, {transform_indices = @transform_7, window_bounds = array<i64: 1, 4, 8, 256>}]} {
    %c8_i32 = arith.constant 8 : i32
    %0 = arith.muli %arg1, %c8_i32 : i32
    %c0 = arith.constant 0 : index
    %c0_0 = arith.constant 0 : index
    %c0_1 = arith.constant 0 : index
    %c0_2 = arith.constant 0 : index
    %1 = vector.load %arg2[%c0, %c0_0, %c0_1, %c0_2] : memref<1x1x384x32xbf16, #tpu.memory_space<vmem>>, vector<1x1x384x32xbf16>
    %2 = vector.shape_cast %1 : vector<1x1x384x32xbf16> to vector<384x32xbf16>
    %c0_3 = arith.constant 0 : index
    %c0_4 = arith.constant 0 : index
    %3 = vector.load %arg3[%c0_3, %c0_4] : memref<32x64xbf16, #tpu.memory_space<vmem>>, vector<32x64xbf16>
    %cst = arith.constant dense<0.000000e+00> : vector<384x64xf32>
    %4 = tpu.matmul %2, %3, %cst {dimension_numbers = #tpu.dot_dimension_numbers<[1], [0], [0], [1], [0, 0, 1, 1], [], []>} : vector<384x32xbf16>, vector<32x64xbf16>, vector<384x64xf32> -> vector<384x64xf32>
    %c0_5 = arith.constant 0 : index
    %c0_6 = arith.constant 0 : index
    %5 = vector.load %arg4[%c0_5, %c0_6] : memref<1x64xf32, #tpu.memory_space<vmem>>, vector<1x64xf32>
    %6 = vector.broadcast %5 : vector<1x64xf32> to vector<384x64xf32>
    %7 = arith.addf %4, %6 : vector<384x64xf32>
    %cst_7 = arith.constant 0.000000e+00 : f32
    %8 = vector.broadcast %cst_7 : f32 to vector<384x64xf32>
    %9 = arith.maximumf %7, %8 : vector<384x64xf32>
    %c2_i32 = arith.constant 2 : i32
    %10 = arith.subi %0, %c2_i32 : i32
    %11 = tpu.iota {dimensions = array<i32: 1>} : vector<12x32x64xi32>
    %12 = tpu.iota {dimensions = array<i32: 0>} : vector<12x32x64xi32>
    %13 = vector.broadcast %10 : i32 to vector<12x32x64xi32>
    %14 = arith.addi %12, %13 : vector<12x32x64xi32>
    %c16_i32 = arith.constant 16 : i32
    %15 = vector.broadcast %c16_i32 : i32 to vector<12x32x64xi32>
    %16 = arith.cmpi slt, %11, %15 : vector<12x32x64xi32>
    %c0_i32 = arith.constant 0 : i32
    %17 = vector.broadcast %c0_i32 : i32 to vector<12x32x64xi32>
    %18 = arith.cmpi sge, %14, %17 : vector<12x32x64xi32>
    %19 = arith.andi %16, %18 : vector<12x32x64xi1>
    %c16_i32_8 = arith.constant 16 : i32
    %20 = vector.broadcast %c16_i32_8 : i32 to vector<12x32x64xi32>
    %21 = arith.cmpi slt, %14, %20 : vector<12x32x64xi32>
    %22 = arith.andi %19, %21 : vector<12x32x64xi1>
    %23 = vector.shape_cast %22 : vector<12x32x64xi1> to vector<384x64xi1>
    %cst_9 = arith.constant 0.000000e+00 : f32
    %24 = vector.broadcast %cst_9 : f32 to vector<384x64xf32>
    %25 = arith.select %23, %9, %24 : vector<384x64xi1>, vector<384x64xf32>
    %26 = arith.truncf %25 : vector<384x64xf32> to vector<384x64xbf16>
    %cst_10 = arith.constant 0.000000e+00 : bf16
    %27 = vector.broadcast %cst_10 : bf16 to vector<1x64xbf16>
    %28 = vector.extract_strided_slice %26 {offsets = [0, 0], sizes = [383, 64], strides = [1, 1]} : vector<384x64xbf16> to vector<383x64xbf16>
    %29 = tpu.concatenate %27, %28 in 0 : vector<1x64xbf16>, vector<383x64xbf16> -> vector<384x64xbf16>
    %30 = vector.extract_strided_slice %26 {offsets = [1, 0], sizes = [383, 64], strides = [1, 1]} : vector<384x64xbf16> to vector<383x64xbf16>
    %31 = tpu.concatenate %30, %27 in 0 : vector<383x64xbf16>, vector<1x64xbf16> -> vector<384x64xbf16>
    %c0_11 = arith.constant 0 : index
    %c0_12 = arith.constant 0 : index
    %32 = vector.load %arg10[%c0_11, %c0_12] : memref<384x192xbf16, #tpu.memory_space<vmem>>, vector<384x64xbf16>
    tpu.vector_store %arg10[%c0_11, %c0_12], %29 {strides = array<i32>} : memref<384x192xbf16, #tpu.memory_space<vmem>>, vector<384x64xbf16>,
    %c0_13 = arith.constant 0 : index
    %c64 = arith.constant 64 : index
    %33 = vector.load %arg10[%c0_13, %c64] : memref<384x192xbf16, #tpu.memory_space<vmem>>, vector<384x64xbf16>
    tpu.vector_store %arg10[%c0_13, %c64], %26 {strides = array<i32>} : memref<384x192xbf16, #tpu.memory_space<vmem>>, vector<384x64xbf16>,
    %c0_14 = arith.constant 0 : index
    %c128 = arith.constant 128 : index
    %34 = vector.load %arg10[%c0_14, %c128] : memref<384x192xbf16, #tpu.memory_space<vmem>>, vector<384x64xbf16>
    tpu.vector_store %arg10[%c0_14, %c128], %31 {strides = array<i32>} : memref<384x192xbf16, #tpu.memory_space<vmem>>, vector<384x64xbf16>,
    %c0_15 = arith.constant 0 : index
    %c0_16 = arith.constant 0 : index
    %35 = vector.load %arg10[%c0_15, %c0_16] : memref<384x192xbf16, #tpu.memory_space<vmem>>, vector<320x192xbf16>
    %c0_17 = arith.constant 0 : index
    %c0_18 = arith.constant 0 : index
    %c0_19 = arith.constant 0 : index
    %36 = vector.load %arg5[%c0_17, %c0_18, %c0_19] : memref<3x192x64xbf16, #tpu.memory_space<vmem>>, vector<1x192x64xbf16>
    %37 = vector.shape_cast %36 : vector<1x192x64xbf16> to vector<192x64xbf16>
    %cst_20 = arith.constant dense<0.000000e+00> : vector<320x64xf32>
    %38 = tpu.matmul %35, %37, %cst_20 {dimension_numbers = #tpu.dot_dimension_numbers<[1], [0], [0], [1], [0, 0, 1, 1], [], []>} : vector<320x192xbf16>, vector<192x64xbf16>, vector<320x64xf32> -> vector<320x64xf32>
    %c32 = arith.constant 32 : index
    %c0_21 = arith.constant 0 : index
    %39 = vector.load %arg10[%c32, %c0_21] : memref<384x192xbf16, #tpu.memory_space<vmem>>, vector<320x192xbf16>
    %c1 = arith.constant 1 : index
    %c0_22 = arith.constant 0 : index
    %c0_23 = arith.constant 0 : index
    %40 = vector.load %arg5[%c1, %c0_22, %c0_23] : memref<3x192x64xbf16, #tpu.memory_space<vmem>>, vector<1x192x64xbf16>
    %41 = vector.shape_cast %40 : vector<1x192x64xbf16> to vector<192x64xbf16>
    %cst_24 = arith.constant dense<0.000000e+00> : vector<320x64xf32>
    %42 = tpu.matmul %39, %41, %cst_24 {dimension_numbers = #tpu.dot_dimension_numbers<[1], [0], [0], [1], [0, 0, 1, 1], [], []>} : vector<320x192xbf16>, vector<192x64xbf16>, vector<320x64xf32> -> vector<320x64xf32>
    %43 = arith.addf %38, %42 : vector<320x64xf32>
    %c64_25 = arith.constant 64 : index
    %c0_26 = arith.constant 0 : index
    %44 = vector.load %arg10[%c64_25, %c0_26] : memref<384x192xbf16, #tpu.memory_space<vmem>>, vector<320x192xbf16>
    %c2 = arith.constant 2 : index
    %c0_27 = arith.constant 0 : index
    %c0_28 = arith.constant 0 : index
    %45 = vector.load %arg5[%c2, %c0_27, %c0_28] : memref<3x192x64xbf16, #tpu.memory_space<vmem>>, vector<1x192x64xbf16>
    %46 = vector.shape_cast %45 : vector<1x192x64xbf16> to vector<192x64xbf16>
    %cst_29 = arith.constant dense<0.000000e+00> : vector<320x64xf32>
    %47 = tpu.matmul %44, %46, %cst_29 {dimension_numbers = #tpu.dot_dimension_numbers<[1], [0], [0], [1], [0, 0, 1, 1], [], []>} : vector<320x192xbf16>, vector<192x64xbf16>, vector<320x64xf32> -> vector<320x64xf32>
    %48 = arith.addf %43, %47 : vector<320x64xf32>
    %c0_30 = arith.constant 0 : index
    %c0_31 = arith.constant 0 : index
    %49 = vector.load %arg6[%c0_30, %c0_31] : memref<1x64xf32, #tpu.memory_space<vmem>>, vector<1x64xf32>
    %50 = vector.broadcast %49 : vector<1x64xf32> to vector<320x64xf32>
    %51 = arith.addf %48, %50 : vector<320x64xf32>
    %cst_32 = arith.constant 0.000000e+00 : f32
    %52 = vector.broadcast %cst_32 : f32 to vector<320x64xf32>
    %53 = arith.maximumf %51, %52 : vector<320x64xf32>
    %c1_i32 = arith.constant 1 : i32
    %54 = arith.subi %0, %c1_i32 : i32
    %55 = tpu.iota {dimensions = array<i32: 1>} : vector<10x32x64xi32>
    %56 = tpu.iota {dimensions = array<i32: 0>} : vector<10x32x64xi32>
    %57 = vector.broadcast %54 : i32 to vector<10x32x64xi32>
    %58 = arith.addi %56, %57 : vector<10x32x64xi32>
    %c16_i32_33 = arith.constant 16 : i32
    %59 = vector.broadcast %c16_i32_33 : i32 to vector<10x32x64xi32>
    %60 = arith.cmpi slt, %55, %59 : vector<10x32x64xi32>
    %c0_i32_34 = arith.constant 0 : i32
    %61 = vector.broadcast %c0_i32_34 : i32 to vector<10x32x64xi32>
    %62 = arith.cmpi sge, %58, %61 : vector<10x32x64xi32>
    %63 = arith.andi %60, %62 : vector<10x32x64xi1>
    %c16_i32_35 = arith.constant 16 : i32
    %64 = vector.broadcast %c16_i32_35 : i32 to vector<10x32x64xi32>
    %65 = arith.cmpi slt, %58, %64 : vector<10x32x64xi32>
    %66 = arith.andi %63, %65 : vector<10x32x64xi1>
    %67 = vector.shape_cast %66 : vector<10x32x64xi1> to vector<320x64xi1>
    %cst_36 = arith.constant 0.000000e+00 : f32
    %68 = vector.broadcast %cst_36 : f32 to vector<320x64xf32>
    %69 = arith.select %67, %53, %68 : vector<320x64xi1>, vector<320x64xf32>
    %70 = arith.truncf %69 : vector<320x64xf32> to vector<320x64xbf16>
    %cst_37 = arith.constant 0.000000e+00 : bf16
    %71 = vector.broadcast %cst_37 : bf16 to vector<1x64xbf16>
    %72 = vector.extract_strided_slice %70 {offsets = [0, 0], sizes = [319, 64], strides = [1, 1]} : vector<320x64xbf16> to vector<319x64xbf16>
    %73 = tpu.concatenate %71, %72 in 0 : vector<1x64xbf16>, vector<319x64xbf16> -> vector<320x64xbf16>
    %74 = vector.extract_strided_slice %70 {offsets = [1, 0], sizes = [319, 64], strides = [1, 1]} : vector<320x64xbf16> to vector<319x64xbf16>
    %75 = tpu.concatenate %74, %71 in 0 : vector<319x64xbf16>, vector<1x64xbf16> -> vector<320x64xbf16>
    %c0_38 = arith.constant 0 : index
    %c0_39 = arith.constant 0 : index
    %76 = vector.load %arg11[%c0_38, %c0_39] : memref<320x192xbf16, #tpu.memory_space<vmem>>, vector<320x64xbf16>
    tpu.vector_store %arg11[%c0_38, %c0_39], %73 {strides = array<i32>} : memref<320x192xbf16, #tpu.memory_space<vmem>>, vector<320x64xbf16>,
    %c0_40 = arith.constant 0 : index
    %c64_41 = arith.constant 64 : index
    %77 = vector.load %arg11[%c0_40, %c64_41] : memref<320x192xbf16, #tpu.memory_space<vmem>>, vector<320x64xbf16>
    tpu.vector_store %arg11[%c0_40, %c64_41], %70 {strides = array<i32>} : memref<320x192xbf16, #tpu.memory_space<vmem>>, vector<320x64xbf16>,
    %c0_42 = arith.constant 0 : index
    %c128_43 = arith.constant 128 : index
    %78 = vector.load %arg11[%c0_42, %c128_43] : memref<320x192xbf16, #tpu.memory_space<vmem>>, vector<320x64xbf16>
    tpu.vector_store %arg11[%c0_42, %c128_43], %75 {strides = array<i32>} : memref<320x192xbf16, #tpu.memory_space<vmem>>, vector<320x64xbf16>,
    %c0_44 = arith.constant 0 : index
    %c0_45 = arith.constant 0 : index
    %79 = vector.load %arg11[%c0_44, %c0_45] : memref<320x192xbf16, #tpu.memory_space<vmem>>, vector<256x192xbf16>
    %c0_46 = arith.constant 0 : index
    %c0_47 = arith.constant 0 : index
    %c0_48 = arith.constant 0 : index
    %80 = vector.load %arg7[%c0_46, %c0_47, %c0_48] : memref<3x192x64xbf16, #tpu.memory_space<vmem>>, vector<1x192x64xbf16>
    %81 = vector.shape_cast %80 : vector<1x192x64xbf16> to vector<192x64xbf16>
    %cst_49 = arith.constant dense<0.000000e+00> : vector<256x64xf32>
    %82 = tpu.matmul %79, %81, %cst_49 {dimension_numbers = #tpu.dot_dimension_numbers<[1], [0], [0], [1], [0, 0, 1, 1], [], []>} : vector<256x192xbf16>, vector<192x64xbf16>, vector<256x64xf32> -> vector<256x64xf32>
    %c32_50 = arith.constant 32 : index
    %c0_51 = arith.constant 0 : index
    %83 = vector.load %arg11[%c32_50, %c0_51] : memref<320x192xbf16, #tpu.memory_space<vmem>>, vector<256x192xbf16>
    %c1_52 = arith.constant 1 : index
    %c0_53 = arith.constant 0 : index
    %c0_54 = arith.constant 0 : index
    %84 = vector.load %arg7[%c1_52, %c0_53, %c0_54] : memref<3x192x64xbf16, #tpu.memory_space<vmem>>, vector<1x192x64xbf16>
    %85 = vector.shape_cast %84 : vector<1x192x64xbf16> to vector<192x64xbf16>
    %cst_55 = arith.constant dense<0.000000e+00> : vector<256x64xf32>
    %86 = tpu.matmul %83, %85, %cst_55 {dimension_numbers = #tpu.dot_dimension_numbers<[1], [0], [0], [1], [0, 0, 1, 1], [], []>} : vector<256x192xbf16>, vector<192x64xbf16>, vector<256x64xf32> -> vector<256x64xf32>
    %87 = arith.addf %82, %86 : vector<256x64xf32>
    %c64_56 = arith.constant 64 : index
    %c0_57 = arith.constant 0 : index
    %88 = vector.load %arg11[%c64_56, %c0_57] : memref<320x192xbf16, #tpu.memory_space<vmem>>, vector<256x192xbf16>
    %c2_58 = arith.constant 2 : index
    %c0_59 = arith.constant 0 : index
    %c0_60 = arith.constant 0 : index
    %89 = vector.load %arg7[%c2_58, %c0_59, %c0_60] : memref<3x192x64xbf16, #tpu.memory_space<vmem>>, vector<1x192x64xbf16>
    %90 = vector.shape_cast %89 : vector<1x192x64xbf16> to vector<192x64xbf16>
    %cst_61 = arith.constant dense<0.000000e+00> : vector<256x64xf32>
    %91 = tpu.matmul %88, %90, %cst_61 {dimension_numbers = #tpu.dot_dimension_numbers<[1], [0], [0], [1], [0, 0, 1, 1], [], []>} : vector<256x192xbf16>, vector<192x64xbf16>, vector<256x64xf32> -> vector<256x64xf32>
    %92 = arith.addf %87, %91 : vector<256x64xf32>
    %c0_62 = arith.constant 0 : index
    %c0_63 = arith.constant 0 : index
    %93 = vector.load %arg8[%c0_62, %c0_63] : memref<1x64xf32, #tpu.memory_space<vmem>>, vector<1x64xf32>
    %94 = vector.broadcast %93 : vector<1x64xf32> to vector<256x64xf32>
    %95 = arith.addf %92, %94 : vector<256x64xf32>
    %cst_64 = arith.constant 0.000000e+00 : f32
    %96 = vector.broadcast %cst_64 : f32 to vector<256x64xf32>
    %97 = arith.maximumf %95, %96 : vector<256x64xf32>
    %98 = vector.shape_cast %97 : vector<256x64xf32> to vector<4x2x16x2x64xf32>
    %99 = vector.extract_strided_slice %98 {offsets = [0, 0, 0, 0, 0], sizes = [4, 1, 8, 1, 64], strides = [1, 1, 1, 1, 1]} : vector<4x2x16x2x64xf32> to vector<4x1x8x1x64xf32>
    %100 = vector.shape_cast %99 : vector<4x1x8x1x64xf32> to vector<4x8x64xf32>
    %101 = vector.extract_strided_slice %98 {offsets = [0, 1, 0, 0, 0], sizes = [4, 1, 8, 1, 64], strides = [1, 1, 1, 1, 1]} : vector<4x2x16x2x64xf32> to vector<4x1x8x1x64xf32>
    %102 = vector.shape_cast %101 : vector<4x1x8x1x64xf32> to vector<4x8x64xf32>
    %103 = vector.extract_strided_slice %98 {offsets = [0, 0, 0, 1, 0], sizes = [4, 1, 8, 1, 64], strides = [1, 1, 1, 1, 1]} : vector<4x2x16x2x64xf32> to vector<4x1x8x1x64xf32>
    %104 = vector.shape_cast %103 : vector<4x1x8x1x64xf32> to vector<4x8x64xf32>
    %105 = vector.extract_strided_slice %98 {offsets = [0, 1, 0, 1, 0], sizes = [4, 1, 8, 1, 64], strides = [1, 1, 1, 1, 1]} : vector<4x2x16x2x64xf32> to vector<4x1x8x1x64xf32>
    %106 = vector.shape_cast %105 : vector<4x1x8x1x64xf32> to vector<4x8x64xf32>
    %107 = arith.addf %100, %102 : vector<4x8x64xf32>
    %108 = arith.addf %107, %104 : vector<4x8x64xf32>
    %109 = arith.addf %108, %106 : vector<4x8x64xf32>
    %cst_65 = arith.constant 0.000000e+00 : f32
    %110 = vector.broadcast %cst_65 : f32 to vector<4x8x64xf32>
    %111 = arith.subf %110, %100 : vector<4x8x64xf32>
    %112 = arith.subf %111, %102 : vector<4x8x64xf32>
    %113 = arith.addf %112, %104 : vector<4x8x64xf32>
    %114 = arith.addf %113, %106 : vector<4x8x64xf32>
    %cst_66 = arith.constant 0.000000e+00 : f32
    %115 = vector.broadcast %cst_66 : f32 to vector<4x8x64xf32>
    %116 = arith.subf %115, %100 : vector<4x8x64xf32>
    %117 = arith.addf %116, %102 : vector<4x8x64xf32>
    %118 = arith.subf %117, %104 : vector<4x8x64xf32>
    %119 = arith.addf %118, %106 : vector<4x8x64xf32>
    %120 = arith.subf %100, %102 : vector<4x8x64xf32>
    %121 = arith.subf %120, %104 : vector<4x8x64xf32>
    %122 = arith.addf %121, %106 : vector<4x8x64xf32>
    %123 = tpu.concatenate %109, %114, %119, %122 in 2 : vector<4x8x64xf32>, vector<4x8x64xf32>, vector<4x8x64xf32>, vector<4x8x64xf32> -> vector<4x8x256xf32>
    %c0_67 = arith.constant 0 : index
    %c0_68 = arith.constant 0 : index
    %c0_69 = arith.constant 0 : index
    %c0_70 = arith.constant 0 : index
    %124 = vector.load %arg9[%c0_67, %c0_68, %c0_69, %c0_70] : memref<1x4x8x256xf32, #tpu.memory_space<vmem>>, vector<1x4x8x256xf32>
    %125 = vector.shape_cast %124 : vector<1x4x8x256xf32> to vector<4x8x256xf32>
    %126 = vector.shape_cast %123 : vector<4x8x256xf32> to vector<1x4x8x256xf32>
    tpu.vector_store %arg9[%c0_67, %c0_68, %c0_69, %c0_70], %126 {strides = array<i32>} : memref<1x4x8x256xf32, #tpu.memory_space<vmem>>, vector<1x4x8x256xf32>,
    return
  }
  func.func @transform_0(%arg0: i32, %arg1: i32) -> (i32, i32, i32, i32) {
    %c0_i32 = arith.constant 0 : i32
    %c0_i32_0 = arith.constant 0 : i32
    %c0_i32_1 = arith.constant 0 : i32
    return %arg0, %arg1, %c0_i32, %c0_i32_0 : i32, i32, i32, i32
  }
  func.func @transform_1(%arg0: i32, %arg1: i32) -> (i32, i32) {
    %c0_i32 = arith.constant 0 : i32
    %c0_i32_0 = arith.constant 0 : i32
    %c0_i32_1 = arith.constant 0 : i32
    return %c0_i32, %c0_i32_0 : i32, i32
  }
  func.func @transform_2(%arg0: i32, %arg1: i32) -> (i32, i32) {
    %c0_i32 = arith.constant 0 : i32
    %c0_i32_0 = arith.constant 0 : i32
    %c0_i32_1 = arith.constant 0 : i32
    return %c0_i32, %c0_i32_0 : i32, i32
  }
  func.func @transform_3(%arg0: i32, %arg1: i32) -> (i32, i32, i32) {
    %c0_i32 = arith.constant 0 : i32
    %c0_i32_0 = arith.constant 0 : i32
    %c0_i32_1 = arith.constant 0 : i32
    %c0_i32_2 = arith.constant 0 : i32
    return %c0_i32, %c0_i32_0, %c0_i32_1 : i32, i32, i32
  }
  func.func @transform_4(%arg0: i32, %arg1: i32) -> (i32, i32) {
    %c0_i32 = arith.constant 0 : i32
    %c0_i32_0 = arith.constant 0 : i32
    %c0_i32_1 = arith.constant 0 : i32
    return %c0_i32, %c0_i32_0 : i32, i32
  }
  func.func @transform_5(%arg0: i32, %arg1: i32) -> (i32, i32, i32) {
    %c0_i32 = arith.constant 0 : i32
    %c0_i32_0 = arith.constant 0 : i32
    %c0_i32_1 = arith.constant 0 : i32
    %c0_i32_2 = arith.constant 0 : i32
    return %c0_i32, %c0_i32_0, %c0_i32_1 : i32, i32, i32
  }
  func.func @transform_6(%arg0: i32, %arg1: i32) -> (i32, i32) {
    %c0_i32 = arith.constant 0 : i32
    %c0_i32_0 = arith.constant 0 : i32
    %c0_i32_1 = arith.constant 0 : i32
    return %c0_i32, %c0_i32_0 : i32, i32
  }
  func.func @transform_7(%arg0: i32, %arg1: i32) -> (i32, i32, i32, i32) {
    %c0_i32 = arith.constant 0 : i32
    %c0_i32_0 = arith.constant 0 : i32
    %c0_i32_1 = arith.constant 0 : i32
    return %arg0, %arg1, %c0_i32, %c0_i32_0 : i32, i32, i32, i32
  }
}

</mosaic_0001>

<bundles_post_ra>
// kernel: block_forward.1
= control target key start
LH: loop header
LB: loop body
LE: loop exit
PB: predicated region body
PF: predicated region fallthrough
CT: control target
= control target key end

     0   :  { %12 = vsyncpa [#allocation5], 0  ;;  %s10161_s0 = inlined_call_operand.vmem [shape: bf16[2,2,384,32], index: 0, kind: input, shape index: {}]   ;;  %s10162_s1 = inlined_call_operand.vmem [shape: bf16[32,64], index: 1, kind: input, shape index: {}]   ;;  %s10163_s2 = inlined_call_operand.vmem [shape: f32[1,64], index: 2, kind: input, shape index: {}]   ;;  %s10164_s3 = inlined_call_operand.vmem [shape: bf16[3,192,64], index: 3, kind: input, shape index: {}]   ;;  %s10165_s4 = inlined_call_operand.vmem [shape: f32[1,64], index: 4, kind: input, shape index: {}]   ;;  %s10166_s5 = inlined_call_operand.vmem [shape: bf16[3,192,64], index: 5, kind: input, shape index: {}]   ;;  %s10167_s6 = inlined_call_operand.vmem [shape: f32[1,64], index: 6, kind: input, shape index: {}]   ;;  %s10168_s7 = inlined_call_operand.hbm [shape: f32[2,8,8,256], index: 7, kind: output, shape index: {}]  }
   0x1   :  { %14 = vsyncpa [#allocation5 + $0x1], 0  ;;  %s6893_s24 = smov 0   ;;  %s6895_s25 = smov 0  }
   0x2   :  { %s6897_s26 = smov 0   ;;  %s6899_s27 = smov 0  }
   0x3   :  { %s6901_s28 = smov 0   ;;  %s6903_s29 = smov 0  }
   0x4   :  { %s6905_s30 = smov 0   ;;  %s6907_s8 = smov 0  }
   0x5 LB: > { %s6143_s9 = sadd.s32 4294967295, %s6844_s8   ;;  %s6144_s10 = sadd.s32 4294967294, %s6844_s8   ;;  %s6844_s8 = sphi %s6907_s8, %s20_s8   ;;  %s6840_s30 = sphi %s6905_s30, %s10744_s30   ;;  %s6836_s29 = sphi %s6903_s29, %s10743_s29   ;;  %s6832_s28 = sphi %s6901_s28, %s10742_s28   ;;  %s6828_s27 = sphi %s6899_s27, %s10741_s27   ;;  %s6824_s26 = sphi %s6897_s26, %s10740_s26   ;;  %s6820_s25 = sphi %s6895_s25, %s10739_s25   ;;  %s6816_s24 = sphi %s6893_s24, %s10738_s24  }
   0x6   : > { %s29_s11 = sadd.s32 1, %s6836_s29  ;;  %s32_s12 = sadd.s32 1, %s6840_s30 }
   0x7   : > { %p30_p0 = scmp.ge.s32.totalorder %s29_s11, 2  ;;  %p205_p1 = scmp.ne.s32.totalorder %s6824_s26, %s6820_s25 }
   0x8   : > { %p206_p2 = scmp.eq.s32.totalorder %s6143_s9, 3  ;;  %p211_p5 = scmp.ne.s32.totalorder %s6820_s25, %s6816_s24 }
   0x9   : > { %s10746_s11 = smov (%p30_p0, %s29_s11), 0  ;;  %s10748_s12 = smov (!%p30_p0, %s32_s12), %s6840_s30 }
   0xa   : > { %s191_s13 = ssub.s32 %s6836_s29, %s10746_s11  ;;  %p6944_p3 = por %p206_p2, %p205_p1 }
   0xb   : > { %p34_p4 = scmp.ge.s32.totalorder %s10748_s12, 2  ;;  %p212_p6 = scmp.eq.s32.totalorder %s6144_s10, 3 }
   0xc   : > { %p6147_p7 = scmp.ge.s32.totalorder %s6844_s8, 1  ;;  %p260_p9 = scmp.lt.s32.totalorder %s6844_s8, 5 }
   0xd   : > { %s10750_s12 = smov (%p34_p4, %s10748_s12), 0  ;;  %p6953_p8 = por %p212_p6, %p211_p5 }
   0xe   : > { %s190_s16 = ssub.s32 %s6840_s30, %s10750_s12  ;;  %s195_s17 = sadd.s32 1, %s6824_s26 }
   0xf   : > { %s192_s18 = sor.u32 %s191_s13, %s190_s16  ;;  %p261_p10 = pnand %p6147_p7, %p260_p9 }
  0x10   : > { %p193_p11 = scmp.eq.s32.totalorder %s192_s18, 0 }
  0x11   : > { %264 = sbr.rel (%p261_p10) target bundleno = 1564 (0x61c), region = 48 }
  0x12   : > { %s6962_s19 = scalar_select %p193_p11, %s6824_s26, %s195_s17  }
  0x18   : > { %v6651_v0 = vld [vmem:[%s10162_s1] sm:$0xff]   ;;  %p296_p12 = scmp.lt.s32.totalorder %s6832_s28, 1  ;;  %v6652_v1 = vld [vmem:[%s10162_s1 + $0x8] sm:$0xff]   ;;  %p298_p13 = scmp.lt.s32.totalorder %s6828_s27, 1  ;;  %vm499_vm0 = vcmask 261120   ;;  %v6846_v24 = vmov 0  }
  0x19   : > { %6516 = vmatprep.subr.bf16.mxu0 %v6651_v0  ;;  %6568 = vmatprep.subr.bf16.mxu1 %v6651_v0  ;;  %v6677_v27 = vld [vmem:[%s10164_s3 + $0x60] sm:$0xff]   ;;  %v6678_v28 = vld [vmem:[%s10164_s3 + $0x68] sm:$0xff]   ;;  %v6679_v29 = vld [vmem:[%s10164_s3 + $0x70] sm:$0xff]   ;;  %s7070_s23 = sshll.u32 %s6828_s27, 3  ;;  %vm1278_vm4 = vsmask.f32 7424 }
  0x1a   : > { %s297_s9 = scalar_select %p296_p12, %s6832_s28, 1  ;;  %6517 = vmatpush3.bf16.msra.mxu0 %v6651_v0  ;;  %6570 = vmatpush3.bf16.msra.mxu1 %v6651_v0  ;;  %v6680_v30 = vld [vmem:[%s10164_s3 + $0x78] sm:$0xff]   ;;  %v6681_v31 = vld [vmem:[%s10164_s3 + $0x80] sm:$0xff]   ;;  %v6682_v32 = vld [vmem:[%s10164_s3 + $0x88] sm:$0xff]   ;;  %v7090_v50 = vrot.slane %v6846_v24, 7  ;;  %v7096_v52 = vrot.slane %v6846_v24, 1 }
  0x1b   : > { %s299_s10 = scalar_select %p298_p13, %s6828_s27, 1  ;;  %6518 = vmatprep.subr.bf16.mxu0 %v6652_v1  ;;  %6569 = vmatprep.subr.bf16.mxu1 %v6652_v1  ;;  %v6683_v33 = vld [vmem:[%s10164_s3 + $0x90] sm:$0xff]   ;;  %v6684_v34 = vld [vmem:[%s10164_s3 + $0x98] sm:$0xff]   ;;  %v6685_v35 = vld [vmem:[%s10164_s3 + $0xa0] sm:$0xff]   ;;  %vm1377_vm7 = vcmask 523264   ;;  %vm1275_vm13 = vcmask 1040384  }
  0x1c   : > { %s6573_s13 = smul.u32 96, %s297_s9  ;;  %v6686_v36 = vld [vmem:[%s10164_s3 + $0xa8] sm:$0xff]   ;;  %s6202_s9 = sadd.s32 4294967294, %s7070_s23  ;;  %v7076_v37 = vld [vmem:[%s10163_s2] ss:$0 sm:$0xff]  ;;  %v6687_v51 = vld [vmem:[%s10164_s3 + $0xb0] sm:$0xff]  }
  0x1d   : > { %s6572_s16 = smul.u32 48, %s299_s10  ;;  %v7078_v38 = vstv %s6202_s9  ;;  %vm1059_vm9 = vsmask.f32 256  ;;  %v6688_v57 = vld [vmem:[%s10164_s3 + $0xb8] sm:$0xff]   ;;  %s6847_s20 = smov 64  }
  0x1e   : > { %6519 = vmatpush3.bf16.msra.mxu0 %v6652_v1  ;;  %6571 = vmatpush3.bf16.msra.mxu1 %v6652_v1  ;;  %vm867_vm1 = vcmp.ge.s32.totalorder %v7078_v38, 0  ;;  %vm927_vm2 = vcmp.lt.s32.totalorder %v7078_v38, 16  ;;  %v852_v43 = vadd.s32 1, %v7078_v38  ;;  %v857_v45 = vadd.s32 6, %v7078_v38  ;;  %s6485_s10 = sshll.u32 %s6832_s28, 4 }
  0x1f   : > { %s302_s17 = sadd.s32 %s6573_s13, %s6572_s16  ;;  %1772 = vmatprep.subr.bf16.mxu1 %v6846_v24  ;;  %2043 = vmatprep.subr.bf16.mxu0 %v6846_v24  ;;  %vm939_vm3 = vmand %vm867_vm1, %vm927_vm2  ;;  %v7087_v48 = vadd.s32 2, %v7078_v38  ;;  %v858_v1 = vadd.s32 7, %v7078_v38  ;;  %s6055_s13 = sadd.s32 %s6485_s10, %s7070_s23 }
  0x20   : > { %s6149_s18 = sshll.u32 %s302_s17, 2  ;;  %vm868_vm5 = vcmp.ge.s32.totalorder %v852_v43, 0  ;;  %vm928_vm6 = vcmp.lt.s32.totalorder %v852_v43, 16  ;;  %vm873_vm8 = vcmp.ge.s32.totalorder %v857_v45, 0  ;;  %vm933_vm10 = vcmp.lt.s32.totalorder %v857_v45, 16  ;;  %vm7142_vm1 = vmand %vm1275_vm13, %vm1059_vm9  ;;  %s6348_s17 = sadd.s32 4294967295, %s7070_s23 }
  0x21   : > { %s6977_s22 = scalar_lea.vmem %s10161_s0, %s6149_s18  ;;  %vm869_vm11 = vcmp.ge.s32.totalorder %v7087_v48, 0  ;;  %vm929_vm12 = vcmp.lt.s32.totalorder %v7087_v48, 16  ;;  %vm7116_vm14 = vmand %vm873_vm8, %vm933_vm10  ;;  %v7180_v45 = vadd.s32 10, %v7078_v38  ;;  %s6486_s16 = sshll.u32 %s6055_s13, 7 }
  0x22   : > { %v6653_v2 = vld [vmem:[%s6977_s22] sm:$0xff]   ;;  %v6654_v3 = vld [vmem:[%s6977_s22 + $0x8] sm:$0xff]   ;;  %v6655_v4 = vld [vmem:[%s6977_s22 + $0x10] sm:$0xff]   ;;  %s10103_s23 = scalar_lea.hbm %s10168_s7, %s6486_s16 }
  0x23   : > { %6520 = vmatprep.mubr.msk.bf16.mxu0 %vm499_vm0, %v6653_v2  ;;  %v6656_v5 = vld [vmem:[%s6977_s22 + $0x18] sm:$0xff]   ;;  %v6657_v6 = vld [vmem:[%s6977_s22 + $0x20] sm:$0xff]   ;;  %v6662_v8 = vld [vmem:[%s6977_s22 + $0x68] sm:$0xff]  }
  0x24   : > { %6521 = vmatmul.mubr.msk.bf16.vlgmr.msra.gmra.mrb[0].mxu0 %vm499_vm0, %v6654_v3  ;;  %v6661_v7 = vld [vmem:[%s6977_s22 + $0x60] sm:$0xff]   ;;  %v6665_v9 = vld [vmem:[%s6977_s22 + $0x70] sm:$0xff]   ;;  %v6658_v10 = vld [vmem:[%s6977_s22 + $0x28] sm:$0xff]  }
  0x25   : > { %6524 = vmatprep.mubr.msk.bf16.mxu0 %vm499_vm0, %v6655_v4  ;;  %6544 = vmatprep.mubr.msk.bf16.mxu1 %vm499_vm0, %v6661_v7  ;;  %v6659_v11 = vld [vmem:[%s6977_s22 + $0x30] sm:$0xff]   ;;  %v6666_v12 = vld [vmem:[%s6977_s22 + $0x78] sm:$0xff]   ;;  %v6669_v13 = vld [vmem:[%s6977_s22 + $0x80] sm:$0xff]  }
  0x26   : > { %6545 = vmatmul.mubr.msk.bf16.vlgmr.msra.gmra.mrb[0].mxu1 %vm499_vm0, %v6662_v8  ;;  %v6660_v14 = vld [vmem:[%s6977_s22 + $0x38] sm:$0xff]   ;;  %v6670_v15 = vld [vmem:[%s6977_s22 + $0x88] sm:$0xff]   ;;  %v6663_v16 = vld [vmem:[%s6977_s22 + $0x40] sm:$0xff]   ;;  %v7121_v8 = vadd.s32 8, %v7078_v38 }
  0x27   : > { %6548 = vmatprep.mubr.msk.bf16.mxu1 %vm499_vm0, %v6665_v9  ;;  %v6671_v17 = vld [vmem:[%s6977_s22 + $0x90] sm:$0xff]   ;;  %v6664_v18 = vld [vmem:[%s6977_s22 + $0x48] sm:$0xff]   ;;  %v6672_v19 = vld [vmem:[%s6977_s22 + $0x98] sm:$0xff]   ;;  %1773 = vmatpush1.bf16.msra.mxu1 %v6677_v27 }
  0x28   : > { %v6667_v20 = vld [vmem:[%s6977_s22 + $0x50] sm:$0xff]   ;;  %v6673_v21 = vld [vmem:[%s6977_s22 + $0xa0] sm:$0xff]   ;;  %v6668_v22 = vld [vmem:[%s6977_s22 + $0x58] sm:$0xff]   ;;  %1774 = vmatprep.subr.bf16.mxu1 %v6846_v24  ;;  %vm935_vm8 = vcmp.lt.s32.totalorder %v7121_v8, 16 }
  0x29   : > { %v6674_v23 = vld [vmem:[%s6977_s22 + $0xa8] sm:$0xff]   ;;  %v6675_v25 = vld [vmem:[%s6977_s22 + $0xb0] sm:$0xff]   ;;  %v6676_v26 = vld [vmem:[%s6977_s22 + $0xb8] sm:$0xff]  }
  0x2a   : > { %vm7127_vm15 = vmand %vm868_vm5, %vm928_vm6  ;;  %vm934_vm5 = vcmp.lt.s32.totalorder %v858_v1, 16  ;;  %vm875_vm6 = vcmp.ge.s32.totalorder %v7121_v8, 0 }
  0x2b   : > { %1775 = vmatpush1.bf16.msra.mxu1 %v6678_v28  ;;  %vm7171_vm10 = vmand %vm869_vm11, %vm929_vm12 }
  0x2c   : > { %6525 = vmatmul.mubr.msk.bf16.gmra.mrb[4].mxu0 %vm499_vm0, %v6656_v5  ;;  %1776 = vmatprep.subr.bf16.mxu1 %v6846_v24  ;;  %v7112_v5 = vadd.s32 3, %v7078_v38 }
  0x2d   : > { %6528 = vmatprep.mubr.msk.bf16.mxu0 %vm499_vm0, %v6657_v6 }
  0x2e   : > { %6549 = vmatmul.mubr.msk.bf16.gmra.mrb[4].mxu1 %vm499_vm0, %v6666_v12  ;;  %vm870_vm2 = vcmp.ge.s32.totalorder %v7112_v5, 0 }
  0x2f   : > { %6552 = vmatprep.mubr.msk.bf16.mxu1 %vm499_vm0, %v6669_v13  ;;  %1777 = vmatpush1.bf16.msra.mxu1 %v6679_v29 }
  0x30   : > { %1778 = vmatprep.subr.bf16.mxu1 %v6846_v24 }
  0x33   : > { %1779 = vmatpush1.bf16.msra.mxu1 %v6680_v30 }
  0x34   : > { %6529 = vmatmul.mubr.msk.bf16.gmra.mrb[8].mxu0 %vm499_vm0, %v6658_v10  ;;  %1780 = vmatprep.subr.bf16.mxu1 %v6846_v24 }
  0x35   : > { %6532 = vmatprep.mubr.msk.bf16.mxu0 %vm499_vm0, %v6659_v11 }
  0x36   : > { %6553 = vmatmul.mubr.msk.bf16.gmra.mrb[8].mxu1 %vm499_vm0, %v6670_v15  ;;  %v7132_v15 = vadd.s32 4, %v7078_v38 }
  0x37   : > { %6556 = vmatprep.mubr.msk.bf16.mxu1 %vm499_vm0, %v6671_v17  ;;  %1781 = vmatpush1.bf16.msra.mxu1 %v6681_v31 }
  0x38   : > { %1782 = vmatprep.subr.bf16.mxu1 %v6846_v24  ;;  %vm871_vm12 = vcmp.ge.s32.totalorder %v7132_v15, 0  ;;  %vm931_vm13 = vcmp.lt.s32.totalorder %v7132_v15, 16 }
  0x3b   : > { %1783 = vmatpush1.bf16.msra.mxu1 %v6682_v32 }
  0x3c   : > { %6533 = vmatmul.mubr.msk.bf16.gmra.mrb[12].mxu0 %vm499_vm0, %v6660_v14  ;;  %1784 = vmatprep.subr.bf16.mxu1 %v6846_v24 }
  0x3d   : > { %6536 = vmatprep.mubr.msk.bf16.mxu0 %vm499_vm0, %v6663_v16  ;;  %v7135_v16 = vadd.s32 5, %v7078_v38 }
  0x3e   : > { %6557 = vmatmul.mubr.msk.bf16.gmra.mrb[12].mxu1 %vm499_vm0, %v6672_v19 }
  0x3f   : > { %6560 = vmatprep.mubr.msk.bf16.mxu1 %vm499_vm0, %v6673_v21  ;;  %1785 = vmatpush1.bf16.msra.mxu1 %v6683_v33 }
  0x40   : > { %1786 = vmatprep.subr.bf16.mxu1 %v6846_v24 }
  0x43   : > { %1787 = vmatpush1.bf16.msra.mxu1 %v6684_v34 }
  0x44   : > { %6537 = vmatmul.mubr.msk.bf16.gmra.mrb[16].mxu0 %vm499_vm0, %v6664_v18  ;;  %1788 = vmatprep.subr.bf16.mxu1 %v6846_v24 }
  0x45   : > { %6540 = vmatprep.mubr.msk.bf16.mxu0 %vm499_vm0, %v6667_v20 }
  0x46   : > { %6561 = vmatmul.mubr.msk.bf16.gmra.mrb[16].mxu1 %vm499_vm0, %v6674_v23 }
  0x47   : > { %6564 = vmatprep.mubr.msk.bf16.mxu1 %vm499_vm0, %v6675_v25  ;;  %1789 = vmatpush1.bf16.msra.mxu1 %v6685_v35 }
  0x48   : > { %1790 = vmatprep.subr.bf16.mxu1 %v6846_v24 }
  0x4b   : > { %1791 = vmatpush1.bf16.msra.mxu1 %v6686_v36 }
  0x4c   : > { %6541 = vmatmul.mubr.msk.bf16.gmra.mrb[20].mxu0 %vm499_vm0, %v6668_v22  ;;  %1792 = vmatprep.subr.bf16.mxu1 %v6846_v24 }
  0x4e   : > { %6565 = vmatmul.mubr.msk.bf16.gmra.mrb[20].mxu1 %vm499_vm0, %v6676_v26  ;;  %vm874_vm0 = vcmp.ge.s32.totalorder %v858_v1, 0 }
  0x4f   : > { %1793 = vmatpush1.bf16.msra.mxu1 %v6687_v51  ;;  %vm7186_vm11 = vmand %vm874_vm0, %vm934_vm5  ;;  %vm932_vm5 = vcmp.lt.s32.totalorder %v7135_v16, 16 }
  0x50   : > { %1794 = vmatprep.subr.bf16.mxu1 %v6846_v24 }
  0x53   : > { %1795 = vmatpush1.bf16.msra.mxu1 %v6688_v57 }
  0x54   : > { %2433 = vmatprep.subr.bf16.mxu1 %v6846_v24 }
  0xf7   : > { %v6522_v39 = vpop.f32.mrb[0].mxu0 }
  0xf8   : > { %v606_v40 = vpop.f32.mrb[1].mxu0 }
  0xf9   : > { %v607_v41 = vadd.f32 %v7076_v37, %v606_v40  ;;  %v6523_v42 = vpop.f32.mrb[2].mxu0  ;;  %v6546_v56 = vpop.f32.mrb[0].mxu1 }
  0xfa   : > { %v609_v44 = vpop.f32.mrb[3].mxu0  ;;  %v702_v60 = vpop.f32.mrb[1].mxu1 }
  0xfb   : > { %v797_v46 = vmax.f32 %v607_v41, 0.0  ;;  %v610_v47 = vadd.f32 %v7076_v37, %v609_v44  ;;  %v703_v63 = vadd.f32 %v7076_v37, %v702_v60  ;;  %v6547_v0 = vpop.f32.mrb[2].mxu1  ;;  %v7177_v44 = vadd.s32 9, %v7078_v38 }
  0xfc   : > { %v705_v7 = vpop.f32.mrb[3].mxu1 }
  0xfd   : > { %v798_v49 = vmax.f32 %v610_v47, 0.0  ;;  %v987_v53 = vsel %vm939_vm3, %v797_v46, 0.0  ;;  %v821_v11 = vmax.f32 %v703_v63, 0.0  ;;  %v706_v12 = vadd.f32 %v7076_v37, %v705_v7 }
  0xff   : > { %v988_v54 = vsel %vm939_vm3, %v798_v49, 0.0  ;;  %v6526_v55 = vpop.f32.mrb[4].mxu0  ;;  %v1011_v19 = vsel %vm7116_vm14, %v821_v11, 0.0  ;;  %v822_v20 = vmax.f32 %v706_v12, 0.0  ;;  %vm930_vm3 = vcmp.lt.s32.totalorder %v7112_v5, 16 }
 0x100   : > { %v7101_v58 = vpack.c.bf16 %v988_v54, %v987_v53  ;;  %v622_v59 = vpop.f32.mrb[5].mxu0  ;;  %vm7239_vm0 = vmand %vm870_vm2, %vm930_vm3  ;;  %vm872_vm3 = vcmp.ge.s32.totalorder %v7135_v16, 0 }
 0x101   : > { %v623_v61 = vadd.f32 %v7076_v37, %v622_v59  ;;  %v6527_v62 = vpop.f32.mrb[6].mxu0  ;;  %v1012_v29 = vsel %vm7116_vm14, %v822_v20, 0.0  ;;  %v6550_v30 = vpop.f32.mrb[4].mxu1  ;;  %vm876_vm14 = vcmp.ge.s32.totalorder %v7177_v44, 0  ;;  %v6691_v20 = vld [vmem:[%s10164_s3 + $0x8] sm:$0xff]   ;;  %vm7255_vm2 = vmand %vm875_vm6, %vm935_vm8  ;;  %vm877_vm6 = vcmp.ge.s32.totalorder %v7180_v45, 0 }
 0x102   : > { %v1061_v2 = vshrl.u32 %v7101_v58, 16  ;;  %v1064_v3 = vshll.u32 %v7101_v58, 16  ;;  %v625_v4 = vpop.f32.mrb[7].mxu0  ;;  %v718_v34 = vpop.f32.mrb[5].mxu1  ;;  %v7161_v35 = vpack.c.bf16 %v1012_v29, %v1011_v19  ;;  %vm937_vm8 = vcmp.lt.s32.totalorder %v7180_v45, 16 }
 0x103   : > { %v801_v9 = vmax.f32 %v623_v61, 0.0  ;;  %v626_v10 = vadd.f32 %v7076_v37, %v625_v4  ;;  %v719_v42 = vadd.f32 %v7076_v37, %v718_v34  ;;  %v6551_v43 = vpop.f32.mrb[6].mxu1  ;;  %v6690_v4 = vld [vmem:[%s10164_s3] sm:$0xff]  }
 0x104   : > { %v1279_v13 = vrot.slane %v1064_v3, 1  ;;  %v1063_v17 = vrot.slane %v1061_v2, 7  ;;  %v721_v51 = vpop.f32.mrb[7].mxu1  ;;  %v1156_v53 = vshrl.u32 %v7161_v35, 16  ;;  %v1159_v54 = vshll.u32 %v7161_v35, 16  ;;  %2044 = vmatpush1.bf16.msra.mxu0 %v6690_v4 }
 0x105   : > { %v802_v18 = vmax.f32 %v626_v10, 0.0  ;;  %v991_v26 = vsel %vm7127_vm15, %v801_v9, 0.0  ;;  %v825_v57 = vmax.f32 %v719_v42, 0.0  ;;  %v722_v59 = vadd.f32 %v7076_v37, %v721_v51  ;;  %2045 = vmatprep.subr.bf16.mxu0 %v6846_v24 }
 0x106   : > { %v1280_v22 = vor.u32 %v1279_v13, %v1061_v2  ;;  %v1066_v23 = vor.u32 %v1064_v3, %v1063_v17  ;;  %v1074_v25 = vsel %vm1059_vm9, %v1063_v17, %v7090_v50  ;;  %v7194_v62 = vrot.slane %v1156_v53, 7 }
 0x107   : > { %v992_v27 = vsel %vm7127_vm15, %v802_v18, 0.0  ;;  %v6530_v28 = vpop.f32.mrb[8].mxu0  ;;  %1379 = vst.msk [vmem:[#allocation2 + $0x10] sm:$0xff] %vm1377_vm7, %v1074_v25  ;;  %v1314_v63 = vrot.slane %v1159_v54, 1  ;;  %v1015_v2 = vsel %vm7186_vm11, %v825_v57, 0.0  ;;  %v826_v3 = vmax.f32 %v722_v59, 0.0 }
 0x108   : > { %v1282_v31 = vsel %vm1278_vm4, %v1280_v22, %v7096_v52  ;;  %v1037_v32 = vpack.c.bf16 %v992_v27, %v991_v26  ;;  %v638_v33 = vpop.f32.mrb[9].mxu0  ;;  %v1277_v36 = vsel %vm7142_vm1, 0, %v1066_v23  ;;  %v6848_v9 = vmov 0.0|0.0   ;;  %2046 = vmatpush1.bf16.msra.mxu0 %v6691_v20 }
 0x109   : > { %1523 = vst.msk [vmem:[#allocation2 + $0x8] sm:$0xff] %vm1377_vm7, %v1282_v31  ;;  %v639_v39 = vadd.f32 %v7076_v37, %v638_v33  ;;  %v6531_v41 = vpop.f32.mrb[10].mxu0  ;;  %1378 = vst.msk [vmem:[#allocation2] sm:$0xff] %vm1377_vm7, %v1277_v36  ;;  %v1315_v10 = vsel %vm1278_vm4, %v7096_v52, %v1314_v63  ;;  %v1316_v11 = vor.u32 %v1314_v63, %v1156_v53  ;;  %v1016_v14 = vsel %vm7186_vm11, %v826_v3, 0.0  ;;  %v6554_v17 = vpop.f32.mrb[8].mxu1  ;;  %v6693_v63 = vld [vmem:[%s10164_s3 + $0x10] sm:$0xff]  }
 0x10a   : > { %1430 = vrot.lane.b32.xlu0 %v1037_v32, %s6847_s20  ;;  %v1076_v46 = vshrl.u32 %v1037_v32, 16  ;;  %v1079_v47 = vshll.u32 %v1037_v32, 16  ;;  %v641_v48 = vpop.f32.mrb[11].mxu0  ;;  %1534 = vst.msk [vmem:[#allocation2 + $0xb8] sm:$0xff] %vm1377_vm7, %v1315_v10  ;;  %vm936_vm15 = vcmp.lt.s32.totalorder %v7177_v44, 16  ;;  %v734_v27 = vpop.f32.mrb[9].mxu1  ;;  %v7228_v29 = vpack.c.bf16 %v1016_v14, %v1015_v2  ;;  %2047 = vmatprep.subr.bf16.mxu0 %v6846_v24 }
 0x10b   : > { %v805_v55 = vmax.f32 %v639_v39, 0.0  ;;  %v642_v56 = vadd.f32 %v7076_v37, %v641_v48  ;;  %v1318_v28 = vsel %vm1278_vm4, %v1316_v11, %v7096_v52  ;;  %v735_v33 = vadd.f32 %v7076_v37, %v734_v27  ;;  %v6555_v34 = vpop.f32.mrb[10].mxu1  ;;  %vm7333_vm11 = vmand %vm876_vm14, %vm936_vm15 }
 0x10c   : > { %v1078_v60 = vrot.slane %v1076_v46, 7  ;;  %v1284_v61 = vrot.slane %v1079_v47, 1  ;;  %1535 = vst.msk [vmem:[#allocation2 + $0xc8] sm:$0xff] %vm1377_vm7, %v1318_v28  ;;  %v7248_v39 = vor.u32 %v1159_v54, %v7194_v62  ;;  %v737_v43 = vpop.f32.mrb[11].mxu1  ;;  %2048 = vmatpush1.bf16.msra.mxu0 %v6693_v63  ;;  %vm1498_vm14 = vcmask 1048064  }
 0x10d   : > { %v995_v0 = vsel %vm7171_vm10, %v805_v55, 0.0  ;;  %v806_v1 = vmax.f32 %v642_v56, 0.0  ;;  %v829_v51 = vmax.f32 %v735_v33, 0.0  ;;  %v738_v53 = vadd.f32 %v7076_v37, %v737_v43  ;;  %2049 = vmatprep.subr.bf16.mxu0 %v6846_v24 }
 0x10e   : > { %v1285_v6 = vsel %vm1278_vm4, %v7096_v52, %v1284_v61  ;;  %v1286_v7 = vor.u32 %v1284_v61, %v1076_v46  ;;  %1432 = vrot.lane.b32.xlu0 %v6848_v9, %s6847_s20  ;;  %v1081_v18 = vor.u32 %v1079_v47, %v1078_v60  ;;  %v1090_v19 = vsel %vm1059_vm9, %v1078_v60, %v7090_v50 }
 0x10f   : > { %1524 = vst.msk [vmem:[#allocation2 + $0x18] sm:$0xff] %vm1377_vm7, %v1285_v6  ;;  %v996_v12 = vsel %vm7171_vm10, %v806_v1, 0.0  ;;  %v6534_v13 = vpop.f32.mrb[12].mxu0  ;;  %1381 = vst.msk [vmem:[#allocation2 + $0x30] sm:$0xff] %vm1377_vm7, %v1090_v19  ;;  %v1172_v46 = vshrl.u32 %v7228_v29, 16  ;;  %v1175_v47 = vshll.u32 %v7228_v29, 16 }
 0x110   : > { %v1288_v22 = vsel %vm1278_vm4, %v1286_v7, %v7096_v52  ;;  %v1548_v23 = vld [vmem:[#allocation2 + $0x8] sm:$0xff]  ;;  %v1039_v25 = vpack.c.bf16 %v996_v12, %v995_v0  ;;  %v654_v26 = vpop.f32.mrb[13].mxu0  ;;  %v1082_v36 = vsel %vm1059_vm9, %v7090_v50, %v1081_v18  ;;  %v1019_v60 = vsel %vm7255_vm2, %v829_v51, 0.0  ;;  %v6694_v13 = vld [vmem:[%s10164_s3 + $0x18] sm:$0xff]   ;;  %vm7315_vm10 = vmand %vm871_vm12, %vm931_vm13 }
 0x111   : > { %1525 = vst.msk [vmem:[#allocation2 + $0x28] sm:$0xff] %vm1377_vm7, %v1288_v22  ;;  %6271 = vmatprep.mubr.msk.bf16.mxu0 %vm1377_vm7, %v1548_v23  ;;  %v655_v30 = vadd.f32 %v7076_v37, %v654_v26  ;;  %v6535_v32 = vpop.f32.mrb[14].mxu0  ;;  %1380 = vst.msk [vmem:[#allocation2 + $0x20] sm:$0xff] %vm1377_vm7, %v1082_v36  ;;  %v7264_v55 = vrot.slane %v1172_v46, 7  ;;  %v1320_v56 = vrot.slane %v1175_v47, 1  ;;  %v830_v61 = vmax.f32 %v738_v53, 0.0  ;;  %2050 = vmatpush1.bf16.msra.mxu0 %v6694_v13 }
 0x112   : > { %1434 = vrot.lane.b32.xlu1 %v1039_v25, %s6847_s20  ;;  %v1092_v40 = vshrl.u32 %v1039_v25, 16  ;;  %v1095_v5 = vshll.u32 %v1039_v25, 16  ;;  %v657_v41 = vpop.f32.mrb[15].mxu0  ;;  %v6558_v10 = vpop.f32.mrb[12].mxu1  ;;  %v1162_v32 = vsel %vm1059_vm9, %v7090_v50, %v7248_v39  ;;  %2051 = vmatprep.subr.bf16.mxu0 %v6846_v24  ;;  %vm7382_vm12 = vmand %vm872_vm3, %vm932_vm5  ;;  %vm1374_vm3 = vcmask 1047552  }
 0x113   : > { %v809_v48 = vmax.f32 %v655_v30, 0.0  ;;  %v658_v49 = vadd.f32 %v7076_v37, %v657_v41  ;;  %v1321_v2 = vsel %vm1278_vm4, %v7096_v52, %v1320_v56  ;;  %v1322_v3 = vor.u32 %v1320_v56, %v1172_v46  ;;  %v750_v20 = vpop.f32.mrb[13].mxu1  ;;  %1390 = vst.msk [vmem:[#allocation2 + $0xc0] sm:$0xff] %vm1377_vm7, %v1162_v32  ;;  %vm7404_vm13 = vmand %vm877_vm6, %vm937_vm8 }
 0x114   : > { %v1094_v54 = vrot.slane %v1092_v40, 7  ;;  %v1290_v8 = vrot.slane %v1095_v5, 1  ;;  %v1020_v7 = vsel %vm7255_vm2, %v830_v61, 0.0  ;;  %1536 = vst.msk [vmem:[#allocation2 + $0xd8] sm:$0xff] %vm1377_vm7, %v1321_v2  ;;  %v751_v28 = vadd.f32 %v7076_v37, %v750_v20  ;;  %v6559_v30 = vpop.f32.mrb[14].mxu1  ;;  %vm1375_vm5 = vmand %vm1374_vm3, %vm1278_vm4 }
 0x115   : > { %v999_v57 = vsel %vm7239_vm0, %v809_v48, 0.0  ;;  %v810_v59 = vmax.f32 %v658_v49, 0.0  ;;  %v1324_v22 = vsel %vm1278_vm4, %v1322_v3, %v7096_v52  ;;  %v7303_v23 = vpack.c.bf16 %v1020_v7, %v1019_v60 }
 0x116   : > { %v1291_v0 = vsel %vm1278_vm4, %v7096_v52, %v1290_v8  ;;  %v1292_v1 = vor.u32 %v1290_v8, %v1092_v40  ;;  %1436 = vrot.lane.b32.xlu1 %v6848_v9, %s6847_s20  ;;  %v1097_v11 = vor.u32 %v1095_v5, %v1094_v54  ;;  %v1106_v12 = vsel %vm1059_vm9, %v1094_v54, %v7090_v50  ;;  %v753_v40 = vpop.f32.mrb[15].mxu1 }
 0x117   : > { %1526 = vst.msk [vmem:[#allocation2 + $0x38] sm:$0xff] %vm1377_vm7, %v1291_v0  ;;  %v1000_v4 = vsel %vm7239_vm0, %v810_v59, 0.0  ;;  %v6538_v6 = vpop.f32.mrb[16].mxu0  ;;  %1383 = vst.msk [vmem:[#allocation2 + $0x50] sm:$0xff] %vm1377_vm7, %v1106_v12  ;;  %v1188_v5 = vshrl.u32 %v7303_v23, 16  ;;  %v1191_v39 = vshll.u32 %v7303_v23, 16  ;;  %v754_v46 = vadd.f32 %v7076_v37, %v753_v40 }
 0x118   : > { %v1294_v14 = vsel %vm1278_vm4, %v1292_v1, %v7096_v52  ;;  %v7299_v17 = vld [vmem:[#allocation2 + $0x28] sm:$0xff]  ;;  %v670_v18 = vpop.f32.mrb[17].mxu0  ;;  %v1041_v19 = vpack.c.bf16 %v1000_v4, %v999_v57  ;;  %1537 = vst.msk [vmem:[#allocation2 + $0xe8] sm:$0xff] %vm1377_vm7, %v1324_v22  ;;  %v1098_v31 = vsel %vm1059_vm9, %v7090_v50, %v1097_v11  ;;  %v833_v43 = vmax.f32 %v751_v28, 0.0  ;;  %v6695_v57 = vld [vmem:[%s10164_s3 + $0x20] sm:$0xff]  }
 0x119   : > { %1527 = vst.msk [vmem:[#allocation2 + $0x48] sm:$0xff] %vm1377_vm7, %v1294_v14  ;;  %6239 = vmatprep.mubr.msk.bf16.mxu1 %vm1377_vm7, %v7299_v17  ;;  %v671_v25 = vadd.f32 %v7076_v37, %v670_v18  ;;  %v6539_v27 = vpop.f32.mrb[18].mxu0  ;;  %1382 = vst.msk [vmem:[#allocation2 + $0x40] sm:$0xff] %vm1377_vm7, %v1098_v31  ;;  %v7343_v49 = vrot.slane %v1188_v5, 7  ;;  %v1326_v51 = vrot.slane %v1191_v39, 1  ;;  %v834_v56 = vmax.f32 %v754_v46, 0.0  ;;  %2052 = vmatpush1.bf16.msra.mxu0 %v6695_v57 }
 0x11a   : > { %v673_v33 = vpop.f32.mrb[19].mxu0  ;;  %v1108_v34 = vshrl.u32 %v1041_v19, 16  ;;  %v1111_v15 = vshll.u32 %v1041_v19, 16  ;;  %1438 = vrot.lane.b32.xlu0 %v1041_v19, %s6847_s20  ;;  %1440 = vrot.lane.b32.xlu1 %v6848_v9, %s6847_s20  ;;  %v1023_v8 = vsel %vm7333_vm11, %v833_v43, 0.0  ;;  %v6562_v3 = vpop.f32.mrb[16].mxu1  ;;  %v6697_v27 = vld [vmem:[%s10164_s3 + $0x28] sm:$0xff]   ;;  %v1177_v16 = vor.u32 %v1175_v47, %v7264_v55 }
 0x11b   : > { %v813_v41 = vmax.f32 %v671_v25, 0.0  ;;  %v674_v42 = vadd.f32 %v7076_v37, %v673_v33  ;;  %v1327_v61 = vsel %vm1278_vm4, %v7096_v52, %v1326_v51  ;;  %v1328_v63 = vor.u32 %v1326_v51, %v1188_v5  ;;  %v766_v12 = vpop.f32.mrb[17].mxu1  ;;  %2053 = vmatprep.subr.bf16.mxu0 %v6846_v24 }
 0x11c   : > { %v1110_v44 = vrot.slane %v1108_v34, 7  ;;  %v1296_v48 = vrot.slane %v1111_v15, 1  ;;  %v1024_v2 = vsel %vm7333_vm11, %v834_v56, 0.0  ;;  %1538 = vst.msk [vmem:[#allocation2 + $0xf8] sm:$0xff] %vm1377_vm7, %v1327_v61  ;;  %v767_v22 = vadd.f32 %v7076_v37, %v766_v12  ;;  %v6563_v25 = vpop.f32.mrb[18].mxu1 }
 0x11d   : > { %v1003_v53 = vsel %vm7315_vm10, %v813_v41, 0.0  ;;  %v814_v54 = vmax.f32 %v674_v42, 0.0  ;;  %v1330_v13 = vsel %vm1278_vm4, %v1328_v63, %v7096_v52  ;;  %v7373_v14 = vpack.c.bf16 %v1024_v2, %v1023_v8  ;;  %v769_v33 = vpop.f32.mrb[19].mxu1  ;;  %2054 = vmatpush1.bf16.msra.mxu0 %v6697_v27 }
 0x11e   : > { %v1297_v59 = vsel %vm1278_vm4, %v7096_v52, %v1296_v48  ;;  %v1298_v60 = vor.u32 %v1296_v48, %v1108_v34  ;;  %1444 = vrot.lane.b32.xlu1 %v6848_v9, %s6847_s20  ;;  %v1113_v4 = vor.u32 %v1111_v15, %v1110_v44  ;;  %v1122_v6 = vsel %vm1059_vm9, %v1110_v44, %v7090_v50 }
 0x11f   : > { %v1004_v0 = vsel %vm7315_vm10, %v814_v54, 0.0  ;;  %v6542_v1 = vpop.f32.mrb[20].mxu0  ;;  %1528 = vst.msk [vmem:[#allocation2 + $0x58] sm:$0xff] %vm1377_vm7, %v1297_v59  ;;  %1385 = vst.msk [vmem:[#allocation2 + $0x70] sm:$0xff] %vm1377_vm7, %v1122_v6  ;;  %v1204_v34 = vshrl.u32 %v7373_v14, 16  ;;  %v1207_v47 = vshll.u32 %v7373_v14, 16  ;;  %v770_v5 = vadd.f32 %v7076_v37, %v769_v33  ;;  %2055 = vmatprep.subr.bf16.mxu0 %v6846_v24 }
 0x120   : > { %v686_v7 = vpop.f32.mrb[21].mxu0  ;;  %v1300_v10 = vsel %vm1278_vm4, %v1298_v60, %v7096_v52  ;;  %v1043_v11 = vpack.c.bf16 %v1004_v0, %v1003_v53  ;;  %1539 = vst.msk [vmem:[#allocation2 + $0x108] sm:$0xff] %vm1377_vm7, %v1330_v13  ;;  %v1114_v26 = vsel %vm1059_vm9, %v7090_v50, %v1113_v4  ;;  %v837_v40 = vmax.f32 %v767_v22, 0.0  ;;  %v6698_v53 = vld [vmem:[%s10164_s3 + $0x30] sm:$0xff]  }
 0x121   : > { %v687_v18 = vadd.f32 %v7076_v37, %v686_v7  ;;  %v6543_v20 = vpop.f32.mrb[22].mxu0  ;;  %1529 = vst.msk [vmem:[#allocation2 + $0x68] sm:$0xff] %vm1377_vm7, %v1300_v10  ;;  %1384 = vst.msk [vmem:[#allocation2 + $0x60] sm:$0xff] %vm1377_vm7, %v1114_v26  ;;  %v1206_v42 = vrot.slane %v1204_v34, 7  ;;  %v1332_v43 = vrot.slane %v1207_v47, 1  ;;  %v838_v51 = vmax.f32 %v770_v5, 0.0  ;;  %2056 = vmatpush1.bf16.msra.mxu0 %v6698_v53 }
 0x122   : > { %v689_v28 = vpop.f32.mrb[23].mxu0  ;;  %v1124_v30 = vshrl.u32 %v1043_v11, 16  ;;  %v1127_v31 = vshll.u32 %v1043_v11, 16  ;;  %1442 = vrot.lane.b32.xlu0 %v1043_v11, %s6847_s20  ;;  %1448 = vrot.lane.b32.xlu1 %v6848_v9, %s6847_s20  ;;  %v1027_v48 = vsel %vm7404_vm13, %v837_v40, 0.0  ;;  %v1178_v6 = vsel %vm1059_vm9, %v7090_v50, %v1177_v16  ;;  %v6699_v11 = vld [vmem:[%s10164_s3 + $0x38] sm:$0xff]  }
 0x123   : > { %v817_v15 = vmax.f32 %v687_v18, 0.0  ;;  %v690_v36 = vadd.f32 %v7076_v37, %v689_v28  ;;  %v1333_v56 = vsel %vm1278_vm4, %v7096_v52, %v1332_v43  ;;  %v1334_v57 = vor.u32 %v1332_v43, %v1204_v34  ;;  %2057 = vmatprep.subr.bf16.mxu0 %v6846_v24  ;;  %1392 = vst.msk [vmem:[#allocation2 + $0xe0] sm:$0xff] %vm1377_vm7, %v1178_v6  ;;  %v6701_v28 = vld [vmem:[%s10164_s3 + $0x40] sm:$0xff]  }
 0x124   : > { %v1126_v41 = vrot.slane %v1124_v30, 7  ;;  %v1302_v45 = vrot.slane %v1127_v31, 1  ;;  %v1028_v60 = vsel %vm7404_vm13, %v838_v51, 0.0  ;;  %1540 = vst.msk [vmem:[#allocation2 + $0x118] sm:$0xff] %vm1377_vm7, %v1333_v56  ;;  %v1170_v7 = vsel %vm1059_vm9, %v7194_v62, %v7090_v50 }
 0x125   : > { %v1007_v46 = vsel %vm7382_vm12, %v817_v15, 0.0  ;;  %v818_v44 = vmax.f32 %v690_v36, 0.0  ;;  %v1336_v2 = vsel %vm1278_vm4, %v1334_v57, %v7096_v52  ;;  %v7439_v3 = vpack.c.bf16 %v1028_v60, %v1027_v48  ;;  %1391 = vst.msk [vmem:[#allocation2 + $0xd0] sm:$0xff] %vm1377_vm7, %v1170_v7  ;;  %2058 = vmatpush1.bf16.msra.mxu0 %v6699_v11  ;;  %v7555_v60 = vld [vmem:[#allocation2 + $0x38] sm:$0xff] }
 0x126   : > { %v1303_v54 = vsel %vm1278_vm4, %v7096_v52, %v1302_v45  ;;  %v1304_v8 = vor.u32 %v1302_v45, %v1124_v30  ;;  %1452 = vrot.lane.b32.xlu1 %v6848_v9, %s6847_s20  ;;  %v1129_v61 = vor.u32 %v1127_v31, %v1126_v41  ;;  %v1138_v63 = vsel %vm1059_vm9, %v1126_v41, %v7090_v50  ;;  %v6702_v45 = vld [vmem:[%s10164_s3 + $0x48] sm:$0xff]  }
 0x127   : > { %v1008_v59 = vsel %vm7382_vm12, %v818_v44, 0.0  ;;  %1530 = vst.msk [vmem:[#allocation2 + $0x78] sm:$0xff] %vm1377_vm7, %v1303_v54  ;;  %1387 = vst.msk [vmem:[#allocation2 + $0x90] sm:$0xff] %vm1377_vm7, %v1138_v63  ;;  %v1193_v10 = vor.u32 %v1191_v39, %v7343_v49  ;;  %v1220_v18 = vshrl.u32 %v7439_v3, 16  ;;  %v1223_v19 = vshll.u32 %v7439_v3, 16  ;;  %2059 = vmatprep.subr.bf16.mxu0 %v6846_v24 }
 0x128   : > { %v1306_v0 = vsel %vm1278_vm4, %v1304_v8, %v7096_v52  ;;  %v1045_v1 = vpack.c.bf16 %v1008_v59, %v1007_v46  ;;  %1541 = vst.msk [vmem:[#allocation2 + $0x128] sm:$0xff] %vm1377_vm7, %v1336_v2  ;;  %v1130_v4 = vsel %vm1059_vm9, %v7090_v50, %v1129_v61  ;;  %v1186_v39 = vsel %vm1059_vm9, %v7264_v55, %v7090_v50  ;;  %v6689_v8 = vld [vmem:[%s10164_s3 + $0xc0] sm:$0xff]  }
 0x129   : > { %1531 = vst.msk [vmem:[#allocation2 + $0x88] sm:$0xff] %vm1377_vm7, %v1306_v0  ;;  %1386 = vst.msk [vmem:[#allocation2 + $0x80] sm:$0xff] %vm1377_vm7, %v1130_v4  ;;  %v1194_v62 = vsel %vm1059_vm9, %v7090_v50, %v1193_v10  ;;  %v1209_v20 = vor.u32 %v1207_v47, %v1206_v42  ;;  %v1202_v22 = vsel %vm1059_vm9, %v7343_v49, %v7090_v50  ;;  %v1222_v27 = vrot.slane %v1220_v18, 7  ;;  %v6696_v4 = vld [vmem:[%s10164_s3 + $0xd0] sm:$0xff]  }
 0x12a   : > { %v1140_v12 = vshrl.u32 %v1045_v1, 16  ;;  %v1143_v13 = vshll.u32 %v1045_v1, 16  ;;  %1446 = vrot.lane.b32.xlu0 %v1045_v1, %s6847_s20  ;;  %1456 = vrot.lane.b32.xlu1 %v6848_v9, %s6847_s20  ;;  %v1338_v16 = vrot.slane %v1223_v19, 1  ;;  %1394 = vst.msk [vmem:[#allocation2 + $0x100] sm:$0xff] %vm1377_vm7, %v1194_v62  ;;  %1393 = vst.msk [vmem:[#allocation2 + $0xf0] sm:$0xff] %vm1377_vm7, %v1186_v39  ;;  %v1218_v49 = vsel %vm1059_vm9, %v1206_v42, %v7090_v50  ;;  %v6703_v42 = vld [vmem:[%s10164_s3 + $0x50] sm:$0xff]  }
 0x12b   : > { %1395 = vst.msk [vmem:[#allocation2 + $0x110] sm:$0xff] %vm1377_vm7, %v1202_v22  ;;  %v1210_v55 = vsel %vm1059_vm9, %v7090_v50, %v1209_v20  ;;  %1397 = vst.msk [vmem:[#allocation2 + $0x130] sm:$0xff] %vm1377_vm7, %v1218_v49  ;;  %2060 = vmatpush1.bf16.msra.mxu0 %v6701_v28  ;;  %v1234_v36 = vsel %vm1059_vm9, %v1222_v27, %v7090_v50  ;;  %v7609_v28 = vld [vmem:[#allocation2 + $0x58] sm:$0xff]  ;;  %v6706_v49 = vld [vmem:[%s10164_s3 + $0xe8] sm:$0xff]  }
 0x12c   : > { %v1142_v25 = vrot.slane %v1140_v12, 7  ;;  %v1308_v26 = vrot.slane %v1143_v13, 1  ;;  %v1339_v32 = vsel %vm1278_vm4, %v7096_v52, %v1338_v16  ;;  %1396 = vst.msk [vmem:[#allocation2 + $0x120] sm:$0xff] %vm1377_vm7, %v1210_v55  ;;  %v1340_v33 = vor.u32 %v1338_v16, %v1220_v18  ;;  %2061 = vmatprep.subr.bf16.mxu0 %v6846_v24  ;;  %1399 = vst.msk [vmem:[#allocation2 + $0x150] sm:$0xff] %vm1377_vm7, %v1234_v36  ;;  %v7577_v18 = vld [vmem:[#allocation2 + $0x48] sm:$0xff] }
 0x12d   : > { %1542 = vst.msk [vmem:[#allocation2 + $0x138] sm:$0xff] %vm1377_vm7, %v1339_v32  ;;  %v6707_v32 = vld [vmem:[%s10164_s3 + $0xf0] sm:$0xff]  }
 0x12e   : > { %v1309_v30 = vsel %vm1278_vm4, %v7096_v52, %v1308_v26  ;;  %v1310_v31 = vor.u32 %v1308_v26, %v1140_v12  ;;  %1450 = vrot.lane.b32.xlu0 %v7161_v35, %s6847_s20  ;;  %1460 = vrot.lane.b32.xlu1 %v6848_v9, %s6847_s20  ;;  %v1145_v34 = vor.u32 %v1143_v13, %v1142_v25  ;;  %v6705_v26 = vld [vmem:[%s10164_s3 + $0xe0] sm:$0xff]  }
 0x12f   : > { %1532 = vst.msk [vmem:[#allocation2 + $0x98] sm:$0xff] %vm1377_vm7, %v1309_v30  ;;  %v1154_v47 = vsel %vm1059_vm9, %v1142_v25, %v7090_v50  ;;  %v1225_v35 = vor.u32 %v1223_v19, %v1222_v27  ;;  %v1342_v40 = vsel %vm1278_vm4, %v1340_v33, %v7096_v52  ;;  %2062 = vmatpush1.bf16.msra.mxu0 %v6702_v45  ;;  %v6700_v19 = vld [vmem:[%s10164_s3 + $0xd8] sm:$0xff]  }
 0x130   : > { %v1312_v15 = vsel %vm1278_vm4, %v1310_v31, %v7096_v52  ;;  %1389 = vst.msk [vmem:[#allocation2 + $0xb0] sm:$0xff] %vm1377_vm7, %v1154_v47  ;;  %v1146_v5 = vsel %vm1059_vm9, %v7090_v50, %v1145_v34  ;;  %1543 = vst.msk [vmem:[#allocation2 + $0x148] sm:$0xff] %vm1377_vm7, %v1342_v40  ;;  %2063 = vmatprep.subr.bf16.mxu0 %v6846_v24  ;;  %v7632_v47 = vld [vmem:[#allocation2 + $0x68] sm:$0xff]  ;;  %v6709_v40 = vld [vmem:[%s10164_s3 + $0x100] sm:$0xff]  }
 0x131   : > { %1533 = vst.msk [vmem:[#allocation2 + $0xa8] sm:$0xff] %vm1377_vm7, %v1312_v15  ;;  %v1226_v41 = vsel %vm1059_vm9, %v7090_v50, %v1225_v35  ;;  %1388 = vst.msk [vmem:[#allocation2 + $0xa0] sm:$0xff] %vm1377_vm7, %v1146_v5  ;;  %v6708_v35 = vld [vmem:[%s10164_s3 + $0xf8] sm:$0xff]  }
 0x132   : > { %1454 = vrot.lane.b32.xlu0 %v7228_v29, %s6847_s20  ;;  %1464 = vrot.lane.b32.xlu1 %v6848_v9, %s6847_s20  ;;  %1398 = vst.msk [vmem:[#allocation2 + $0x140] sm:$0xff] %vm1377_vm7, %v1226_v41  ;;  %v6704_v29 = vld [vmem:[%s10164_s3 + $0x58] sm:$0xff]  }
 0x133   : > { %2064 = vmatpush1.bf16.msra.mxu0 %v6703_v42  ;;  %v7655_v42 = vld [vmem:[#allocation2 + $0x78] sm:$0xff] }
 0x134   : > { %2065 = vmatprep.subr.bf16.mxu0 %v6846_v24 }
 0x136   : > { %1458 = vrot.lane.b32.xlu0 %v7303_v23, %s6847_s20  ;;  %1468 = vrot.lane.b32.xlu1 %v6848_v9, %s6847_s20  ;;  %v6566_v23 = vpop.f32.mrb[20].mxu1 }
 0x137   : > { %2066 = vmatpush1.bf16.msra.mxu0 %v6704_v29  ;;  %v782_v46 = vpop.f32.mrb[21].mxu1  ;;  %v6710_v29 = vld [vmem:[%s10164_s3 + $0x108] sm:$0xff]  }
 0x138   : > { %3529 = vmatprep.subr.bf16.mxu0 %v6846_v24  ;;  %v783_v44 = vadd.f32 %v7076_v37, %v782_v46  ;;  %v6567_v48 = vpop.f32.mrb[22].mxu1 }
 0x139   : > { %v785_v53 = vpop.f32.mrb[23].mxu1 }
 0x13a   : > { %1462 = vrot.lane.b32.xlu0 %v7373_v14, %s6847_s20  ;;  %1428 = vrot.lane.b32.xlu1 %v6848_v9, %s6847_s20  ;;  %v862_v14 = vadd.s32 11, %v7078_v38  ;;  %v841_v54 = vmax.f32 %v783_v44, 0.0 }
 0x13c   : > { %vm878_vm15 = vcmp.ge.s32.totalorder %v862_v14, 0  ;;  %vm938_vm0 = vcmp.lt.s32.totalorder %v862_v14, 16  ;;  %v6711_v14 = vld [vmem:[%s10164_s3 + $0x110] sm:$0xff]  }
 0x13d   : > { %vm983_vm2 = vmand %vm878_vm15, %vm938_vm0 }
 0x13e   : > { %1466 = vrot.lane.b32.xlu0 %v7439_v3, %s6847_s20  ;;  %v1031_v56 = vsel %vm983_vm2, %v841_v54, 0.0 }
 0x142   : > { %1426 = vrot.lane.b32.xlu0 %v7101_v58, %s6847_s20  ;;  %v786_v58 = vadd.f32 %v7076_v37, %v785_v53  ;;  %v6692_v37 = vld [vmem:[%s10164_s3 + $0xc8] sm:$0xff]   ;;  %v6712_v53 = vld [vmem:[%s10164_s3 + $0x118] sm:$0xff]  }
 0x144   : > { %v842_v57 = vmax.f32 %v786_v58, 0.0 }
 0x146   : > { %v1032_v61 = vsel %vm983_vm2, %v842_v57, 0.0 }
 0x147   : > { %v1057_v63 = vpack.c.bf16 %v1032_v61, %v1031_v56  ;;  %v7691_v56 = vld [vmem:[#allocation2 + $0x98] sm:$0xff]  ;;  %v7698_v61 = vld [vmem:[#allocation2 + $0xa8] sm:$0xff] }
 0x149   : > { %v1236_v1 = vshrl.u32 %v1057_v63, 16  ;;  %v1239_v2 = vshll.u32 %v1057_v63, 16  ;;  %1470 = vrot.lane.b32.xlu0 %v1057_v63, %s6847_s20 }
 0x14b   : > { %v1344_v6 = vrot.slane %v1239_v2, 1  ;;  %v1238_v7 = vrot.slane %v1236_v1, 7 }
 0x14d   : > { %v1345_v12 = vsel %vm1278_vm4, %v7096_v52, %v1344_v6  ;;  %v1346_v13 = vor.u32 %v1344_v6, %v1236_v1  ;;  %3230 = vrot.lane.b32.xlu0 %v6848_v9, %s6847_s20  ;;  %v1241_v39 = vor.u32 %v1239_v2, %v1238_v7  ;;  %v1250_v25 = vsel %vm1059_vm9, %v1238_v7, %v7090_v50  ;;  %v7706_v1 = vld [vmem:[#allocation2 + $0xb8] sm:$0xff] }
 0x14e   : > { %1544 = vst.msk [vmem:[#allocation2 + $0x158] sm:$0xff] %vm1377_vm7, %v1345_v12  ;;  %1401 = vst.msk [vmem:[#allocation2 + $0x170] sm:$0xff] %vm1377_vm7, %v1250_v25  ;;  %v7746_v7 = vld [vmem:[#allocation2 + $0xf8] sm:$0xff] }
 0x14f   : > { %v1348_v62 = vsel %vm1278_vm4, %v1346_v13, %v7096_v52  ;;  %v1242_v22 = vsel %vm1059_vm9, %v7090_v50, %v1241_v39  ;;  %v7766_v13 = vld [vmem:[#allocation2 + $0x118] sm:$0xff] }
 0x150   : > { %1545 = vst.msk [vmem:[#allocation2 + $0x168] sm:$0xff] %vm1377_vm7, %v1348_v62  ;;  %1400 = vst.msk [vmem:[#allocation2 + $0x160] sm:$0xff] %vm1377_vm7, %v1242_v22  ;;  %v7776_v62 = vld [vmem:[#allocation2 + $0x128] sm:$0xff]  ;;  %v7787_v22 = vld [vmem:[#allocation2 + $0x138] sm:$0xff] }
 0x151   : > { %3234 = vrot.lane.b32.xlu0 %v6848_v9, %s6847_s20 }
 0x155   : > { %3238 = vrot.lane.b32.xlu0 %v6848_v9, %s6847_s20 }
 0x159   : > { %3242 = vrot.lane.b32.xlu0 %v6848_v9, %s6847_s20 }
 0x15d   : > { %3246 = vrot.lane.b32.xlu0 %v6848_v9, %s6847_s20 }
 0x161   : > { %3250 = vrot.lane.b32.xlu0 %v6848_v9, %s6847_s20 }
 0x165   : > { %3254 = vrot.lane.b32.xlu0 %v6848_v9, %s6847_s20 }
 0x169   : > { %1472 = vrot.lane.b32.xlu0 %v6848_v9, %s6847_s20 }
 0x17c   : > { %v1431_v43 = vpop.permute.xlu0 %1430 }
 0x17d   : > { %1501 = vst.msk [vmem:[#allocation2 + $0x20] sm:$0xff] %vm1498_vm14, %v1431_v43 }
 0x180   : > { %v1433_v51 = vpop.permute.xlu0 %1432 }
 0x181   : > { %1502 = vst.msk [vmem:[#allocation2 + $0x30] sm:$0xff] %vm1498_vm14, %v1433_v51  ;;  %v7676_v51 = vld [vmem:[#allocation2 + $0x88] sm:$0xff] }
 0x184   : > { %v7552_v38 = vld [vmem:[#allocation2 + $0x20] sm:$0xff]  ;;  %v1435_v59 = vpop.permute.xlu1 %1434 }
 0x185   : > { %1805 = vmatmul.mubr.bf16.vlgmr.msra.gmra.mrb[24].mxu1 %v7552_v38  ;;  %1503 = vst.msk [vmem:[#allocation2 + $0x40] sm:$0xff] %vm1498_vm14, %v1435_v59 }
 0x186   : > { %2434 = vmatpush1.bf16.msra.mxu1 %v6689_v8  ;;  %6240 = vmatprep.mubr.msk.bf16.mxu1 %vm1377_vm7, %v7555_v60 }
 0x187   : > { %2435 = vmatprep.subr.bf16.mxu1 %v6846_v24 }
 0x188   : > { %v1437_v0 = vpop.permute.xlu1 %1436  ;;  %v7566_v3 = vld [vmem:[#allocation2 + $0x30] sm:$0xff] }
 0x189   : > { %1504 = vst.msk [vmem:[#allocation2 + $0x50] sm:$0xff] %vm1498_vm14, %v1437_v0 }
 0x18a   : > { %2436 = vmatpush1.bf16.msra.mxu1 %v6692_v37  ;;  %v1550_v37 = vld [vmem:[#allocation2 + $0x18] sm:$0xff] }
 0x18b   : > { %2437 = vmatprep.subr.bf16.mxu1 %v6846_v24 }
 0x18c   : > { %v1439_v10 = vpop.permute.xlu0 %1438  ;;  %v1441_v11 = vpop.permute.xlu1 %1440  ;;  %v7604_v27 = vld [vmem:[#allocation2 + $0x40] sm:$0xff] }
 0x18d   : > { %1813 = vmatmul.mubr.bf16.gmra.mrb[28].mxu1 %v7566_v3  ;;  %1505 = vst.msk [vmem:[#allocation2 + $0x60] sm:$0xff] %vm1498_vm14, %v1439_v10  ;;  %1506 = vst.msk [vmem:[#allocation2 + $0x70] sm:$0xff] %vm1498_vm14, %v1441_v11  ;;  %v7756_v11 = vld [vmem:[#allocation2 + $0x108] sm:$0xff] }
 0x18e   : > { %6241 = vmatprep.mubr.msk.bf16.mxu1 %vm1377_vm7, %v7577_v18  ;;  %2438 = vmatpush1.bf16.msra.mxu1 %v6696_v4  ;;  %v7716_v4 = vld [vmem:[#allocation2 + $0xc8] sm:$0xff] }
 0x18f   : > { %2439 = vmatprep.subr.bf16.mxu1 %v6846_v24 }
 0x190   : > { %v1445_v20 = vpop.permute.xlu1 %1444  ;;  %v7622_v31 = vld [vmem:[#allocation2 + $0x50] sm:$0xff] }
 0x191   : > { %1508 = vst.msk [vmem:[#allocation2 + $0x90] sm:$0xff] %vm1498_vm14, %v1445_v20 }
 0x192   : > { %2440 = vmatpush1.bf16.msra.mxu1 %v6700_v19 }
 0x193   : > { %2441 = vmatprep.subr.bf16.mxu1 %v6846_v24 }
 0x194   : > { %v1443_v16 = vpop.permute.xlu0 %1442  ;;  %v1449_v55 = vpop.permute.xlu1 %1448  ;;  %v7649_v41 = vld [vmem:[#allocation2 + $0x60] sm:$0xff]  ;;  %v7668_v46 = vld [vmem:[#allocation2 + $0x70] sm:$0xff] }
 0x195   : > { %1821 = vmatmul.mubr.bf16.gmra.mrb[32].mxu1 %v7604_v27  ;;  %1507 = vst.msk [vmem:[#allocation2 + $0x80] sm:$0xff] %vm1498_vm14, %v1443_v16  ;;  %1510 = vst.msk [vmem:[#allocation2 + $0xb0] sm:$0xff] %vm1498_vm14, %v1449_v55  ;;  %v7803_v16 = vld [vmem:[#allocation2 + $0x158] sm:$0xff] }
 0x196   : > { %6242 = vmatprep.mubr.msk.bf16.mxu1 %vm1377_vm7, %v7609_v28  ;;  %2442 = vmatpush1.bf16.msra.mxu1 %v6705_v26  ;;  %v7797_v26 = vld [vmem:[#allocation2 + $0x148] sm:$0xff] }
 0x197   : > { %2443 = vmatprep.subr.bf16.mxu1 %v6846_v24 }
 0x198   : > { %v1453_v30 = vpop.permute.xlu1 %1452  ;;  %v7695_v57 = vld [vmem:[#allocation2 + $0x90] sm:$0xff] }
 0x199   : > { %1512 = vst.msk [vmem:[#allocation2 + $0xd0] sm:$0xff] %vm1498_vm14, %v1453_v30 }
 0x19a   : > { %2444 = vmatpush1.bf16.msra.mxu1 %v6706_v49 }
 0x19b   : > { %2445 = vmatprep.subr.bf16.mxu1 %v6846_v24 }
 0x19c   : > { %v1447_v33 = vpop.permute.xlu0 %1446  ;;  %v1457_v34 = vpop.permute.xlu1 %1456  ;;  %v7687_v8 = vld [vmem:[#allocation2 + $0x80] sm:$0xff]  ;;  %v7712_v2 = vld [vmem:[#allocation2 + $0xb0] sm:$0xff] }
 0x19d   : > { %1509 = vst.msk [vmem:[#allocation2 + $0xa0] sm:$0xff] %vm1498_vm14, %v1447_v33  ;;  %1829 = vmatmul.mubr.bf16.gmra.mrb[36].mxu1 %v7622_v31  ;;  %1514 = vst.msk [vmem:[#allocation2 + $0xf0] sm:$0xff] %vm1498_vm14, %v1457_v34 }
 0x19e   : > { %6243 = vmatprep.mubr.msk.bf16.mxu1 %vm1377_vm7, %v7632_v47  ;;  %2446 = vmatpush1.bf16.msra.mxu1 %v6707_v32 }
 0x19f   : > { %2447 = vmatprep.subr.bf16.mxu1 %v6846_v24 }
 0x1a0   : > { %v1451_v15 = vpop.permute.xlu0 %1450  ;;  %v1461_v36 = vpop.permute.xlu1 %1460 }
 0x1a1   : > { %1511 = vst.msk [vmem:[#allocation2 + $0xc0] sm:$0xff] %vm1498_vm14, %v1451_v15  ;;  %1516 = vst.msk [vmem:[#allocation2 + $0x110] sm:$0xff] %vm1498_vm14, %v1461_v36 }
 0x1a2   : > { %2448 = vmatpush1.bf16.msra.mxu1 %v6708_v35 }
 0x1a3   : > { %2449 = vmatprep.subr.bf16.mxu1 %v6846_v24 }
 0x1a4   : > { %v1455_v5 = vpop.permute.xlu0 %1454  ;;  %v1465_v45 = vpop.permute.xlu1 %1464  ;;  %v7703_v0 = vld [vmem:[#allocation2 + $0xa0] sm:$0xff]  ;;  %v7752_v10 = vld [vmem:[#allocation2 + $0xf0] sm:$0xff] }
 0x1a5   : > { %1513 = vst.msk [vmem:[#allocation2 + $0xe0] sm:$0xff] %vm1498_vm14, %v1455_v5  ;;  %1837 = vmatmul.mubr.bf16.gmra.mrb[40].mxu1 %v7649_v41  ;;  %1518 = vst.msk [vmem:[#allocation2 + $0x130] sm:$0xff] %vm1498_vm14, %v1465_v45  ;;  %v6713_v5 = vld [vmem:[%s10166_s5 + $0x60] sm:$0xff]  }
 0x1a6   : > { %6244 = vmatprep.mubr.msk.bf16.mxu1 %vm1377_vm7, %v7655_v42  ;;  %2450 = vmatpush1.bf16.msra.mxu1 %v6709_v40 }
 0x1a7   : > { %2451 = vmatprep.subr.bf16.mxu1 %v6846_v24 }
 0x1a8   : > { %v1459_v23 = vpop.permute.xlu0 %1458  ;;  %v1469_v43 = vpop.permute.xlu1 %1468  ;;  %v7722_v6 = vld [vmem:[#allocation2 + $0xc0] sm:$0xff]  ;;  %v7772_v19 = vld [vmem:[#allocation2 + $0x110] sm:$0xff] }
 0x1a9   : > { %1515 = vst.msk [vmem:[#allocation2 + $0x100] sm:$0xff] %vm1498_vm14, %v1459_v23  ;;  %1520 = vst.msk [vmem:[#allocation2 + $0x150] sm:$0xff] %vm1498_vm14, %v1469_v43 }
 0x1aa   : > { %2452 = vmatpush1.bf16.msra.mxu1 %v6710_v29 }
 0x1ab   : > { %2453 = vmatprep.subr.bf16.mxu1 %v6846_v24 }
 0x1ac   : > { %v1463_v44 = vpop.permute.xlu0 %1462  ;;  %v1429_v48 = vpop.permute.xlu1 %1428  ;;  %v7793_v25 = vld [vmem:[#allocation2 + $0x130] sm:$0xff] }
 0x1ad   : > { %1517 = vst.msk [vmem:[#allocation2 + $0x120] sm:$0xff] %vm1498_vm14, %v1463_v44  ;;  %1845 = vmatmul.mubr.bf16.gmra.mrb[44].mxu1 %v7668_v46  ;;  %1500 = vst.msk [vmem:[#allocation2 + $0x10] sm:$0xff] %vm1498_vm14, %v1429_v48 }
 0x1ae   : > { %6245 = vmatprep.mubr.msk.bf16.mxu1 %vm1377_vm7, %v7676_v51  ;;  %2454 = vmatpush1.bf16.msra.mxu1 %v6711_v14 }
 0x1af   : > { %2455 = vmatprep.subr.bf16.mxu1 %v6846_v24 }
 0x1b0   : > { %v1467_v54 = vpop.permute.xlu0 %1466  ;;  %v7762_v12 = vld [vmem:[#allocation2 + $0x100] sm:$0xff]  ;;  %v7813_v49 = vld [vmem:[#allocation2 + $0x150] sm:$0xff] }
 0x1b1   : > { %1519 = vst.msk [vmem:[#allocation2 + $0x140] sm:$0xff] %vm1498_vm14, %v1467_v54  ;;  %v6714_v54 = vld [vmem:[%s10166_s5 + $0x68] sm:$0xff]  }
 0x1b2   : > { %2456 = vmatpush1.bf16.msra.mxu1 %v6712_v53 }
 0x1b3   : > { %3752 = vmatprep.subr.bf16.mxu1 %v6846_v24 }
 0x1b4   : > { %v1427_v58 = vpop.permute.xlu0 %1426  ;;  %v1549_v63 = vld [vmem:[#allocation2 + $0x10] sm:$0xff]  ;;  %v7783_v20 = vld [vmem:[#allocation2 + $0x120] sm:$0xff] }
 0x1b5   : > { %1499 = vst.msk [vmem:[#allocation2] sm:$0xff] %vm1498_vm14, %v1427_v58  ;;  %1853 = vmatmul.mubr.bf16.gmra.mrb[48].mxu1 %v7687_v8 }
 0x1b6   : > { %6246 = vmatprep.mubr.msk.bf16.mxu1 %vm1377_vm7, %v7691_v56 }
 0x1b8   : > { %v7805_v55 = vld [vmem:[#allocation2 + $0x140] sm:$0xff] }
 0x1bb   : > { %v1471_v39 = vpop.permute.xlu0 %1470 }
 0x1bc   : > { %v1547_v59 = vld [vmem:[#allocation2] sm:$0xff]  ;;  %1521 = vst.msk [vmem:[#allocation2 + $0x160] sm:$0xff] %vm1498_vm14, %v1471_v39 }
 0x1bd   : > { %1861 = vmatmul.mubr.bf16.gmra.mrb[52].mxu1 %v7695_v57  ;;  %2076 = vmatmul.mubr.bf16.vlgmr.msra.gmra.mrb[24].mxu0 %v1547_v59 }
 0x1be   : > { %6247 = vmatprep.mubr.msk.bf16.mxu1 %vm1377_vm7, %v7698_v61  ;;  %6272 = vmatprep.mubr.msk.bf16.mxu0 %vm1377_vm7, %v1550_v37 }
 0x1bf   : > { %v7875_v40 = vpop.permute.xlu0 %3230  ;;  %3530 = vmatpush1.bf16.msra.mxu0 %v6713_v5 }
 0x1c0   : > { %3531 = vmatprep.subr.bf16.mxu0 %v6846_v24 }
 0x1c3   : > { %3532 = vmatpush1.bf16.msra.mxu0 %v6714_v54 }
 0x1c4   : > { %3533 = vmatprep.subr.bf16.mxu0 %v6846_v24 }
 0x1c5   : > { %1869 = vmatmul.mubr.bf16.gmra.mrb[56].mxu1 %v7703_v0  ;;  %2084 = vmatmul.mubr.bf16.gmra.mrb[28].mxu0 %v1549_v63 }
 0x1c6   : > { %6248 = vmatprep.mubr.msk.bf16.mxu1 %vm1377_vm7, %v7706_v1  ;;  %6273 = vmatprep.mubr.msk.bf16.mxu0 %vm1377_vm7, %v7299_v17  ;;  %v7726_v17 = vld [vmem:[#allocation2 + $0xd8] sm:$0xff] }
 0x1cd   : > { %1877 = vmatmul.mubr.bf16.gmra.mrb[60].mxu1 %v7712_v2  ;;  %2092 = vmatmul.mubr.bf16.gmra.mrb[32].mxu0 %v7552_v38  ;;  %v7732_v38 = vld [vmem:[#allocation2 + $0xd0] sm:$0xff] }
 0x1ce   : > { %6249 = vmatprep.mubr.msk.bf16.mxu1 %vm1377_vm7, %v7716_v4  ;;  %6274 = vmatprep.mubr.msk.bf16.mxu0 %vm1377_vm7, %v7555_v60  ;;  %v7736_v60 = vld [vmem:[#allocation2 + $0xe8] sm:$0xff] }
 0x1d5   : > { %1885 = vmatmul.mubr.bf16.gmra.mrb[64].mxu1 %v7722_v6  ;;  %2100 = vmatmul.mubr.bf16.gmra.mrb[36].mxu0 %v7566_v3  ;;  %v7742_v3 = vld [vmem:[#allocation2 + $0xe0] sm:$0xff] }
 0x1d6   : > { %6250 = vmatprep.mubr.msk.bf16.mxu1 %vm1377_vm7, %v7726_v17  ;;  %6275 = vmatprep.mubr.msk.bf16.mxu0 %vm1377_vm7, %v7577_v18 }
 0x1dd   : > { %1893 = vmatmul.mubr.bf16.gmra.mrb[68].mxu1 %v7732_v38  ;;  %2108 = vmatmul.mubr.bf16.gmra.mrb[40].mxu0 %v7604_v27 }
 0x1de   : > { %6251 = vmatprep.mubr.msk.bf16.mxu1 %vm1377_vm7, %v7736_v60  ;;  %6276 = vmatprep.mubr.msk.bf16.mxu0 %vm1377_vm7, %v7609_v28 }
 0x1e5   : > { %1901 = vmatmul.mubr.bf16.gmra.mrb[72].mxu1 %v7742_v3  ;;  %2116 = vmatmul.mubr.bf16.gmra.mrb[44].mxu0 %v7622_v31 }
 0x1e6   : > { %6252 = vmatprep.mubr.msk.bf16.mxu1 %vm1377_vm7, %v7746_v7  ;;  %6277 = vmatprep.mubr.msk.bf16.mxu0 %vm1377_vm7, %v7632_v47 }
 0x1ed   : > { %1909 = vmatmul.mubr.bf16.gmra.mrb[76].mxu1 %v7752_v10  ;;  %2124 = vmatmul.mubr.bf16.gmra.mrb[48].mxu0 %v7649_v41 }
 0x1ee   : > { %6253 = vmatprep.mubr.msk.bf16.mxu1 %vm1377_vm7, %v7756_v11  ;;  %6278 = vmatprep.mubr.msk.bf16.mxu0 %vm1377_vm7, %v7655_v42 }
 0x1f5   : > { %1917 = vmatmul.mubr.bf16.gmra.mrb[80].mxu1 %v7762_v12  ;;  %2132 = vmatmul.mubr.bf16.gmra.mrb[52].mxu0 %v7668_v46 }
 0x1f6   : > { %6254 = vmatprep.mubr.msk.bf16.mxu1 %vm1377_vm7, %v7766_v13  ;;  %6279 = vmatprep.mubr.msk.bf16.mxu0 %vm1377_vm7, %v7676_v51 }
 0x1fd   : > { %1925 = vmatmul.mubr.bf16.gmra.mrb[84].mxu1 %v7772_v19  ;;  %2140 = vmatmul.mubr.bf16.gmra.mrb[56].mxu0 %v7687_v8 }
 0x1fe   : > { %6255 = vmatprep.mubr.msk.bf16.mxu1 %vm1377_vm7, %v7776_v62  ;;  %6280 = vmatprep.mubr.msk.bf16.mxu0 %vm1377_vm7, %v7691_v56 }
 0x205   : > { %1933 = vmatmul.mubr.bf16.gmra.mrb[88].mxu1 %v7783_v20  ;;  %2148 = vmatmul.mubr.bf16.gmra.mrb[60].mxu0 %v7695_v57 }
 0x206   : > { %6256 = vmatprep.mubr.msk.bf16.mxu1 %vm1377_vm7, %v7787_v22  ;;  %6281 = vmatprep.mubr.msk.bf16.mxu0 %vm1377_vm7, %v7698_v61 }
 0x20d   : > { %1941 = vmatmul.mubr.bf16.gmra.mrb[92].mxu1 %v7793_v25  ;;  %2156 = vmatmul.mubr.bf16.gmra.mrb[64].mxu0 %v7703_v0 }
 0x20e   : > { %6257 = vmatprep.mubr.msk.bf16.mxu1 %vm1377_vm7, %v7797_v26  ;;  %6282 = vmatprep.mubr.msk.bf16.mxu0 %vm1377_vm7, %v7706_v1 }
 0x215   : > { %1949 = vmatmul.mubr.bf16.gmra.mrb[96].mxu1 %v7805_v55  ;;  %2164 = vmatmul.mubr.bf16.gmra.mrb[68].mxu0 %v7712_v2 }
 0x216   : > { %6283 = vmatprep.mubr.msk.bf16.mxu0 %vm1377_vm7, %v7716_v4  ;;  %6258 = vmatprep.mubr.msk.bf16.mxu1 %vm1377_vm7, %v7803_v16 }
 0x21d   : > { %1957 = vmatmul.mubr.bf16.gmra.mrb[100].mxu1 %v7813_v49  ;;  %2172 = vmatmul.mubr.bf16.gmra.mrb[72].mxu0 %v7722_v6 }
 0x21e   : > { %6284 = vmatprep.mubr.msk.bf16.mxu0 %vm1377_vm7, %v7726_v17  ;;  %6327 = vmatprep.mubr.msk.bf16.mxu1 %vm1377_vm7, %v7577_v18 }
 0x225   : > { %2180 = vmatmul.mubr.bf16.gmra.mrb[76].mxu0 %v7732_v38  ;;  %2466 = vmatmul.mubr.bf16.vlgmr.msra.gmra.mrb[104].mxu1 %v7604_v27 }
 0x226   : > { %6285 = vmatprep.mubr.msk.bf16.mxu0 %vm1377_vm7, %v7736_v60  ;;  %6328 = vmatprep.mubr.msk.bf16.mxu1 %vm1377_vm7, %v7609_v28 }
 0x22d   : > { %2188 = vmatmul.mubr.bf16.gmra.mrb[80].mxu0 %v7742_v3  ;;  %2474 = vmatmul.mubr.bf16.gmra.mrb[108].mxu1 %v7622_v31 }
 0x22e   : > { %6286 = vmatprep.mubr.msk.bf16.mxu0 %vm1377_vm7, %v7746_v7  ;;  %6329 = vmatprep.mubr.msk.bf16.mxu1 %vm1377_vm7, %v7632_v47 }
 0x235   : > { %2196 = vmatmul.mubr.bf16.gmra.mrb[84].mxu0 %v7752_v10  ;;  %2482 = vmatmul.mubr.bf16.gmra.mrb[112].mxu1 %v7649_v41 }
 0x236   : > { %6287 = vmatprep.mubr.msk.bf16.mxu0 %vm1377_vm7, %v7756_v11  ;;  %6330 = vmatprep.mubr.msk.bf16.mxu1 %vm1377_vm7, %v7655_v42  ;;  %v7884_v42 = vpop.permute.xlu0 %3234 }
 0x23a   : > { %v7887_v43 = vpop.permute.xlu0 %3238 }
 0x23d   : > { %2204 = vmatmul.mubr.bf16.gmra.mrb[88].mxu0 %v7762_v12  ;;  %2490 = vmatmul.mubr.bf16.gmra.mrb[116].mxu1 %v7668_v46 }
 0x23e   : > { %6288 = vmatprep.mubr.msk.bf16.mxu0 %vm1377_vm7, %v7766_v13  ;;  %6331 = vmatprep.mubr.msk.bf16.mxu1 %vm1377_vm7, %v7676_v51  ;;  %v7895_v48 = vpop.permute.xlu0 %3242 }
 0x242   : > { %v7900_v53 = vpop.permute.xlu0 %3246 }
 0x245   : > { %2212 = vmatmul.mubr.bf16.gmra.mrb[92].mxu0 %v7772_v19  ;;  %2498 = vmatmul.mubr.bf16.gmra.mrb[120].mxu1 %v7687_v8 }
 0x246   : > { %6289 = vmatprep.mubr.msk.bf16.mxu0 %vm1377_vm7, %v7776_v62  ;;  %6332 = vmatprep.mubr.msk.bf16.mxu1 %vm1377_vm7, %v7691_v56 }
 0x24d   : > { %2220 = vmatmul.mubr.bf16.gmra.mrb[96].mxu0 %v7783_v20  ;;  %2506 = vmatmul.mubr.bf16.gmra.mrb[124].mxu1 %v7695_v57  ;;  %v7905_v57 = vpop.permute.xlu0 %3250 }
 0x24e   : > { %6290 = vmatprep.mubr.msk.bf16.mxu0 %vm1377_vm7, %v7787_v22  ;;  %6333 = vmatprep.mubr.msk.bf16.mxu1 %vm1377_vm7, %v7698_v61 }
 0x251   : > { %v7911_v61 = vpop.permute.xlu0 %3254 }
 0x255   : > { %2228 = vmatmul.mubr.bf16.gmra.mrb[100].mxu0 %v7793_v25  ;;  %2514 = vmatmul.mubr.bf16.gmra.mrb[128].mxu1 %v7703_v0  ;;  %v1376_v0 = vsel %vm1375_vm5, %v7096_v52, 0 }
 0x256   : > { %6334 = vmatprep.mubr.msk.bf16.mxu1 %vm1377_vm7, %v7706_v1  ;;  %1546 = vst.msk [vmem:[#allocation2 + $0x178] sm:$0xff] %vm1377_vm7, %v1376_v0  ;;  %3323 = vst.msk [vmem:[#allocation3 + $0x138] sm:$0xff] %vm1377_vm7, %v1376_v0 }
 0x258   : > { %v7861_v18 = vpop.f32.mrb[24].mxu1 }
 0x259   : > { %v1808_v27 = vpop.f32.mrb[25].mxu1 }
 0x25a   : > { %v7863_v28 = vpop.f32.mrb[26].mxu1 }
 0x25b   : > { %v1811_v30 = vpop.f32.mrb[27].mxu1 }
 0x25d   : > { %2522 = vmatmul.mubr.bf16.gmra.mrb[132].mxu1 %v7712_v2  ;;  %v1473_v2 = vpop.permute.xlu0 %1472 }
 0x25e   : > { %6335 = vmatprep.mubr.msk.bf16.mxu1 %vm1377_vm7, %v7716_v4  ;;  %1522 = vst.msk [vmem:[#allocation2 + $0x170] sm:$0xff] %vm1498_vm14, %v1473_v2 }
 0x260   : > { %v1814_v31 = vpop.f32.mrb[28].mxu1 }
 0x261   : > { %v1816_v32 = vpop.f32.mrb[29].mxu1 }
 0x262   : > { %v1817_v33 = vpop.f32.mrb[30].mxu1 }
 0x263   : > { %v1819_v34 = vpop.f32.mrb[31].mxu1 }
 0x265   : > { %2530 = vmatmul.mubr.bf16.gmra.mrb[136].mxu1 %v7722_v6  ;;  %v6715_v6 = vld [vmem:[%s10166_s5 + $0x70] sm:$0xff]  }
 0x266   : > { %6336 = vmatprep.mubr.msk.bf16.mxu1 %vm1377_vm7, %v7726_v17  ;;  %3534 = vmatpush1.bf16.msra.mxu0 %v6715_v6  ;;  %v6718_v6 = vld [vmem:[%s10166_s5 + $0x88] sm:$0xff]  }
 0x267   : > { %3535 = vmatprep.subr.bf16.mxu0 %v6846_v24 }
 0x268   : > { %v7871_v47 = vpop.f32.mrb[32].mxu1 }
 0x269   : > { %v1824_v35 = vpop.f32.mrb[33].mxu1 }
 0x26a   : > { %v7873_v15 = vpop.f32.mrb[34].mxu1 }
 0x26b   : > { %v1827_v36 = vpop.f32.mrb[35].mxu1 }
 0x26d   : > { %2538 = vmatmul.mubr.bf16.gmra.mrb[140].mxu1 %v7732_v38 }
 0x26e   : > { %6337 = vmatprep.mubr.msk.bf16.mxu1 %vm1377_vm7, %v7736_v60 }
 0x270   : > { %v1830_v41 = vpop.f32.mrb[36].mxu1 }
 0x271   : > { %v1832_v45 = vpop.f32.mrb[37].mxu1 }
 0x272   : > { %v1833_v29 = vpop.f32.mrb[38].mxu1 }
 0x273   : > { %v1835_v23 = vpop.f32.mrb[39].mxu1 }
 0x275   : > { %2546 = vmatmul.mubr.bf16.gmra.mrb[144].mxu1 %v7742_v3 }
 0x276   : > { %6338 = vmatprep.mubr.msk.bf16.mxu1 %vm1377_vm7, %v7746_v7 }
 0x278   : > { %v7891_v46 = vpop.f32.mrb[40].mxu1 }
 0x279   : > { %v1840_v14 = vpop.f32.mrb[41].mxu1 }
 0x27a   : > { %v7893_v44 = vpop.f32.mrb[42].mxu1 }
 0x27b   : > { %v1843_v51 = vpop.f32.mrb[43].mxu1 }
 0x27d   : > { %2554 = vmatmul.mubr.bf16.gmra.mrb[148].mxu1 %v7752_v10 }
 0x27e   : > { %6339 = vmatprep.mubr.msk.bf16.mxu1 %vm1377_vm7, %v7756_v11 }
 0x280   : > { %v1846_v58 = vpop.f32.mrb[44].mxu1 }
 0x281   : > { %v1848_v8 = vpop.f32.mrb[45].mxu1 }
 0x282   : > { %v1849_v56 = vpop.f32.mrb[46].mxu1 }
 0x283   : > { %v1851_v59 = vpop.f32.mrb[47].mxu1 }
 0x285   : > { %2562 = vmatmul.mubr.bf16.gmra.mrb[152].mxu1 %v7762_v12 }
 0x286   : > { %6340 = vmatprep.mubr.msk.bf16.mxu1 %vm1377_vm7, %v7766_v13 }
 0x288   : > { %v7913_v37 = vpop.f32.mrb[48].mxu1 }
 0x289   : > { %v1856_v63 = vpop.f32.mrb[49].mxu1 }
 0x28a   : > { %v7917_v1 = vpop.f32.mrb[50].mxu1 }
 0x28b   : > { %v1859_v4 = vpop.f32.mrb[51].mxu1 }
 0x28d   : > { %2570 = vmatmul.mubr.bf16.gmra.mrb[156].mxu1 %v7772_v19 }
 0x28e   : > { %6341 = vmatprep.mubr.msk.bf16.mxu1 %vm1377_vm7, %v7776_v62 }
 0x290   : > { %v1862_v17 = vpop.f32.mrb[52].mxu1  ;;  %v2077_v38 = vpop.f32.mrb[24].mxu0 }
 0x291   : > { %v7929_v60 = vadd.f32 %v2077_v38, %v7861_v18  ;;  %v1864_v3 = vpop.f32.mrb[53].mxu1  ;;  %v2079_v7 = vpop.f32.mrb[25].mxu0 }
 0x292   : > { %v1865_v10 = vpop.f32.mrb[54].mxu1  ;;  %v2080_v11 = vpop.f32.mrb[26].mxu0  ;;  %v2275_v3 = vld [vmem:[#allocation2 + $0x178] sm:$0xff]  ;;  %v2272_v7 = vld [vmem:[#allocation2 + $0x160] sm:$0xff] }
 0x293   : > { %v7933_v12 = vadd.f32 %v2080_v11, %v7863_v28  ;;  %v1867_v13 = vpop.f32.mrb[55].mxu1  ;;  %v2082_v19 = vpop.f32.mrb[27].mxu0  ;;  %v6716_v28 = vld [vmem:[%s10166_s5 + $0x78] sm:$0xff]  }
 0x294   : > { %3536 = vmatpush1.bf16.msra.mxu0 %v6716_v28 }
 0x295   : > { %2578 = vmatmul.mubr.bf16.gmra.mrb[160].mxu1 %v7783_v20  ;;  %3537 = vmatprep.subr.bf16.mxu0 %v6846_v24 }
 0x296   : > { %6342 = vmatprep.mubr.msk.bf16.mxu1 %vm1377_vm7, %v7787_v22 }
 0x298   : > { %v7938_v62 = vpop.f32.mrb[56].mxu1  ;;  %v2085_v39 = vpop.f32.mrb[28].mxu0 }
 0x299   : > { %v1872_v18 = vpop.f32.mrb[57].mxu1  ;;  %v2087_v27 = vpop.f32.mrb[29].mxu0 }
 0x29a   : > { %v7940_v30 = vpop.f32.mrb[58].mxu1  ;;  %v2088_v31 = vpop.f32.mrb[30].mxu0 }
 0x29b   : > { %v1875_v32 = vpop.f32.mrb[59].mxu1  ;;  %v2090_v33 = vpop.f32.mrb[31].mxu0  ;;  %v6719_v31 = vld [vmem:[%s10166_s5 + $0x90] sm:$0xff]  }
 0x29d   : > { %2586 = vmatmul.mubr.bf16.gmra.mrb[164].mxu1 %v7793_v25 }
 0x29e   : > { %6343 = vmatprep.mubr.msk.bf16.mxu1 %vm1377_vm7, %v7797_v26 }
 0x2a0   : > { %v1878_v20 = vpop.f32.mrb[60].mxu1  ;;  %v2093_v22 = vpop.f32.mrb[32].mxu0 }
 0x2a1   : > { %v7950_v34 = vadd.f32 %v2093_v22, %v7871_v47  ;;  %v1880_v35 = vpop.f32.mrb[61].mxu1  ;;  %v2095_v36 = vpop.f32.mrb[33].mxu0 }
 0x2a2   : > { %v1881_v5 = vpop.f32.mrb[62].mxu1  ;;  %v2096_v41 = vpop.f32.mrb[34].mxu0 }
 0x2a3   : > { %v7953_v45 = vadd.f32 %v2096_v41, %v7873_v15  ;;  %v1883_v29 = vpop.f32.mrb[63].mxu1  ;;  %v2098_v25 = vpop.f32.mrb[35].mxu0  ;;  %v6717_v15 = vld [vmem:[%s10166_s5 + $0x80] sm:$0xff]  }
 0x2a4   : > { %3538 = vmatpush1.bf16.msra.mxu0 %v6717_v15  ;;  %v6720_v15 = vld [vmem:[%s10166_s5 + $0x98] sm:$0xff]  }
 0x2a5   : > { %2594 = vmatmul.mubr.bf16.gmra.mrb[168].mxu1 %v7805_v55  ;;  %v2273_v55 = vld [vmem:[#allocation2 + $0x168] sm:$0xff]  ;;  %3539 = vmatprep.subr.bf16.mxu0 %v6846_v24 }
 0x2a6   : > { %6344 = vmatprep.mubr.msk.bf16.mxu1 %vm1377_vm7, %v7803_v16 }
 0x2a8   : > { %v7958_v26 = vpop.f32.mrb[64].mxu1  ;;  %v2101_v23 = vpop.f32.mrb[36].mxu0  ;;  %3540 = vmatpush1.bf16.msra.mxu0 %v6718_v6 }
 0x2a9   : > { %v1888_v14 = vpop.f32.mrb[65].mxu1  ;;  %v2103_v47 = vpop.f32.mrb[37].mxu0  ;;  %3541 = vmatprep.subr.bf16.mxu0 %v6846_v24 }
 0x2aa   : > { %v7960_v51 = vpop.f32.mrb[66].mxu1  ;;  %v2104_v54 = vpop.f32.mrb[38].mxu0 }
 0x2ab   : > { %v1891_v58 = vpop.f32.mrb[67].mxu1  ;;  %v2106_v8 = vpop.f32.mrb[39].mxu0 }
 0x2ac   : > { %3542 = vmatpush1.bf16.msra.mxu0 %v6719_v31  ;;  %v6724_v31 = vld [vmem:[%s10166_s5 + $0xa0] sm:$0xff]  }
 0x2ad   : > { %2602 = vmatmul.mubr.bf16.gmra.mrb[172].mxu1 %v7813_v49  ;;  %3543 = vmatprep.subr.bf16.mxu0 %v6846_v24 }
 0x2ae   : > { %6345 = vmatprep.mubr.msk.bf16.mxu1 %vm1377_vm7, %v2273_v55 }
 0x2b0   : > { %v1894_v16 = vpop.f32.mrb[68].mxu1  ;;  %v2109_v56 = vpop.f32.mrb[40].mxu0  ;;  %3544 = vmatpush1.bf16.msra.mxu0 %v6720_v15 }
 0x2b1   : > { %v7969_v59 = vadd.f32 %v2109_v56, %v7891_v46  ;;  %v1896_v63 = vpop.f32.mrb[69].mxu1  ;;  %v2111_v0 = vpop.f32.mrb[41].mxu0  ;;  %3545 = vmatprep.subr.bf16.mxu0 %v6846_v24 }
 0x2b2   : > { %v1897_v2 = vpop.f32.mrb[70].mxu1  ;;  %v2112_v4 = vpop.f32.mrb[42].mxu0 }
 0x2b3   : > { %v7975_v49 = vadd.f32 %v2112_v4, %v7893_v44  ;;  %v1899_v17 = vpop.f32.mrb[71].mxu1  ;;  %v2114_v38 = vpop.f32.mrb[43].mxu0  ;;  %v2274_v44 = vld [vmem:[#allocation2 + $0x170] sm:$0xff] }
 0x2b4   : > { %3546 = vmatpush1.bf16.msra.mxu0 %v6724_v31 }
 0x2b5   : > { %2610 = vmatmul.mubr.bf16.gmra.mrb[176].mxu1 %v2272_v7  ;;  %3547 = vmatprep.subr.bf16.mxu0 %v6846_v24 }
 0x2b6   : > { %6346 = vmatprep.mubr.msk.bf16.mxu1 %vm1377_vm7, %v2275_v3  ;;  %v6723_v3 = vld [vmem:[%s10166_s5 + $0x10] sm:$0xff]  }
 0x2b8   : > { %v7979_v46 = vpop.f32.mrb[72].mxu1  ;;  %v2117_v10 = vpop.f32.mrb[44].mxu0 }
 0x2b9   : > { %v1904_v11 = vpop.f32.mrb[73].mxu1  ;;  %v2119_v13 = vpop.f32.mrb[45].mxu0 }
 0x2ba   : > { %v7981_v19 = vpop.f32.mrb[74].mxu1  ;;  %v2120_v39 = vpop.f32.mrb[46].mxu0 }
 0x2bb   : > { %v1907_v18 = vpop.f32.mrb[75].mxu1  ;;  %v2122_v27 = vpop.f32.mrb[47].mxu0 }
 0x2bc   : > { %v6725_v27 = vld [vmem:[%s10166_s5 + $0x18] sm:$0xff]  }
 0x2bd   : > { %2618 = vmatmul.mubr.bf16.gmra.mrb[180].mxu1 %v2274_v44 }
 0x2c0   : > { %v1910_v32 = vpop.f32.mrb[76].mxu1  ;;  %v2125_v33 = vpop.f32.mrb[48].mxu0 }
 0x2c1   : > { %v7987_v28 = vadd.f32 %v2125_v33, %v7913_v37  ;;  %v1912_v20 = vpop.f32.mrb[77].mxu1  ;;  %v2127_v22 = vpop.f32.mrb[49].mxu0  ;;  %v6726_v32 = vld [vmem:[%s10166_s5 + $0x20] sm:$0xff]  }
 0x2c2   : > { %v1913_v35 = vpop.f32.mrb[78].mxu1  ;;  %v2128_v36 = vpop.f32.mrb[50].mxu0 }
 0x2c3   : > { %v7991_v5 = vadd.f32 %v2128_v36, %v7917_v1  ;;  %v1915_v41 = vpop.f32.mrb[79].mxu1  ;;  %v2130_v29 = vpop.f32.mrb[51].mxu0  ;;  %v6721_v1 = vld [vmem:[%s10166_s5] sm:$0xff]  }
 0x2c4   : > { %3753 = vmatpush1.bf16.msra.mxu1 %v6721_v1 }
 0x2c5   : > { %3754 = vmatprep.subr.bf16.mxu1 %v6846_v24 }
 0x2c8   : > { %v7993_v25 = vpop.f32.mrb[80].mxu1  ;;  %v2133_v23 = vpop.f32.mrb[52].mxu0 }
 0x2c9   : > { %v1920_v14 = vpop.f32.mrb[81].mxu1  ;;  %v2135_v47 = vpop.f32.mrb[53].mxu0 }
 0x2ca   : > { %v7995_v54 = vpop.f32.mrb[82].mxu1  ;;  %v2136_v37 = vpop.f32.mrb[54].mxu0 }
 0x2cb   : > { %v1923_v58 = vpop.f32.mrb[83].mxu1  ;;  %v2138_v8 = vpop.f32.mrb[55].mxu0  ;;  %v6729_v37 = vld [vmem:[%s10166_s5 + $0x30] sm:$0xff]  }
 0x2d0   : > { %v1926_v55 = vpop.f32.mrb[84].mxu1  ;;  %v2141_v16 = vpop.f32.mrb[56].mxu0 }
 0x2d1   : > { %v8004_v56 = vadd.f32 %v2141_v16, %v7938_v62  ;;  %v1928_v63 = vpop.f32.mrb[85].mxu1  ;;  %v2143_v0 = vpop.f32.mrb[57].mxu0  ;;  %v6722_v62 = vld [vmem:[%s10166_s5 + $0x8] sm:$0xff]  }
 0x2d2   : > { %v1929_v2 = vpop.f32.mrb[86].mxu1  ;;  %v2144_v4 = vpop.f32.mrb[58].mxu0  ;;  %3755 = vmatpush1.bf16.msra.mxu1 %v6722_v62  ;;  %v6728_v0 = vld [vmem:[%s10166_s5 + $0xa8] sm:$0xff]  }
 0x2d3   : > { %v8009_v6 = vadd.f32 %v2144_v4, %v7940_v30  ;;  %v1931_v17 = vpop.f32.mrb[87].mxu1  ;;  %v2146_v38 = vpop.f32.mrb[59].mxu0  ;;  %3756 = vmatprep.subr.bf16.mxu1 %v6846_v24  ;;  %v6730_v2 = vld [vmem:[%s10166_s5 + $0x38] sm:$0xff]   ;;  %3548 = vmatpush1.bf16.msra.mxu0 %v6728_v0  ;;  %v6731_v4 = vld [vmem:[%s10166_s5 + $0x40] sm:$0xff]  }
 0x2d4   : > { %3549 = vmatprep.subr.bf16.mxu0 %v6846_v24 }
 0x2d6   : > { %3757 = vmatpush1.bf16.msra.mxu1 %v6723_v3 }
 0x2d7   : > { %3758 = vmatprep.subr.bf16.mxu1 %v6846_v24 }
 0x2d8   : > { %v8018_v7 = vpop.f32.mrb[88].mxu1  ;;  %v2149_v10 = vpop.f32.mrb[60].mxu0 }
 0x2d9   : > { %v1936_v11 = vpop.f32.mrb[89].mxu1  ;;  %v2151_v13 = vpop.f32.mrb[61].mxu0 }
 0x2da   : > { %v8020_v30 = vpop.f32.mrb[90].mxu1  ;;  %v2152_v39 = vpop.f32.mrb[62].mxu0  ;;  %3759 = vmatpush1.bf16.msra.mxu1 %v6725_v27  ;;  %v6732_v27 = vld [vmem:[%s10166_s5 + $0x48] sm:$0xff]  }
 0x2db   : > { %v1939_v44 = vpop.f32.mrb[91].mxu1  ;;  %v2154_v18 = vpop.f32.mrb[63].mxu0  ;;  %3760 = vmatprep.subr.bf16.mxu1 %v6846_v24 }
 0x2de   : > { %3761 = vmatpush1.bf16.msra.mxu1 %v6726_v32 }
 0x2df   : > { %3762 = vmatprep.subr.bf16.mxu1 %v6846_v24 }
 0x2e0   : > { %v1942_v33 = vpop.f32.mrb[92].mxu1  ;;  %v2157_v20 = vpop.f32.mrb[64].mxu0 }
 0x2e1   : > { %v8034_v22 = vadd.f32 %v2157_v20, %v7958_v26  ;;  %v1944_v35 = vpop.f32.mrb[93].mxu1  ;;  %v2159_v36 = vpop.f32.mrb[65].mxu0  ;;  %v6727_v26 = vld [vmem:[%s10166_s5 + $0x28] sm:$0xff]   ;;  %v8084_v33 = vstv %s6348_s17 }
 0x2e2   : > { %v1945_v41 = vpop.f32.mrb[94].mxu1  ;;  %v2160_v29 = vpop.f32.mrb[66].mxu0  ;;  %3763 = vmatpush1.bf16.msra.mxu1 %v6727_v26  ;;  %vm2764_vm6 = vcmp.ge.s32.totalorder %v8084_v33, 0  ;;  %vm2814_vm8 = vcmp.lt.s32.totalorder %v8084_v33, 16 }
 0x2e3   : > { %v8039_v23 = vadd.f32 %v2160_v29, %v7960_v51  ;;  %v1947_v14 = vpop.f32.mrb[95].mxu1  ;;  %v2162_v47 = vpop.f32.mrb[67].mxu0  ;;  %3764 = vmatprep.subr.bf16.mxu1 %v6846_v24  ;;  %vm2824_vm10 = vmand %vm2764_vm6, %vm2814_vm8 }
 0x2e6   : > { %3765 = vmatpush1.bf16.msra.mxu1 %v6729_v37 }
 0x2e7   : > { %3766 = vmatprep.subr.bf16.mxu1 %v6846_v24 }
 0x2e8   : > { %v8048_v58 = vpop.f32.mrb[96].mxu1  ;;  %v2165_v8 = vpop.f32.mrb[68].mxu0 }
 0x2e9   : > { %v1952_v15 = vpop.f32.mrb[97].mxu1  ;;  %v2167_v1 = vpop.f32.mrb[69].mxu0  ;;  %v6735_v8 = vld [vmem:[%s10166_s5 + $0x58] sm:$0xff]  }
 0x2ea   : > { %v8050_v51 = vpop.f32.mrb[98].mxu1  ;;  %v2168_v55 = vpop.f32.mrb[70].mxu0  ;;  %3767 = vmatpush1.bf16.msra.mxu1 %v6730_v2 }
 0x2eb   : > { %v1955_v16 = vpop.f32.mrb[99].mxu1  ;;  %v2170_v63 = vpop.f32.mrb[71].mxu0  ;;  %3768 = vmatprep.subr.bf16.mxu1 %v6846_v24 }
 0x2ee   : > { %3769 = vmatpush1.bf16.msra.mxu1 %v6731_v4 }
 0x2ef   : > { %3770 = vmatprep.subr.bf16.mxu1 %v6846_v24 }
 0x2f0   : > { %v1958_v17 = vpop.f32.mrb[100].mxu1  ;;  %v2173_v38 = vpop.f32.mrb[72].mxu0 }
 0x2f1   : > { %v8065_v62 = vadd.f32 %v2173_v38, %v7979_v46  ;;  %v1960_v3 = vpop.f32.mrb[101].mxu1  ;;  %v2175_v10 = vpop.f32.mrb[73].mxu0  ;;  %v6734_v46 = vld [vmem:[%s10166_s5 + $0x50] sm:$0xff]  }
 0x2f2   : > { %v1961_v11 = vpop.f32.mrb[102].mxu1  ;;  %v2176_v13 = vpop.f32.mrb[74].mxu0  ;;  %3771 = vmatpush1.bf16.msra.mxu1 %v6732_v27 }
 0x2f3   : > { %v8069_v39 = vadd.f32 %v2176_v13, %v7981_v19  ;;  %v1963_v44 = vpop.f32.mrb[103].mxu1  ;;  %v2178_v18 = vpop.f32.mrb[75].mxu0  ;;  %3772 = vmatprep.subr.bf16.mxu1 %v6846_v24  ;;  %v8082_v19 = vld [vmem:[%s10165_s4] ss:$0 sm:$0xff]  ;;  %v6736_v11 = vld [vmem:[%s10166_s5 + $0xb8] sm:$0xff]  }
 0x2f6   : > { %3773 = vmatpush1.bf16.msra.mxu1 %v6734_v46 }
 0x2f7   : > { %3774 = vmatprep.subr.bf16.mxu1 %v6846_v24 }
 0x2f8   : > { %v2181_v31 = vpop.f32.mrb[76].mxu0  ;;  %v2467_v32 = vpop.f32.mrb[104].mxu1 }
 0x2f9   : > { %v2626_v20 = vadd.f32 %v2467_v32, %v7929_v60  ;;  %v2469_v35 = vpop.f32.mrb[105].mxu1  ;;  %v2183_v36 = vpop.f32.mrb[77].mxu0  ;;  %v6733_v60 = vld [vmem:[%s10166_s5 + $0xb0] sm:$0xff]   ;;  %v2755_v32 = vadd.s32 1, %v8084_v33 }
 0x2fa   : > { %v2184_v41 = vpop.f32.mrb[78].mxu0  ;;  %v2470_v29 = vpop.f32.mrb[106].mxu1  ;;  %3550 = vmatpush1.bf16.msra.mxu0 %v6733_v60  ;;  %3775 = vmatpush1.bf16.msra.mxu1 %v6735_v8 }
 0x2fb   : > { %v2673_v14 = vadd.f32 %v8082_v19, %v2626_v20  ;;  %v2627_v47 = vadd.f32 %v2470_v29, %v7933_v12  ;;  %v2186_v26 = vpop.f32.mrb[79].mxu0  ;;  %v2472_v37 = vpop.f32.mrb[107].mxu1  ;;  %3551 = vmatprep.subr.bf16.mxu0 %v6846_v24  ;;  %vm2765_vm11 = vcmp.ge.s32.totalorder %v2755_v32, 0  ;;  %vm2815_vm12 = vcmp.lt.s32.totalorder %v2755_v32, 16 }
 0x2fc   : > { %vm2828_vm13 = vmand %vm2765_vm11, %vm2815_vm12 }
 0x2fd   : > { %v2713_v15 = vmax.f32 %v2673_v14, 0.0  ;;  %v2674_v1 = vadd.f32 %v8082_v19, %v2627_v47 }
 0x2fe   : > { %3552 = vmatpush1.bf16.msra.mxu0 %v6736_v11 }
 0x2ff   : > { %v2714_v12 = vmax.f32 %v2674_v1, 0.0  ;;  %v2864_v4 = vsel %vm2824_vm10, %v2713_v15, 0.0  ;;  %4074 = vmatprep.subr.bf16.mxu0 %v6846_v24 }
 0x300   : > { %v2189_v55 = vpop.f32.mrb[80].mxu0  ;;  %v2475_v16 = vpop.f32.mrb[108].mxu1 }
 0x301   : > { %v8101_v63 = vadd.f32 %v2189_v55, %v7993_v25  ;;  %v2477_v0 = vpop.f32.mrb[109].mxu1  ;;  %v2191_v2 = vpop.f32.mrb[81].mxu0  ;;  %v2865_v17 = vsel %vm2824_vm10, %v2714_v12, 0.0 }
 0x302   : > { %v2192_v38 = vpop.f32.mrb[82].mxu0  ;;  %v2478_v3 = vpop.f32.mrb[110].mxu1  ;;  %v2904_v10 = vpack.c.bf16 %v2865_v17, %v2864_v4 }
 0x303   : > { %v8107_v13 = vadd.f32 %v2192_v38, %v7995_v54  ;;  %v2194_v44 = vpop.f32.mrb[83].mxu0  ;;  %v2480_v18 = vpop.f32.mrb[111].mxu1 }
 0x304   : > { %3224 = vrot.lane.b32.xlu0 %v2904_v10, %s6847_s20  ;;  %v2925_v25 = vshrl.u32 %v2904_v10, 16  ;;  %v2928_v27 = vshll.u32 %v2904_v10, 16 }
 0x306   : > { %v3104_v46 = vrot.slane %v2928_v27, 1  ;;  %v2927_v31 = vrot.slane %v2925_v25, 7 }
 0x308   : > { %v3105_v20 = vor.u32 %v3104_v46, %v2925_v25  ;;  %v2197_v35 = vpop.f32.mrb[84].mxu0  ;;  %v2483_v36 = vpop.f32.mrb[112].mxu1  ;;  %v2930_v41 = vor.u32 %v2928_v27, %v2927_v31  ;;  %v2938_v54 = vsel %vm1059_vm9, %v2927_v31, %v7090_v50 }
 0x309   : > { %v2630_v29 = vadd.f32 %v2483_v36, %v7950_v34  ;;  %v2485_v14 = vpop.f32.mrb[113].mxu1  ;;  %v2199_v47 = vpop.f32.mrb[85].mxu0  ;;  %3185 = vst.msk [vmem:[#allocation3 + $0x10] sm:$0xff] %vm1377_vm7, %v2938_v54  ;;  %v2756_v35 = vadd.s32 2, %v8084_v33 }
 0x30a   : > { %v3107_v26 = vsel %vm1278_vm4, %v3105_v20, %v7096_v52  ;;  %v2200_v37 = vpop.f32.mrb[86].mxu0  ;;  %v2486_v60 = vpop.f32.mrb[114].mxu1  ;;  %v3103_v8 = vsel %vm7142_vm1, 0, %v2930_v41 }
 0x30b   : > { %3304 = vst.msk [vmem:[#allocation3 + $0x8] sm:$0xff] %vm1377_vm7, %v3107_v26  ;;  %v2677_v15 = vadd.f32 %v8082_v19, %v2630_v29  ;;  %v2631_v1 = vadd.f32 %v2486_v60, %v7953_v45  ;;  %v2202_v12 = vpop.f32.mrb[87].mxu0  ;;  %v2488_v34 = vpop.f32.mrb[115].mxu1  ;;  %3184 = vst.msk [vmem:[#allocation3] sm:$0xff] %vm1377_vm7, %v3103_v8  ;;  %vm2766_vm1 = vcmp.ge.s32.totalorder %v2756_v35, 0  ;;  %vm2816_vm15 = vcmp.lt.s32.totalorder %v2756_v35, 16 }
 0x30c   : > { %vm2832_vm0 = vmand %vm2766_vm1, %vm2816_vm15  ;;  %v2757_v35 = vadd.s32 3, %v8084_v33 }
 0x30d   : > { %v2717_v55 = vmax.f32 %v2677_v15, 0.0  ;;  %v2678_v16 = vadd.f32 %v8082_v19, %v2631_v1 }
 0x30e   : > { %vm2767_vm2 = vcmp.ge.s32.totalorder %v2757_v35, 0  ;;  %vm2817_vm3 = vcmp.lt.s32.totalorder %v2757_v35, 16 }
 0x30f   : > { %v2718_v0 = vmax.f32 %v2678_v16, 0.0  ;;  %v2868_v3 = vsel %vm2828_vm13, %v2717_v55, 0.0  ;;  %vm2836_vm5 = vmand %vm2767_vm2, %vm2817_vm3 }
 0x310   : > { %v2205_v2 = vpop.f32.mrb[88].mxu0  ;;  %v2491_v21 = vpop.f32.mrb[116].mxu1 }
 0x311   : > { %v8126_v4 = vadd.f32 %v2205_v2, %v8018_v7  ;;  %v2207_v17 = vpop.f32.mrb[89].mxu0  ;;  %v2493_v38 = vpop.f32.mrb[117].mxu1  ;;  %v2869_v45 = vsel %vm2828_vm13, %v2718_v0, 0.0 }
 0x312   : > { %v2208_v10 = vpop.f32.mrb[90].mxu0  ;;  %v2494_v11 = vpop.f32.mrb[118].mxu1  ;;  %v3325_v44 = vld [vmem:[#allocation3 + $0x8] sm:$0xff]  ;;  %v2906_v18 = vpack.c.bf16 %v2869_v45, %v2868_v3 }
 0x313   : > { %v8129_v25 = vadd.f32 %v2208_v10, %v8020_v30  ;;  %v2210_v27 = vpop.f32.mrb[91].mxu0  ;;  %v2496_v46 = vpop.f32.mrb[119].mxu1  ;;  %6413 = vmatprep.mubr.msk.bf16.mxu1 %vm1377_vm7, %v3325_v44 }
 0x314   : > { %3228 = vrot.lane.b32.xlu1 %v2906_v18, %s6847_s20  ;;  %v2940_v31 = vshrl.u32 %v2906_v18, 16  ;;  %v2943_v7 = vshll.u32 %v2906_v18, 16 }
 0x316   : > { %v2942_v32 = vrot.slane %v2940_v31, 7  ;;  %v3109_v20 = vrot.slane %v2943_v7, 1 }
 0x318   : > { %v2954_v36 = vsel %vm1059_vm9, %v2942_v32, %v7090_v50  ;;  %v3110_v41 = vsel %vm1278_vm4, %v7096_v52, %v3109_v20  ;;  %v3111_v30 = vor.u32 %v3109_v20, %v2940_v31  ;;  %v2213_v54 = vpop.f32.mrb[92].mxu0  ;;  %v2499_v29 = vpop.f32.mrb[120].mxu1  ;;  %v2945_v14 = vor.u32 %v2943_v7, %v2942_v32 }
 0x319   : > { %3187 = vst.msk [vmem:[#allocation3 + $0x30] sm:$0xff] %vm1377_vm7, %v2954_v36  ;;  %3305 = vst.msk [vmem:[#allocation3 + $0x18] sm:$0xff] %vm1377_vm7, %v3110_v41  ;;  %v2634_v47 = vadd.f32 %v2499_v29, %v7969_v59  ;;  %v2215_v26 = vpop.f32.mrb[93].mxu0  ;;  %v2501_v37 = vpop.f32.mrb[121].mxu1 }
 0x31a   : > { %v3113_v60 = vsel %vm1278_vm4, %v3111_v30, %v7096_v52  ;;  %3287 = vst.msk [vmem:[#allocation3 + $0x30] sm:$0xff] %vm1498_vm14, %v7875_v40  ;;  %v2216_v8 = vpop.f32.mrb[94].mxu0  ;;  %v2502_v15 = vpop.f32.mrb[122].mxu1  ;;  %v2946_v1 = vsel %vm1059_vm9, %v7090_v50, %v2945_v14 }
 0x31b   : > { %3306 = vst.msk [vmem:[#allocation3 + $0x28] sm:$0xff] %vm1377_vm7, %v3113_v60  ;;  %v2681_v12 = vadd.f32 %v8082_v19, %v2634_v47  ;;  %v2635_v34 = vadd.f32 %v2502_v15, %v7975_v49  ;;  %v2218_v59 = vpop.f32.mrb[95].mxu0  ;;  %v2504_v55 = vpop.f32.mrb[123].mxu1  ;;  %3186 = vst.msk [vmem:[#allocation3 + $0x20] sm:$0xff] %vm1377_vm7, %v2946_v1 }
 0x31d   : > { %v2721_v16 = vmax.f32 %v2681_v12, 0.0  ;;  %v2682_v40 = vadd.f32 %v8082_v19, %v2635_v34 }
 0x31f   : > { %v2722_v0 = vmax.f32 %v2682_v40, 0.0  ;;  %v2872_v45 = vsel %vm2832_vm0, %v2721_v16, 0.0 }
 0x320   : > { %v2221_v2 = vpop.f32.mrb[96].mxu0  ;;  %v2507_v21 = vpop.f32.mrb[124].mxu1 }
 0x321   : > { %v8153_v17 = vadd.f32 %v2221_v2, %v8048_v58  ;;  %v2223_v38 = vpop.f32.mrb[97].mxu0  ;;  %v2509_v3 = vpop.f32.mrb[125].mxu1  ;;  %v2873_v49 = vsel %vm2832_vm0, %v2722_v0, 0.0 }
 0x322   : > { %v2224_v10 = vpop.f32.mrb[98].mxu0  ;;  %v2510_v11 = vpop.f32.mrb[126].mxu1  ;;  %v8155_v44 = vld [vmem:[#allocation3 + $0x28] sm:$0xff]  ;;  %v2908_v18 = vpack.c.bf16 %v2873_v49, %v2872_v45 }
 0x323   : > { %v8158_v27 = vadd.f32 %v2224_v10, %v8050_v51  ;;  %v2226_v46 = vpop.f32.mrb[99].mxu0  ;;  %v2512_v31 = vpop.f32.mrb[127].mxu1  ;;  %6385 = vmatprep.mubr.msk.bf16.mxu0 %vm1377_vm7, %v8155_v44  ;;  %v2758_v11 = vadd.s32 4, %v8084_v33 }
 0x324   : > { %v2956_v7 = vshrl.u32 %v2908_v18, 16  ;;  %v2959_v58 = vshll.u32 %v2908_v18, 16  ;;  %3232 = vrot.lane.b32.xlu1 %v2908_v18, %s6847_s20 }
 0x325   : > { %vm2768_vm6 = vcmp.ge.s32.totalorder %v2758_v11, 0  ;;  %vm2818_vm8 = vcmp.lt.s32.totalorder %v2758_v11, 16 }
 0x326   : > { %v2958_v32 = vrot.slane %v2956_v7, 7  ;;  %v3115_v20 = vrot.slane %v2959_v58, 1  ;;  %vm2840_vm10 = vmand %vm2768_vm6, %vm2818_vm8 }
 0x328   : > { %v2970_v36 = vsel %vm1059_vm9, %v2958_v32, %v7090_v50  ;;  %v3116_v51 = vsel %vm1278_vm4, %v7096_v52, %v3115_v20  ;;  %v3117_v41 = vor.u32 %v3115_v20, %v2956_v7  ;;  %v2229_v30 = vpop.f32.mrb[100].mxu0  ;;  %v2515_v54 = vpop.f32.mrb[128].mxu1  ;;  %v2961_v29 = vor.u32 %v2959_v58, %v2958_v32 }
 0x329   : > { %3189 = vst.msk [vmem:[#allocation3 + $0x50] sm:$0xff] %vm1377_vm7, %v2970_v36  ;;  %3307 = vst.msk [vmem:[#allocation3 + $0x38] sm:$0xff] %vm1377_vm7, %v3116_v51  ;;  %v2638_v14 = vadd.f32 %v2515_v54, %v7987_v28  ;;  %v2231_v47 = vpop.f32.mrb[101].mxu0  ;;  %v2517_v26 = vpop.f32.mrb[129].mxu1 }
 0x32a   : > { %v3119_v37 = vsel %vm1278_vm4, %v3117_v41, %v7096_v52  ;;  %3289 = vst.msk [vmem:[#allocation3 + $0x50] sm:$0xff] %vm1498_vm14, %v7884_v42  ;;  %v2232_v60 = vpop.f32.mrb[102].mxu0  ;;  %v2518_v8 = vpop.f32.mrb[130].mxu1  ;;  %v2962_v15 = vsel %vm1059_vm9, %v7090_v50, %v2961_v29 }
 0x32b   : > { %3308 = vst.msk [vmem:[#allocation3 + $0x48] sm:$0xff] %vm1377_vm7, %v3119_v37  ;;  %v2685_v1 = vadd.f32 %v8082_v19, %v2638_v14  ;;  %v2639_v12 = vadd.f32 %v2518_v8, %v7991_v5  ;;  %v2234_v28 = vpop.f32.mrb[103].mxu0  ;;  %v2520_v34 = vpop.f32.mrb[131].mxu1  ;;  %3188 = vst.msk [vmem:[#allocation3 + $0x40] sm:$0xff] %vm1377_vm7, %v2962_v15 }
 0x32c   : > { %v2759_v34 = vadd.s32 5, %v8084_v33 }
 0x32d   : > { %v2725_v59 = vmax.f32 %v2685_v1, 0.0  ;;  %v2686_v42 = vadd.f32 %v8082_v19, %v2639_v12 }
 0x32e   : > { %vm2769_vm11 = vcmp.ge.s32.totalorder %v2759_v34, 0  ;;  %vm2819_vm12 = vcmp.lt.s32.totalorder %v2759_v34, 16 }
 0x32f   : > { %v2726_v55 = vmax.f32 %v2686_v42, 0.0  ;;  %v2876_v0 = vsel %vm2836_vm5, %v2725_v59, 0.0  ;;  %vm2844_vm13 = vmand %vm2769_vm11, %vm2819_vm12 }
 0x330   : > { %v2523_v16 = vpop.f32.mrb[132].mxu1 }
 0x331   : > { %v2525_v40 = vpop.f32.mrb[133].mxu1  ;;  %v2877_v2 = vsel %vm2836_vm5, %v2726_v55, 0.0 }
 0x332   : > { %v2526_v21 = vpop.f32.mrb[134].mxu1  ;;  %v2910_v38 = vpack.c.bf16 %v2877_v2, %v2876_v0 }
 0x333   : > { %v2528_v3 = vpop.f32.mrb[135].mxu1 }
 0x334   : > { %v2972_v45 = vshrl.u32 %v2910_v38, 16  ;;  %v2975_v5 = vshll.u32 %v2910_v38, 16  ;;  %3236 = vrot.lane.b32.xlu1 %v2910_v38, %s6847_s20 }
 0x336   : > { %v2974_v49 = vrot.slane %v2972_v45, 7  ;;  %v3121_v10 = vrot.slane %v2975_v5, 1 }
 0x338   : > { %v2986_v18 = vsel %vm1059_vm9, %v2974_v49, %v7090_v50  ;;  %v3122_v46 = vsel %vm1278_vm4, %v7096_v52, %v3121_v10  ;;  %v3123_v31 = vor.u32 %v3121_v10, %v2972_v45  ;;  %v2531_v7 = vpop.f32.mrb[136].mxu1  ;;  %v2977_v58 = vor.u32 %v2975_v5, %v2974_v49 }
 0x339   : > { %3191 = vst.msk [vmem:[#allocation3 + $0x70] sm:$0xff] %vm1377_vm7, %v2986_v18  ;;  %3309 = vst.msk [vmem:[#allocation3 + $0x58] sm:$0xff] %vm1377_vm7, %v3122_v46  ;;  %v2642_v32 = vadd.f32 %v2531_v7, %v8004_v56  ;;  %v2533_v20 = vpop.f32.mrb[137].mxu1 }
 0x33a   : > { %v3125_v35 = vsel %vm1278_vm4, %v3123_v31, %v7096_v52  ;;  %3291 = vst.msk [vmem:[#allocation3 + $0x70] sm:$0xff] %vm1498_vm14, %v7887_v43  ;;  %v2534_v36 = vpop.f32.mrb[138].mxu1  ;;  %v2978_v51 = vsel %vm1059_vm9, %v7090_v50, %v2977_v58 }
 0x33b   : > { %3310 = vst.msk [vmem:[#allocation3 + $0x68] sm:$0xff] %vm1377_vm7, %v3125_v35  ;;  %v2689_v41 = vadd.f32 %v8082_v19, %v2642_v32  ;;  %v2643_v30 = vadd.f32 %v2534_v36, %v8009_v6  ;;  %v2536_v54 = vpop.f32.mrb[139].mxu1  ;;  %3190 = vst.msk [vmem:[#allocation3 + $0x60] sm:$0xff] %vm1377_vm7, %v2978_v51  ;;  %v2760_v51 = vadd.s32 6, %v8084_v33 }
 0x33d   : > { %v2729_v56 = vmax.f32 %v2689_v41, 0.0  ;;  %v2690_v29 = vadd.f32 %v8082_v19, %v2643_v30  ;;  %vm2770_vm1 = vcmp.ge.s32.totalorder %v2760_v51, 0  ;;  %vm2820_vm15 = vcmp.lt.s32.totalorder %v2760_v51, 16 }
 0x33e   : > { %vm2848_vm0 = vmand %vm2770_vm1, %vm2820_vm15  ;;  %vm5400_vm1 = vcmask 1044484   ;;  %vm5402_vm15 = vcmask 1045509  }
 0x33f   : > { %v2730_v43 = vmax.f32 %v2690_v29, 0.0  ;;  %v2880_v26 = vsel %vm2840_vm10, %v2729_v56, 0.0 }
 0x340   : > { %v2539_v14 = vpop.f32.mrb[140].mxu1 }
 0x341   : > { %v2541_v47 = vpop.f32.mrb[141].mxu1  ;;  %v2881_v37 = vsel %vm2840_vm10, %v2730_v43, 0.0 }
 0x342   : > { %v2542_v60 = vpop.f32.mrb[142].mxu1  ;;  %v2912_v8 = vpack.c.bf16 %v2881_v37, %v2880_v26 }
 0x343   : > { %v2544_v15 = vpop.f32.mrb[143].mxu1 }
 0x344   : > { %v2988_v1 = vshrl.u32 %v2912_v8, 16  ;;  %v2991_v12 = vshll.u32 %v2912_v8, 16  ;;  %3240 = vrot.lane.b32.xlu1 %v2912_v8, %s6847_s20 }
 0x346   : > { %v2990_v6 = vrot.slane %v2988_v1, 7  ;;  %v3127_v28 = vrot.slane %v2991_v12, 1 }
 0x348   : > { %v3002_v59 = vsel %vm1059_vm9, %v2990_v6, %v7090_v50  ;;  %v3128_v42 = vsel %vm1278_vm4, %v7096_v52, %v3127_v28  ;;  %v3129_v55 = vor.u32 %v3127_v28, %v2988_v1  ;;  %v2547_v16 = vpop.f32.mrb[144].mxu1  ;;  %v2993_v40 = vor.u32 %v2991_v12, %v2990_v6 }
 0x349   : > { %3193 = vst.msk [vmem:[#allocation3 + $0x90] sm:$0xff] %vm1377_vm7, %v3002_v59  ;;  %3311 = vst.msk [vmem:[#allocation3 + $0x78] sm:$0xff] %vm1377_vm7, %v3128_v42  ;;  %v2646_v0 = vadd.f32 %v2547_v16, %v8034_v22  ;;  %v2549_v2 = vpop.f32.mrb[145].mxu1 }
 0x34a   : > { %v3131_v21 = vsel %vm1278_vm4, %v3129_v55, %v7096_v52  ;;  %3293 = vst.msk [vmem:[#allocation3 + $0x90] sm:$0xff] %vm1498_vm14, %v7895_v48  ;;  %v2550_v38 = vpop.f32.mrb[146].mxu1  ;;  %v2994_v3 = vsel %vm1059_vm9, %v7090_v50, %v2993_v40  ;;  %v2761_v2 = vadd.s32 7, %v8084_v33 }
 0x34b   : > { %3312 = vst.msk [vmem:[#allocation3 + $0x88] sm:$0xff] %vm1377_vm7, %v3131_v21  ;;  %v2693_v45 = vadd.f32 %v8082_v19, %v2646_v0  ;;  %v2647_v5 = vadd.f32 %v2550_v38, %v8039_v23  ;;  %v2552_v49 = vpop.f32.mrb[147].mxu1  ;;  %3192 = vst.msk [vmem:[#allocation3 + $0x80] sm:$0xff] %vm1377_vm7, %v2994_v3 }
 0x34c   : > { %vm2771_vm2 = vcmp.ge.s32.totalorder %v2761_v2, 0  ;;  %vm2821_vm3 = vcmp.lt.s32.totalorder %v2761_v2, 16 }
 0x34d   : > { %v2733_v22 = vmax.f32 %v2693_v45, 0.0  ;;  %v2694_v10 = vadd.f32 %v8082_v19, %v2647_v5  ;;  %vm2852_vm5 = vmand %vm2771_vm2, %vm2821_vm3  ;;  %vm5406_vm2 = vcmask 1047559  }
 0x34f   : > { %v2734_v48 = vmax.f32 %v2694_v10, 0.0  ;;  %v2884_v46 = vsel %vm2844_vm13, %v2733_v22, 0.0 }
 0x350   : > { %v2555_v11 = vpop.f32.mrb[148].mxu1 }
 0x351   : > { %v2557_v18 = vpop.f32.mrb[149].mxu1  ;;  %v2885_v31 = vsel %vm2844_vm13, %v2734_v48, 0.0 }
 0x352   : > { %v2558_v7 = vpop.f32.mrb[150].mxu1  ;;  %v2914_v58 = vpack.c.bf16 %v2885_v31, %v2884_v46 }
 0x353   : > { %v2560_v32 = vpop.f32.mrb[151].mxu1 }
 0x354   : > { %v3004_v20 = vshrl.u32 %v2914_v58, 16  ;;  %v3007_v35 = vshll.u32 %v2914_v58, 16  ;;  %3244 = vrot.lane.b32.xlu1 %v2914_v58, %s6847_s20 }
 0x356   : > { %v3006_v23 = vrot.slane %v3004_v20, 7  ;;  %v3133_v36 = vrot.slane %v3007_v35, 1 }
 0x358   : > { %v3018_v41 = vsel %vm1059_vm9, %v3006_v23, %v7090_v50  ;;  %v3134_v30 = vsel %vm1278_vm4, %v7096_v52, %v3133_v36  ;;  %v3135_v54 = vor.u32 %v3133_v36, %v3004_v20  ;;  %v2563_v56 = vpop.f32.mrb[152].mxu1  ;;  %v3009_v29 = vor.u32 %v3007_v35, %v3006_v23 }
 0x359   : > { %3195 = vst.msk [vmem:[#allocation3 + $0xb0] sm:$0xff] %vm1377_vm7, %v3018_v41  ;;  %3313 = vst.msk [vmem:[#allocation3 + $0x98] sm:$0xff] %vm1377_vm7, %v3134_v30  ;;  %v2650_v43 = vadd.f32 %v2563_v56, %v8065_v62  ;;  %v2565_v14 = vpop.f32.mrb[153].mxu1 }
 0x35a   : > { %v3137_v47 = vsel %vm1278_vm4, %v3135_v54, %v7096_v52  ;;  %3295 = vst.msk [vmem:[#allocation3 + $0xb0] sm:$0xff] %vm1498_vm14, %v7900_v53  ;;  %v2566_v26 = vpop.f32.mrb[154].mxu1  ;;  %v3010_v37 = vsel %vm1059_vm9, %v7090_v50, %v3009_v29  ;;  %v2762_v29 = vadd.s32 8, %v8084_v33 }
 0x35b   : > { %3314 = vst.msk [vmem:[#allocation3 + $0xa8] sm:$0xff] %vm1377_vm7, %v3137_v47  ;;  %v2697_v60 = vadd.f32 %v8082_v19, %v2650_v43  ;;  %v2651_v8 = vadd.f32 %v2566_v26, %v8069_v39  ;;  %v2568_v15 = vpop.f32.mrb[155].mxu1  ;;  %3194 = vst.msk [vmem:[#allocation3 + $0xa0] sm:$0xff] %vm1377_vm7, %v3010_v37 }
 0x35c   : > { %vm2772_vm6 = vcmp.ge.s32.totalorder %v2762_v29, 0  ;;  %vm2822_vm8 = vcmp.lt.s32.totalorder %v2762_v29, 16 }
 0x35d   : > { %v2737_v62 = vmax.f32 %v2697_v60, 0.0  ;;  %v2698_v1 = vadd.f32 %v8082_v19, %v2651_v8  ;;  %vm2856_vm10 = vmand %vm2772_vm6, %vm2822_vm8 }
 0x35f   : > { %v2738_v53 = vmax.f32 %v2698_v1, 0.0  ;;  %v2888_v28 = vsel %vm2848_vm0, %v2737_v62, 0.0 }
 0x360   : > { %v2571_v12 = vpop.f32.mrb[156].mxu1 }
 0x361   : > { %v2573_v6 = vpop.f32.mrb[157].mxu1  ;;  %v2889_v34 = vsel %vm2848_vm0, %v2738_v53, 0.0  ;;  %vm5404_vm0 = vcmask 1046534  }
 0x362   : > { %v2574_v59 = vpop.f32.mrb[158].mxu1  ;;  %v2916_v42 = vpack.c.bf16 %v2889_v34, %v2888_v28 }
 0x363   : > { %v2576_v55 = vpop.f32.mrb[159].mxu1  ;;  %v3327_v59 = vld [vmem:[#allocation3 + $0x18] sm:$0xff] }
 0x364   : > { %v3020_v16 = vshrl.u32 %v2916_v42, 16  ;;  %v3023_v40 = vshll.u32 %v2916_v42, 16  ;;  %3248 = vrot.lane.b32.xlu1 %v2916_v42, %s6847_s20 }
 0x366   : > { %v3022_v39 = vrot.slane %v3020_v16, 7  ;;  %v3139_v0 = vrot.slane %v3023_v40, 1 }
 0x368   : > { %v3034_v21 = vsel %vm1059_vm9, %v3022_v39, %v7090_v50  ;;  %v3140_v38 = vsel %vm1278_vm4, %v7096_v52, %v3139_v0  ;;  %v3141_v3 = vor.u32 %v3139_v0, %v3020_v16  ;;  %v2579_v45 = vpop.f32.mrb[160].mxu1  ;;  %v3025_v5 = vor.u32 %v3023_v40, %v3022_v39 }
 0x369   : > { %3197 = vst.msk [vmem:[#allocation3 + $0xd0] sm:$0xff] %vm1377_vm7, %v3034_v21  ;;  %3315 = vst.msk [vmem:[#allocation3 + $0xb8] sm:$0xff] %vm1377_vm7, %v3140_v38  ;;  %v2654_v49 = vadd.f32 %v2579_v45, %v8101_v63  ;;  %v2581_v22 = vpop.f32.mrb[161].mxu1 }
 0x36a   : > { %v3143_v10 = vsel %vm1278_vm4, %v3141_v3, %v7096_v52  ;;  %3297 = vst.msk [vmem:[#allocation3 + $0xd0] sm:$0xff] %vm1498_vm14, %v7905_v57  ;;  %v2582_v48 = vpop.f32.mrb[162].mxu1  ;;  %v3026_v11 = vsel %vm1059_vm9, %v7090_v50, %v3025_v5  ;;  %v2763_v5 = vadd.s32 9, %v8084_v33 }
 0x36b   : > { %3316 = vst.msk [vmem:[#allocation3 + $0xc8] sm:$0xff] %vm1377_vm7, %v3143_v10  ;;  %v2701_v18 = vadd.f32 %v8082_v19, %v2654_v49  ;;  %v2655_v46 = vadd.f32 %v2582_v48, %v8107_v13  ;;  %v2584_v31 = vpop.f32.mrb[163].mxu1  ;;  %3196 = vst.msk [vmem:[#allocation3 + $0xc0] sm:$0xff] %vm1377_vm7, %v3026_v11 }
 0x36c   : > { %vm2773_vm11 = vcmp.ge.s32.totalorder %v2763_v5, 0  ;;  %vm2823_vm12 = vcmp.lt.s32.totalorder %v2763_v5, 16  ;;  %v8417_v5 = vld [vmem:[#allocation3 + $0x98] sm:$0xff] }
 0x36d   : > { %v2741_v63 = vmax.f32 %v2701_v18, 0.0  ;;  %v2702_v7 = vadd.f32 %v8082_v19, %v2655_v46  ;;  %vm2860_vm13 = vmand %vm2773_vm11, %vm2823_vm12 }
 0x36f   : > { %v2742_v57 = vmax.f32 %v2702_v7, 0.0  ;;  %v2892_v20 = vsel %vm2852_vm5, %v2741_v63, 0.0 }
 0x370   : > { %v2587_v58 = vpop.f32.mrb[164].mxu1 }
 0x371   : > { %v2589_v32 = vpop.f32.mrb[165].mxu1  ;;  %v2893_v35 = vsel %vm2852_vm5, %v2742_v57, 0.0 }
 0x372   : > { %v2590_v23 = vpop.f32.mrb[166].mxu1  ;;  %v2918_v36 = vpack.c.bf16 %v2893_v35, %v2892_v20 }
 0x373   : > { %v2592_v51 = vpop.f32.mrb[167].mxu1 }
 0x374   : > { %v3036_v41 = vshrl.u32 %v2918_v36, 16  ;;  %v3039_v30 = vshll.u32 %v2918_v36, 16  ;;  %3252 = vrot.lane.b32.xlu1 %v2918_v36, %s6847_s20  ;;  %v6738_v36 = vld [vmem:[%s10166_s5 + $0xc8] sm:$0xff]  }
 0x376   : > { %v3038_v13 = vrot.slane %v3036_v41, 7  ;;  %v3145_v54 = vrot.slane %v3039_v30, 1  ;;  %v3225_v56 = vpop.permute.xlu0 %3224 }
 0x377   : > { %3284 = vst.msk [vmem:[#allocation3] sm:$0xff] %vm1498_vm14, %v3225_v56 }
 0x378   : > { %v3050_v43 = vsel %vm1059_vm9, %v3038_v13, %v7090_v50  ;;  %v3146_v14 = vsel %vm1278_vm4, %v7096_v52, %v3145_v54  ;;  %v3147_v47 = vor.u32 %v3145_v54, %v3036_v41  ;;  %v2595_v26 = vpop.f32.mrb[168].mxu1  ;;  %v3041_v37 = vor.u32 %v3039_v30, %v3038_v13 }
 0x379   : > { %3199 = vst.msk [vmem:[#allocation3 + $0xf0] sm:$0xff] %vm1377_vm7, %v3050_v43  ;;  %3317 = vst.msk [vmem:[#allocation3 + $0xd8] sm:$0xff] %vm1377_vm7, %v3146_v14  ;;  %v2658_v60 = vadd.f32 %v2595_v26, %v8126_v4  ;;  %v2597_v8 = vpop.f32.mrb[169].mxu1  ;;  %v8324_v14 = vld [vmem:[#allocation3 + $0x30] sm:$0xff] }
 0x37a   : > { %v3149_v15 = vsel %vm1278_vm4, %v3147_v47, %v7096_v52  ;;  %3299 = vst.msk [vmem:[#allocation3 + $0xf0] sm:$0xff] %vm1498_vm14, %v7911_v61  ;;  %v2598_v62 = vpop.f32.mrb[170].mxu1  ;;  %v3042_v1 = vsel %vm1059_vm9, %v7090_v50, %v3041_v37  ;;  %v6739_v47 = vld [vmem:[%s10166_s5 + $0xd0] sm:$0xff]  }
 0x37b   : > { %3318 = vst.msk [vmem:[#allocation3 + $0xe8] sm:$0xff] %vm1377_vm7, %v3149_v15  ;;  %v2705_v53 = vadd.f32 %v8082_v19, %v2658_v60  ;;  %v2659_v12 = vadd.f32 %v2598_v62, %v8129_v25  ;;  %v2600_v6 = vpop.f32.mrb[171].mxu1  ;;  %3198 = vst.msk [vmem:[#allocation3 + $0xe0] sm:$0xff] %vm1377_vm7, %v3042_v1  ;;  %v6740_v62 = vld [vmem:[%s10166_s5 + $0xd8] sm:$0xff]  }
 0x37d   : > { %v2745_v4 = vmax.f32 %v2705_v53, 0.0  ;;  %v2706_v28 = vadd.f32 %v8082_v19, %v2659_v12 }
 0x37e   : > { %v3324_v34 = vld [vmem:[#allocation3] sm:$0xff] }
 0x37f   : > { %v2746_v61 = vmax.f32 %v2706_v28, 0.0  ;;  %3785 = vmatmul.mubr.bf16.vlgmr.msra.gmra.mrb[184].mxu1 %v3324_v34  ;;  %v2896_v16 = vsel %vm2856_vm10, %v2745_v4, 0.0  ;;  %v6741_v4 = vld [vmem:[%s10166_s5 + $0xe0] sm:$0xff]   ;;  %v8367_v34 = vld [vmem:[#allocation3 + $0x50] sm:$0xff] }
 0x380   : > { %v2603_v42 = vpop.f32.mrb[172].mxu1  ;;  %6414 = vmatprep.mubr.msk.bf16.mxu1 %vm1377_vm7, %v3327_v59 }
 0x381   : > { %v2605_v55 = vpop.f32.mrb[173].mxu1  ;;  %v2897_v40 = vsel %vm2856_vm10, %v2746_v61, 0.0  ;;  %v6743_v61 = vld [vmem:[%s10166_s5 + $0xf0] sm:$0xff]   ;;  %v8375_v42 = vld [vmem:[#allocation3 + $0x68] sm:$0xff] }
 0x382   : > { %v2606_v25 = vpop.f32.mrb[174].mxu1  ;;  %v2920_v39 = vpack.c.bf16 %v2897_v40, %v2896_v16  ;;  %v6744_v55 = vld [vmem:[%s10166_s5 + $0xf8] sm:$0xff]   ;;  %v6745_v16 = vld [vmem:[%s10166_s5 + $0x100] sm:$0xff]  }
 0x383   : > { %v2608_v0 = vpop.f32.mrb[175].mxu1  ;;  %v8390_v25 = vld [vmem:[#allocation3 + $0x78] sm:$0xff] }
 0x384   : > { %v3052_v2 = vshrl.u32 %v2920_v39, 16  ;;  %v3055_v21 = vshll.u32 %v2920_v39, 16  ;;  %3256 = vrot.lane.b32.xlu1 %v2920_v39, %s6847_s20  ;;  %v6746_v39 = vld [vmem:[%s10166_s5 + $0x108] sm:$0xff]   ;;  %v8398_v0 = vld [vmem:[#allocation3 + $0x70] sm:$0xff] }
 0x386   : > { %v3054_v38 = vrot.slane %v3052_v2, 7  ;;  %v3151_v3 = vrot.slane %v3055_v21, 1  ;;  %v3229_v45 = vpop.permute.xlu1 %3228 }
 0x387   : > { %3286 = vst.msk [vmem:[#allocation3 + $0x20] sm:$0xff] %vm1498_vm14, %v3229_v45 }
 0x388   : > { %v3152_v49 = vsel %vm1278_vm4, %v7096_v52, %v3151_v3  ;;  %v3153_v22 = vor.u32 %v3151_v3, %v3052_v2  ;;  %v2611_v10 = vpop.f32.mrb[176].mxu1  ;;  %3258 = vrot.lane.b32.xlu1 %v6848_v9, %s6847_s20  ;;  %v3057_v48 = vor.u32 %v3055_v21, %v3054_v38  ;;  %v3066_v11 = vsel %vm1059_vm9, %v3054_v38, %v7090_v50  ;;  %v6747_v2 = vld [vmem:[%s10166_s5 + $0x110] sm:$0xff]   ;;  %v8406_v38 = vld [vmem:[#allocation3 + $0x88] sm:$0xff]  ;;  %v6748_v3 = vld [vmem:[%s10166_s5 + $0x118] sm:$0xff]  }
 0x389   : > { %3319 = vst.msk [vmem:[#allocation3 + $0xf8] sm:$0xff] %vm1377_vm7, %v3152_v49  ;;  %v2662_v18 = vadd.f32 %v2611_v10, %v8153_v17  ;;  %v2613_v46 = vpop.f32.mrb[177].mxu1  ;;  %3201 = vst.msk [vmem:[#allocation3 + $0x110] sm:$0xff] %vm1377_vm7, %v3066_v11  ;;  %v6737_v17 = vld [vmem:[%s10166_s5 + $0xc0] sm:$0xff]   ;;  %v8421_v49 = vld [vmem:[#allocation3 + $0x90] sm:$0xff] }
 0x38a   : > { %v3155_v33 = vsel %vm1278_vm4, %v3153_v22, %v7096_v52  ;;  %v2614_v31 = vpop.f32.mrb[178].mxu1  ;;  %v3058_v63 = vsel %vm1059_vm9, %v7090_v50, %v3057_v48  ;;  %v8425_v10 = vld [vmem:[#allocation3 + $0xa8] sm:$0xff]  ;;  %v8432_v48 = vld [vmem:[#allocation3 + $0xb8] sm:$0xff]  ;;  %v8436_v11 = vld [vmem:[#allocation3 + $0xb0] sm:$0xff] }
 0x38b   : > { %3320 = vst.msk [vmem:[#allocation3 + $0x108] sm:$0xff] %vm1377_vm7, %v3155_v33  ;;  %v2709_v7 = vadd.f32 %v8082_v19, %v2662_v18  ;;  %v2663_v57 = vadd.f32 %v2614_v31, %v8158_v27  ;;  %v2616_v58 = vpop.f32.mrb[179].mxu1  ;;  %3200 = vst.msk [vmem:[#allocation3 + $0x100] sm:$0xff] %vm1377_vm7, %v3058_v63  ;;  %v8313_v27 = vld [vmem:[#allocation3 + $0x38] sm:$0xff]  ;;  %v8440_v46 = vld [vmem:[#allocation3 + $0xc8] sm:$0xff] }
 0x38c   : > { %3226 = vrot.lane.b32.xlu1 %v6848_v9, %s6847_s20  ;;  %v8447_v31 = vld [vmem:[#allocation3 + $0xd8] sm:$0xff]  ;;  %v8451_v63 = vld [vmem:[#allocation3 + $0xd0] sm:$0xff] }
 0x38d   : > { %v2749_v32 = vmax.f32 %v2709_v7, 0.0  ;;  %v2710_v20 = vadd.f32 %v8082_v19, %v2663_v57  ;;  %v8455_v57 = vld [vmem:[#allocation3 + $0xe8] sm:$0xff] }
 0x38e   : > { %v8310_v35 = vld [vmem:[#allocation3 + $0x20] sm:$0xff] }
 0x38f   : > { %v2750_v23 = vmax.f32 %v2710_v20, 0.0  ;;  %3562 = vmatmul.mubr.bf16.vlgmr.msra.gmra.mrb[104].mxu0 %v8310_v35  ;;  %v2900_v41 = vsel %vm2860_vm13, %v2749_v32, 0.0  ;;  %v8466_v32 = vld [vmem:[#allocation3 + $0xf0] sm:$0xff] }
 0x390   : > { %4075 = vmatpush1.bf16.msra.mxu0 %v6737_v17  ;;  %6386 = vmatprep.mubr.msk.bf16.mxu0 %vm1377_vm7, %v8313_v27  ;;  %v2619_v51 = vpop.f32.mrb[180].mxu1  ;;  %v8462_v17 = vld [vmem:[#allocation3 + $0xf8] sm:$0xff] }
 0x391   : > { %v2901_v30 = vsel %vm2860_vm13, %v2750_v23, 0.0  ;;  %4076 = vmatprep.subr.bf16.mxu0 %v6846_v24  ;;  %v2621_v19 = vpop.f32.mrb[181].mxu1  ;;  %3262 = vrot.lane.b32.xlu1 %v6848_v9, %s6847_s20  ;;  %v8332_v9 = vld [vmem:[#allocation3 + $0x48] sm:$0xff] }
 0x392   : > { %v2922_v13 = vpack.c.bf16 %v2901_v30, %v2900_v41  ;;  %v2622_v54 = vpop.f32.mrb[182].mxu1  ;;  %v8470_v23 = vld [vmem:[#allocation3 + $0x108] sm:$0xff] }
 0x393   : > { %v2624_v56 = vpop.f32.mrb[183].mxu1 }
 0x394   : > { %v3068_v29 = vshrl.u32 %v2922_v13, 16  ;;  %v3071_v43 = vshll.u32 %v2922_v13, 16  ;;  %3260 = vrot.lane.b32.xlu0 %v2922_v13, %s6847_s20  ;;  %4077 = vmatpush1.bf16.msra.mxu0 %v6738_v36 }
 0x395   : > { %4078 = vmatprep.subr.bf16.mxu0 %v6846_v24 }
 0x396   : > { %v3070_v26 = vrot.slane %v3068_v29, 7  ;;  %v3157_v37 = vrot.slane %v3071_v43, 1  ;;  %v3233_v60 = vpop.permute.xlu1 %3232 }
 0x397   : > { %3288 = vst.msk [vmem:[#allocation3 + $0x40] sm:$0xff] %vm1498_vm14, %v3233_v60  ;;  %3570 = vmatmul.mubr.bf16.gmra.mrb[108].mxu0 %v8324_v14 }
 0x398   : > { %v3158_v8 = vsel %vm1278_vm4, %v7096_v52, %v3157_v37  ;;  %v3159_v15 = vor.u32 %v3157_v37, %v3068_v29  ;;  %6387 = vmatprep.mubr.msk.bf16.mxu0 %vm1377_vm7, %v8332_v9  ;;  %4079 = vmatpush1.bf16.msra.mxu0 %v6739_v47  ;;  %v3073_v1 = vor.u32 %v3071_v43, %v3070_v26 }
 0x399   : > { %3321 = vst.msk [vmem:[#allocation3 + $0x118] sm:$0xff] %vm1377_vm7, %v3158_v8  ;;  %4080 = vmatprep.subr.bf16.mxu0 %v6846_v24  ;;  %v3082_v53 = vsel %vm1059_vm9, %v3070_v26, %v7090_v50 }
 0x39a   : > { %v3161_v12 = vsel %vm1278_vm4, %v3159_v15, %v7096_v52  ;;  %v3074_v6 = vsel %vm1059_vm9, %v7090_v50, %v3073_v1  ;;  %3203 = vst.msk [vmem:[#allocation3 + $0x130] sm:$0xff] %vm1377_vm7, %v3082_v53  ;;  %v8359_v52 = vld [vmem:[#allocation3 + $0x58] sm:$0xff]  ;;  %v6742_v50 = vld [vmem:[%s10166_s5 + $0xe8] sm:$0xff]   ;;  %vm5394_vm4 = vcmask 1041409   ;;  %vm5396_vm9 = vcmask 1042434  }
 0x39b   : > { %3322 = vst.msk [vmem:[#allocation3 + $0x128] sm:$0xff] %vm1377_vm7, %v3161_v12  ;;  %3202 = vst.msk [vmem:[#allocation3 + $0x120] sm:$0xff] %vm1377_vm7, %v3074_v6 }
 0x39c   : > { %4081 = vmatpush1.bf16.msra.mxu0 %v6740_v62 }
 0x39d   : > { %4082 = vmatprep.subr.bf16.mxu0 %v6846_v24 }
 0x39e   : > { %v8356_v28 = vld [vmem:[#allocation3 + $0x40] sm:$0xff] }
 0x39f   : > { %3576 = vmatmul.mubr.bf16.gmra.mrb[112].mxu0 %v8356_v28 }
 0x3a0   : > { %6388 = vmatprep.mubr.msk.bf16.mxu0 %vm1377_vm7, %v8359_v52  ;;  %4083 = vmatpush1.bf16.msra.mxu0 %v6741_v4  ;;  %v8479_v30 = vld [vmem:[#allocation3 + $0x118] sm:$0xff] }
 0x3a1   : > { %4084 = vmatprep.subr.bf16.mxu0 %v6846_v24 }
 0x3a2   : > { %v3926_v6 = vld [vmem:[#allocation3 + $0x128] sm:$0xff] }
 0x3a4   : > { %4085 = vmatpush1.bf16.msra.mxu0 %v6742_v50 }
 0x3a5   : > { %4086 = vmatprep.subr.bf16.mxu0 %v6846_v24 }
 0x3a6   : > { %v3237_v59 = vpop.permute.xlu1 %3236 }
 0x3a7   : > { %3290 = vst.msk [vmem:[#allocation3 + $0x60] sm:$0xff] %vm1498_vm14, %v3237_v59  ;;  %3584 = vmatmul.mubr.bf16.gmra.mrb[116].mxu0 %v8367_v34 }
 0x3a8   : > { %6389 = vmatprep.mubr.msk.bf16.mxu0 %vm1377_vm7, %v8375_v42  ;;  %4087 = vmatpush1.bf16.msra.mxu0 %v6743_v61 }
 0x3a9   : > { %4088 = vmatprep.subr.bf16.mxu0 %v6846_v24 }
 0x3ac   : > { %4089 = vmatpush1.bf16.msra.mxu0 %v6744_v55 }
 0x3ad   : > { %4090 = vmatprep.subr.bf16.mxu0 %v6846_v24 }
 0x3ae   : > { %v8387_v40 = vld [vmem:[#allocation3 + $0x60] sm:$0xff] }
 0x3af   : > { %3590 = vmatmul.mubr.bf16.gmra.mrb[120].mxu0 %v8387_v40 }
 0x3b0   : > { %6390 = vmatprep.mubr.msk.bf16.mxu0 %vm1377_vm7, %v8390_v25  ;;  %4091 = vmatpush1.bf16.msra.mxu0 %v6745_v16 }
 0x3b1   : > { %4092 = vmatprep.subr.bf16.mxu0 %v6846_v24 }
 0x3b4   : > { %4093 = vmatpush1.bf16.msra.mxu0 %v6746_v39 }
 0x3b5   : > { %4094 = vmatprep.subr.bf16.mxu0 %v6846_v24 }
 0x3b6   : > { %v3241_v21 = vpop.permute.xlu1 %3240 }
 0x3b7   : > { %3292 = vst.msk [vmem:[#allocation3 + $0x80] sm:$0xff] %vm1498_vm14, %v3241_v21  ;;  %3598 = vmatmul.mubr.bf16.gmra.mrb[124].mxu0 %v8398_v0 }
 0x3b8   : > { %6391 = vmatprep.mubr.msk.bf16.mxu0 %vm1377_vm7, %v8406_v38  ;;  %4095 = vmatpush1.bf16.msra.mxu0 %v6747_v2  ;;  %v3928_v2 = vld [vmem:[#allocation3 + $0x138] sm:$0xff] }
 0x3b9   : > { %4096 = vmatprep.subr.bf16.mxu0 %v6846_v24 }
 0x3bc   : > { %4097 = vmatpush1.bf16.msra.mxu0 %v6748_v3 }
 0x3be   : > { %v8414_v45 = vld [vmem:[#allocation3 + $0x80] sm:$0xff] }
 0x3bf   : > { %3604 = vmatmul.mubr.bf16.gmra.mrb[128].mxu0 %v8414_v45 }
 0x3c0   : > { %6392 = vmatprep.mubr.msk.bf16.mxu0 %vm1377_vm7, %v8417_v5 }
 0x3c6   : > { %v3245_v22 = vpop.permute.xlu1 %3244 }
 0x3c7   : > { %3294 = vst.msk [vmem:[#allocation3 + $0xa0] sm:$0xff] %vm1498_vm14, %v3245_v22  ;;  %3612 = vmatmul.mubr.bf16.gmra.mrb[132].mxu0 %v8421_v49 }
 0x3c8   : > { %6393 = vmatprep.mubr.msk.bf16.mxu0 %vm1377_vm7, %v8425_v10 }
 0x3ce   : > { %v8429_v24 = vld [vmem:[#allocation3 + $0xa0] sm:$0xff] }
 0x3cf   : > { %3618 = vmatmul.mubr.bf16.gmra.mrb[136].mxu0 %v8429_v24 }
 0x3d0   : > { %6394 = vmatprep.mubr.msk.bf16.mxu0 %vm1377_vm7, %v8432_v48 }
 0x3d6   : > { %v3249_v18 = vpop.permute.xlu1 %3248 }
 0x3d7   : > { %3296 = vst.msk [vmem:[#allocation3 + $0xc0] sm:$0xff] %vm1498_vm14, %v3249_v18  ;;  %3626 = vmatmul.mubr.bf16.gmra.mrb[140].mxu0 %v8436_v11 }
 0x3d8   : > { %6395 = vmatprep.mubr.msk.bf16.mxu0 %vm1377_vm7, %v8440_v46 }
 0x3de   : > { %v8444_v33 = vld [vmem:[#allocation3 + $0xc0] sm:$0xff] }
 0x3df   : > { %3632 = vmatmul.mubr.bf16.gmra.mrb[144].mxu0 %v8444_v33 }
 0x3e0   : > { %6396 = vmatprep.mubr.msk.bf16.mxu0 %vm1377_vm7, %v8447_v31 }
 0x3e6   : > { %v3253_v7 = vpop.permute.xlu1 %3252 }
 0x3e7   : > { %3298 = vst.msk [vmem:[#allocation3 + $0xe0] sm:$0xff] %vm1498_vm14, %v3253_v7  ;;  %3640 = vmatmul.mubr.bf16.gmra.mrb[148].mxu0 %v8451_v63 }
 0x3e8   : > { %6397 = vmatprep.mubr.msk.bf16.mxu0 %vm1377_vm7, %v8455_v57 }
 0x3ee   : > { %v8459_v58 = vld [vmem:[#allocation3 + $0xe0] sm:$0xff] }
 0x3ef   : > { %3646 = vmatmul.mubr.bf16.gmra.mrb[152].mxu0 %v8459_v58 }
 0x3f0   : > { %6398 = vmatprep.mubr.msk.bf16.mxu0 %vm1377_vm7, %v8462_v17 }
 0x3f6   : > { %v3257_v20 = vpop.permute.xlu1 %3256 }
 0x3f7   : > { %3300 = vst.msk [vmem:[#allocation3 + $0x100] sm:$0xff] %vm1498_vm14, %v3257_v20  ;;  %3654 = vmatmul.mubr.bf16.gmra.mrb[156].mxu0 %v8466_v32 }
 0x3f8   : > { %6399 = vmatprep.mubr.msk.bf16.mxu0 %vm1377_vm7, %v8470_v23 }
 0x3fa   : > { %v3259_v36 = vpop.permute.xlu1 %3258 }
 0x3fb   : > { %3301 = vst.msk [vmem:[#allocation3 + $0x110] sm:$0xff] %vm1498_vm14, %v3259_v36 }
 0x3fe   : > { %v3227_v51 = vpop.permute.xlu1 %3226  ;;  %v8475_v41 = vld [vmem:[#allocation3 + $0x100] sm:$0xff] }
 0x3ff   : > { %3285 = vst.msk [vmem:[#allocation3 + $0x10] sm:$0xff] %vm1498_vm14, %v3227_v51  ;;  %3660 = vmatmul.mubr.bf16.gmra.mrb[160].mxu0 %v8475_v41 }
 0x400   : > { %6400 = vmatprep.mubr.msk.bf16.mxu0 %vm1377_vm7, %v8479_v30 }
 0x402   : > { %v8483_v19 = vld [vmem:[#allocation3 + $0x110] sm:$0xff] }
 0x403   : > { %v3263_v16 = vpop.permute.xlu1 %3262 }
 0x404   : > { %3303 = vst.msk [vmem:[#allocation3 + $0x130] sm:$0xff] %vm1498_vm14, %v3263_v16 }
 0x406   : > { %v3261_v13 = vpop.permute.xlu0 %3260  ;;  %v3326_v54 = vld [vmem:[#allocation3 + $0x10] sm:$0xff] }
 0x407   : > { %3302 = vst.msk [vmem:[#allocation3 + $0x120] sm:$0xff] %vm1498_vm14, %v3261_v13  ;;  %3668 = vmatmul.mubr.bf16.gmra.mrb[164].mxu0 %v8483_v19  ;;  %3793 = vmatmul.mubr.bf16.gmra.mrb[188].mxu1 %v3326_v54  ;;  %vm5398_vm14 = vcmask 1043459  }
 0x408   : > { %6415 = vmatprep.mubr.msk.bf16.mxu1 %vm1377_vm7, %v8155_v44  ;;  %6465 = vmatprep.mubr.msk.bf16.mxu0 %vm1377_vm7, %v8332_v9 }
 0x40b   : > { %v3927_v21 = vld [vmem:[#allocation3 + $0x130] sm:$0xff] }
 0x40f   : > { %3799 = vmatmul.mubr.bf16.gmra.mrb[192].mxu1 %v8310_v35  ;;  %4107 = vmatmul.mubr.bf16.vlgmr.msra.gmra.mrb[168].mxu0 %v8356_v28 }
 0x410   : > { %6416 = vmatprep.mubr.msk.bf16.mxu1 %vm1377_vm7, %v8313_v27  ;;  %6466 = vmatprep.mubr.msk.bf16.mxu0 %vm1377_vm7, %v8359_v52 }
 0x417   : > { %3807 = vmatmul.mubr.bf16.gmra.mrb[196].mxu1 %v8324_v14  ;;  %4115 = vmatmul.mubr.bf16.gmra.mrb[172].mxu0 %v8367_v34 }
 0x418   : > { %6417 = vmatprep.mubr.msk.bf16.mxu1 %vm1377_vm7, %v8332_v9  ;;  %6467 = vmatprep.mubr.msk.bf16.mxu0 %vm1377_vm7, %v8375_v42 }
 0x41f   : > { %3813 = vmatmul.mubr.bf16.gmra.mrb[200].mxu1 %v8356_v28  ;;  %4121 = vmatmul.mubr.bf16.gmra.mrb[176].mxu0 %v8387_v40 }
 0x420   : > { %6418 = vmatprep.mubr.msk.bf16.mxu1 %vm1377_vm7, %v8359_v52  ;;  %6468 = vmatprep.mubr.msk.bf16.mxu0 %vm1377_vm7, %v8390_v25 }
 0x427   : > { %3821 = vmatmul.mubr.bf16.gmra.mrb[204].mxu1 %v8367_v34  ;;  %4129 = vmatmul.mubr.bf16.gmra.mrb[180].mxu0 %v8398_v0  ;;  %v3925_v34 = vld [vmem:[#allocation3 + $0x120] sm:$0xff] }
 0x428   : > { %6419 = vmatprep.mubr.msk.bf16.mxu1 %vm1377_vm7, %v8375_v42  ;;  %6469 = vmatprep.mubr.msk.bf16.mxu0 %vm1377_vm7, %v8406_v38 }
 0x42f   : > { %3827 = vmatmul.mubr.bf16.gmra.mrb[208].mxu1 %v8387_v40  ;;  %4135 = vmatmul.mubr.bf16.gmra.mrb[184].mxu0 %v8414_v45 }
 0x430   : > { %6420 = vmatprep.mubr.msk.bf16.mxu1 %vm1377_vm7, %v8390_v25  ;;  %6470 = vmatprep.mubr.msk.bf16.mxu0 %vm1377_vm7, %v8417_v5 }
 0x437   : > { %3835 = vmatmul.mubr.bf16.gmra.mrb[212].mxu1 %v8398_v0  ;;  %4143 = vmatmul.mubr.bf16.gmra.mrb[188].mxu0 %v8421_v49 }
 0x438   : > { %6421 = vmatprep.mubr.msk.bf16.mxu1 %vm1377_vm7, %v8406_v38  ;;  %6471 = vmatprep.mubr.msk.bf16.mxu0 %vm1377_vm7, %v8425_v10 }
 0x43f   : > { %3841 = vmatmul.mubr.bf16.gmra.mrb[216].mxu1 %v8414_v45  ;;  %4149 = vmatmul.mubr.bf16.gmra.mrb[192].mxu0 %v8429_v24 }
 0x440   : > { %6422 = vmatprep.mubr.msk.bf16.mxu1 %vm1377_vm7, %v8417_v5  ;;  %6472 = vmatprep.mubr.msk.bf16.mxu0 %vm1377_vm7, %v8432_v48 }
 0x447   : > { %3849 = vmatmul.mubr.bf16.gmra.mrb[220].mxu1 %v8421_v49  ;;  %4157 = vmatmul.mubr.bf16.gmra.mrb[196].mxu0 %v8436_v11 }
 0x448   : > { %6423 = vmatprep.mubr.msk.bf16.mxu1 %vm1377_vm7, %v8425_v10  ;;  %6473 = vmatprep.mubr.msk.bf16.mxu0 %vm1377_vm7, %v8440_v46 }
 0x44f   : > { %3855 = vmatmul.mubr.bf16.gmra.mrb[224].mxu1 %v8429_v24  ;;  %4163 = vmatmul.mubr.bf16.gmra.mrb[200].mxu0 %v8444_v33 }
 0x450   : > { %6424 = vmatprep.mubr.msk.bf16.mxu1 %vm1377_vm7, %v8432_v48  ;;  %6474 = vmatprep.mubr.msk.bf16.mxu0 %vm1377_vm7, %v8447_v31 }
 0x452   : > { %v3786_v44 = vpop.f32.mrb[184].mxu1 }
 0x453   : > { %v3788_v35 = vpop.f32.mrb[185].mxu1 }
 0x454   : > { %v3789_v27 = vpop.f32.mrb[186].mxu1 }
 0x455   : > { %v3791_v56 = vpop.f32.mrb[187].mxu1 }
 0x457   : > { %3863 = vmatmul.mubr.bf16.gmra.mrb[228].mxu1 %v8436_v11  ;;  %4171 = vmatmul.mubr.bf16.gmra.mrb[204].mxu0 %v8451_v63 }
 0x458   : > { %6425 = vmatprep.mubr.msk.bf16.mxu1 %vm1377_vm7, %v8440_v46  ;;  %6475 = vmatprep.mubr.msk.bf16.mxu0 %vm1377_vm7, %v8455_v57 }
 0x45f   : > { %3869 = vmatmul.mubr.bf16.gmra.mrb[232].mxu1 %v8444_v33  ;;  %4177 = vmatmul.mubr.bf16.gmra.mrb[208].mxu0 %v8459_v58 }
 0x460   : > { %6426 = vmatprep.mubr.msk.bf16.mxu1 %vm1377_vm7, %v8447_v31  ;;  %6476 = vmatprep.mubr.msk.bf16.mxu0 %vm1377_vm7, %v8462_v17 }
 0x462   : > { %v3563_v29 = vpop.f32.mrb[104].mxu0 }
 0x463   : > { %v8557_v43 = vadd.f32 %v3786_v44, %v3563_v29  ;;  %v3565_v14 = vpop.f32.mrb[105].mxu0 }
 0x464   : > { %v3566_v47 = vpop.f32.mrb[106].mxu0 }
 0x465   : > { %v8559_v26 = vadd.f32 %v3789_v27, %v3566_v47  ;;  %v3568_v37 = vpop.f32.mrb[107].mxu0 }
 0x467   : > { %3877 = vmatmul.mubr.bf16.gmra.mrb[236].mxu1 %v8451_v63  ;;  %4185 = vmatmul.mubr.bf16.gmra.mrb[212].mxu0 %v8466_v32 }
 0x468   : > { %6427 = vmatprep.mubr.msk.bf16.mxu1 %vm1377_vm7, %v8455_v57  ;;  %6477 = vmatprep.mubr.msk.bf16.mxu0 %vm1377_vm7, %v8470_v23 }
 0x46a   : > { %v3571_v60 = vpop.f32.mrb[108].mxu0 }
 0x46b   : > { %v3572_v9 = vpop.f32.mrb[109].mxu0 }
 0x46c   : > { %v3573_v8 = vpop.f32.mrb[110].mxu0 }
 0x46d   : > { %v3574_v15 = vpop.f32.mrb[111].mxu0 }
 0x46f   : > { %3883 = vmatmul.mubr.bf16.gmra.mrb[240].mxu1 %v8459_v58  ;;  %4191 = vmatmul.mubr.bf16.gmra.mrb[216].mxu0 %v8475_v41 }
 0x470   : > { %6428 = vmatprep.mubr.msk.bf16.mxu1 %vm1377_vm7, %v8462_v17  ;;  %6478 = vmatprep.mubr.msk.bf16.mxu0 %vm1377_vm7, %v8479_v30 }
 0x472   : > { %v8573_v62 = vpop.f32.mrb[112].mxu0 }
 0x473   : > { %v3579_v1 = vpop.f32.mrb[113].mxu0 }
 0x474   : > { %v8575_v53 = vpop.f32.mrb[114].mxu0 }
 0x475   : > { %v3582_v12 = vpop.f32.mrb[115].mxu0 }
 0x477   : > { %3891 = vmatmul.mubr.bf16.gmra.mrb[244].mxu1 %v8466_v32  ;;  %4199 = vmatmul.mubr.bf16.gmra.mrb[220].mxu0 %v8483_v19 }
 0x478   : > { %6479 = vmatprep.mubr.msk.bf16.mxu0 %vm1377_vm7, %v3926_v6 }
 0x47a   : > { %v3585_v4 = vpop.f32.mrb[116].mxu0 }
 0x47b   : > { %v3586_v28 = vpop.f32.mrb[117].mxu0  ;;  %v6849_v4 = vmov 1983009808  }
 0x47c   : > { %v3587_v52 = vpop.f32.mrb[118].mxu0  ;;  %v4292_v28 = vunpack.c.l.s4 %v6849_v4 }
 0x47d   : > { %v3588_v50 = vpop.f32.mrb[119].mxu0  ;;  %v4294_v52 = vlaneseq }
 0x47f   : > { %4205 = vmatmul.mubr.bf16.gmra.mrb[224].mxu0 %v3925_v34 }
 0x480   : > { %6480 = vmatprep.mubr.msk.bf16.mxu0 %vm1377_vm7, %v3928_v2 }
 0x482   : > { %v8580_v61 = vpop.f32.mrb[120].mxu0 }
 0x483   : > { %v3593_v59 = vpop.f32.mrb[121].mxu0 }
 0x484   : > { %v8582_v42 = vpop.f32.mrb[122].mxu0  ;;  %v8609_v59 = vld [vmem:[%s10167_s6] ss:$0 sm:$0xff] }
 0x485   : > { %v3596_v55 = vpop.f32.mrb[123].mxu0  ;;  %10404 = vst [vmem:[#allocation13_spill] sm:$0xff] %v8609_v59 }
 0x487   : > { %4213 = vmatmul.mubr.bf16.gmra.mrb[228].mxu0 %v3927_v21 }
 0x48a   : > { %v3599_v40 = vpop.f32.mrb[124].mxu0 }
 0x48b   : > { %v3600_v25 = vpop.f32.mrb[125].mxu0  ;;  %v4293_v40 = vunpack.c.0.s8 %v4292_v28 }
 0x48c   : > { %v3601_v39 = vpop.f32.mrb[126].mxu0  ;;  %v4295_v25 = vshrl.u32 %v4294_v52, 7 }
 0x48d   : > { %v3602_v0 = vpop.f32.mrb[127].mxu0 }
 0x492   : > { %v8586_v38 = vpop.f32.mrb[128].mxu0 }
 0x493   : > { %v3607_v3 = vpop.f32.mrb[129].mxu0 }
 0x494   : > { %v8588_v45 = vpop.f32.mrb[130].mxu0 }
 0x495   : > { %v3610_v5 = vpop.f32.mrb[131].mxu0 }
 0x49a   : > { %v3613_v49 = vpop.f32.mrb[132].mxu0 }
 0x49b   : > { %v3614_v22 = vpop.f32.mrb[133].mxu0 }
 0x49c   : > { %v3615_v10 = vpop.f32.mrb[134].mxu0 }
 0x49d   : > { %v3616_v24 = vpop.f32.mrb[135].mxu0 }
 0x4a2   : > { %v8590_v48 = vpop.f32.mrb[136].mxu0 }
 0x4a3   : > { %v3621_v11 = vpop.f32.mrb[137].mxu0 }
 0x4a4   : > { %v8592_v18 = vpop.f32.mrb[138].mxu0  ;;  %v8616_v11 = vsub.s32 %v4293_v40, %v4295_v25 }
 0x4a5   : > { %v3624_v46 = vpop.f32.mrb[139].mxu0 }
 0x4a6   : > { %10405 = vst [vmem:[#allocation14_spill] sm:$0xff] %v8616_v11 }
 0x4aa   : > { %v3627_v33 = vpop.f32.mrb[140].mxu0 }
 0x4ab   : > { %v3628_v31 = vpop.f32.mrb[141].mxu0 }
 0x4ac   : > { %v3629_v63 = vpop.f32.mrb[142].mxu0 }
 0x4ad   : > { %v3630_v7 = vpop.f32.mrb[143].mxu0 }
 0x4b2   : > { %v8594_v57 = vpop.f32.mrb[144].mxu0 }
 0x4b3   : > { %10398 = vst [vmem:[#allocation7_spill] sm:$0xff] %v8594_v57  ;;  %v3635_v58 = vpop.f32.mrb[145].mxu0 }
 0x4b4   : > { %v8596_v17 = vpop.f32.mrb[146].mxu0 }
 0x4b5   : > { %10399 = vst [vmem:[#allocation8_spill] sm:$0xff] %v8596_v17  ;;  %v3638_v32 = vpop.f32.mrb[147].mxu0 }
 0x4ba   : > { %v3641_v20 = vpop.f32.mrb[148].mxu0 }
 0x4bb   : > { %v3642_v23 = vpop.f32.mrb[149].mxu0 }
 0x4bc   : > { %v3643_v36 = vpop.f32.mrb[150].mxu0 }
 0x4bd   : > { %v3644_v51 = vpop.f32.mrb[151].mxu0 }
 0x4c2   : > { %v8598_v41 = vpop.f32.mrb[152].mxu0 }
 0x4c3   : > { %10400 = vst [vmem:[#allocation9_spill] sm:$0xff] %v8598_v41  ;;  %v3649_v30 = vpop.f32.mrb[153].mxu0 }
 0x4c4   : > { %v8600_v19 = vpop.f32.mrb[154].mxu0 }
 0x4c5   : > { %10401 = vst [vmem:[#allocation10_spill] sm:$0xff] %v8600_v19  ;;  %v3652_v13 = vpop.f32.mrb[155].mxu0 }
 0x4ca   : > { %v3655_v54 = vpop.f32.mrb[156].mxu0 }
 0x4cb   : > { %v3656_v44 = vpop.f32.mrb[157].mxu0 }
 0x4cc   : > { %v3657_v35 = vpop.f32.mrb[158].mxu0 }
 0x4cd   : > { %v3658_v27 = vpop.f32.mrb[159].mxu0 }
 0x4d2   : > { %v8602_v56 = vpop.f32.mrb[160].mxu0 }
 0x4d3   : > { %10402 = vst [vmem:[#allocation11_spill] sm:$0xff] %v8602_v56  ;;  %v3663_v29 = vpop.f32.mrb[161].mxu0 }
 0x4d4   : > { %v8604_v14 = vpop.f32.mrb[162].mxu0 }
 0x4d5   : > { %10403 = vst [vmem:[#allocation12_spill] sm:$0xff] %v8604_v14  ;;  %v3666_v47 = vpop.f32.mrb[163].mxu0 }
 0x4d6   : > { %v8644_v47 = vsub.s32 0, %v4295_v25 }
 0x4da   : > { %v3669_v37 = vpop.f32.mrb[164].mxu0  ;;  %v3794_v60 = vpop.f32.mrb[188].mxu1 }
 0x4db   : > { %v3670_v9 = vpop.f32.mrb[165].mxu0  ;;  %v3795_v8 = vpop.f32.mrb[189].mxu1 }
 0x4dc   : > { %v3671_v15 = vpop.f32.mrb[166].mxu0  ;;  %v3796_v1 = vpop.f32.mrb[190].mxu1 }
 0x4dd   : > { %v3672_v12 = vpop.f32.mrb[167].mxu0  ;;  %v3797_v6 = vpop.f32.mrb[191].mxu1 }
 0x4e2   : > { %v3800_v50 = vpop.f32.mrb[192].mxu1  ;;  %v4108_v34 = vpop.f32.mrb[168].mxu0 }
 0x4e3   : > { %v3801_v55 = vadd.f32 %v3800_v50, %v8573_v62  ;;  %v4219_v16 = vadd.f32 %v4108_v34, %v8557_v43  ;;  %v3802_v39 = vpop.f32.mrb[193].mxu1  ;;  %v4110_v0 = vpop.f32.mrb[169].mxu0 }
 0x4e4   : > { %v3803_v2 = vpop.f32.mrb[194].mxu1  ;;  %v4111_v21 = vpop.f32.mrb[170].mxu0 }
 0x4e5   : > { %v4242_v3 = vadd.f32 %v8609_v59, %v4219_v16  ;;  %v3804_v5 = vadd.f32 %v3803_v2, %v8575_v53  ;;  %v4220_v49 = vadd.f32 %v4111_v21, %v8559_v26  ;;  %v3805_v22 = vpop.f32.mrb[195].mxu1  ;;  %v4113_v10 = vpop.f32.mrb[171].mxu0 }
 0x4e7   : > { %v4258_v24 = vmax.f32 %v4242_v3, 0.0  ;;  %v4243_v62 = vadd.f32 %v8609_v59, %v4220_v49 }
 0x4e9   : > { %v4290_v43 = vcombine.high %v4258_v24, %v4258_v24  ;;  %v4259_v46 = vmax.f32 %v4243_v62, 0.0  ;;  %v8620_v63 = vrot.slane %v4258_v24, %v8616_v11 }
 0x4ea   : > { %v3808_v33 = vpop.f32.mrb[196].mxu1  ;;  %v4116_v31 = vpop.f32.mrb[172].mxu0 }
 0x4eb   : > { %v3809_v7 = vpop.f32.mrb[197].mxu1  ;;  %v4117_v58 = vpop.f32.mrb[173].mxu0  ;;  %v8623_v53 = vrot.slane %v4290_v43, %v8616_v11  ;;  %v4307_v36 = vcombine.high %v4259_v46, %v4259_v46  ;;  %v8626_v51 = vrot.slane %v4259_v46, %v8616_v11  ;;  %v8630_v30 = vcombine.high %v8620_v63, %v8620_v63 }
 0x4ec   : > { %v3810_v26 = vpop.f32.mrb[198].mxu1  ;;  %v4118_v32 = vpop.f32.mrb[174].mxu0  ;;  %v4658_v54 = vrot.slane %v8620_v63, 7  ;;  %v4914_v4 = vsub.f32 0.0, %v8620_v63 }
 0x4ed   : > { %v3811_v20 = vpop.f32.mrb[199].mxu1  ;;  %v4119_v23 = vpop.f32.mrb[175].mxu0  ;;  %10406 = vst [vmem:[#allocation15_spill] sm:$0xff] %v8626_v51  ;;  %10407 = vst [vmem:[#allocation16_spill] sm:$0xff] %v8630_v30  ;;  %v8634_v13 = vcombine.high %v8623_v53, %v8623_v53  ;;  %v8638_v44 = vrot.slane %v4307_v36, %v8616_v11  ;;  %v8642_v35 = vcombine.high %v8626_v51, %v8626_v51  ;;  %v4660_v37 = vrot.slane %v8630_v30, 7 }
 0x4ee   : > { %v4662_v60 = vrot.slane %v8623_v53, 7  ;;  %v8651_v12 = vrot.slane %v4658_v54, 2  ;;  %v4666_v28 = vrot.slane %v8626_v51, 7  ;;  %v10169_v34 = vsub.f32 0.0, %v8630_v30 }
 0x4ef   : > { %10408 = vst [vmem:[#allocation17_spill] sm:$0xff] %v8634_v13  ;;  %10409 = vst [vmem:[#allocation18_spill] sm:$0xff] %v8638_v44  ;;  %v4664_v6 = vrot.slane %v8634_v13, 7  ;;  %v4916_v39 = vsub.f32 0.0, %v8623_v53  ;;  %v8664_v0 = vcombine.high %v8638_v44, %v8638_v44  ;;  %v4670_v2 = vrot.slane %v8638_v44, 7 }
 0x4f0   : > { %10410 = vst [vmem:[#allocation19_spill] sm:$0xff] %v8642_v35  ;;  %10411 = vst [vmem:[#allocation20_spill] sm:$0xff] %v8651_v12  ;;  %v4668_v21 = vrot.slane %v8642_v35, 7  ;;  %v8668_v3 = vrot.slane %v4660_v37, 2  ;;  %v8670_v49 = vrot.slane %v4662_v60, 2  ;;  %v10172_v10 = vsub.f32 0.0, %v8626_v51 }
 0x4f1   : > { %10412 = vst [vmem:[#allocation21_spill] sm:$0xff] %v8664_v0  ;;  %v8676_v24 = vrot.slane %v4664_v6, 2  ;;  %v10171_v62 = vsub.f32 0.0, %v8634_v13  ;;  %v8683_v7 = vrot.slane %v4670_v2, 2  ;;  %v4672_v20 = vrot.slane %v8664_v0, 7 }
 0x4f2   : > { %v3814_v27 = vpop.f32.mrb[200].mxu1  ;;  %v4122_v29 = vpop.f32.mrb[176].mxu0  ;;  %10413 = vst [vmem:[#allocation22_spill] sm:$0xff] %v8668_v3  ;;  %10414 = vst [vmem:[#allocation23_spill] sm:$0xff] %v8670_v49  ;;  %v8685_v32 = vrot.slane %v4668_v21, 2 }
 0x4f3   : > { %v8649_v9 = vadd.f32 %v3814_v27, %v8580_v61  ;;  %v4221_v8 = vadd.f32 %v4122_v29, %v3801_v55  ;;  %v3816_v15 = vpop.f32.mrb[201].mxu1  ;;  %v4124_v1 = vpop.f32.mrb[177].mxu0  ;;  %10416 = vst [vmem:[#allocation25_spill] sm:$0xff] %v8676_v24  ;;  %10417 = vst [vmem:[#allocation26_spill] sm:$0xff] %v8683_v7 }
 0x4f4   : > { %v3817_v52 = vpop.f32.mrb[202].mxu1  ;;  %v4125_v50 = vpop.f32.mrb[178].mxu0  ;;  %10418 = vst [vmem:[#allocation27_spill] sm:$0xff] %v8685_v32 }
 0x4f5   : > { %v4244_v16 = vadd.f32 %v8609_v59, %v4221_v8  ;;  %v8659_v61 = vadd.f32 %v3817_v52, %v8582_v42  ;;  %v4222_v55 = vadd.f32 %v4125_v50, %v3804_v5  ;;  %v3819_v40 = vpop.f32.mrb[203].mxu1  ;;  %v4127_v25 = vpop.f32.mrb[179].mxu0  ;;  %v8673_v5 = vrot.slane %v4666_v28, 2 }
 0x4f7   : > { %v4260_v22 = vmax.f32 %v4244_v16, 0.0  ;;  %v4245_v42 = vadd.f32 %v8609_v59, %v4222_v55  ;;  %10415 = vst [vmem:[#allocation24_spill] sm:$0xff] %v8673_v5 }
 0x4f9   : > { %v4324_v43 = vcombine.high %v4260_v22, %v4260_v22  ;;  %v8680_v46 = vrot.slane %v4260_v22, %v8616_v11  ;;  %v4261_v33 = vmax.f32 %v4245_v42, 0.0 }
 0x4fa   : > { %v3822_v58 = vpop.f32.mrb[204].mxu1  ;;  %v4130_v26 = vpop.f32.mrb[180].mxu0 }
 0x4fb   : > { %v8690_v36 = vrot.slane %v4324_v43, %v8616_v11  ;;  %v8694_v54 = vcombine.high %v8680_v46, %v8680_v46  ;;  %v4626_v27 = vadd.f32 %v8680_v46, %v8620_v63  ;;  %v4786_v29 = vrot.slane %v8680_v46, 7  ;;  %v3823_v37 = vpop.f32.mrb[205].mxu1  ;;  %v4131_v60 = vpop.f32.mrb[181].mxu0 }
 0x4fc   : > { %v4946_v8 = vsub.f32 %v4914_v4, %v8680_v46  ;;  %v8701_v15 = vadd.f32 %v4914_v4, %v8680_v46  ;;  %v4341_v6 = vcombine.high %v4261_v33, %v4261_v33  ;;  %v3824_v28 = vpop.f32.mrb[206].mxu1  ;;  %v4132_v52 = vpop.f32.mrb[182].mxu0  ;;  %v8724_v42 = vrot.slane %v4261_v33, %v8616_v11 }
 0x4fd   : > { %10419 = vst [vmem:[#allocation28_spill] sm:$0xff] %v8694_v54  ;;  %v8707_v50 = vcombine.high %v8690_v36, %v8690_v36  ;;  %v8711_v16 = vadd.f32 %v8690_v36, %v8623_v53  ;;  %v8714_v55 = vadd.f32 %v8651_v12, %v4626_v27  ;;  %v3825_v40 = vpop.f32.mrb[207].mxu1  ;;  %v4133_v4 = vpop.f32.mrb[183].mxu0  ;;  %v4790_v2 = vrot.slane %v8690_v36, 7 }
 0x4fe   : > { %10420 = vst [vmem:[#allocation29_spill] sm:$0xff] %v8701_v15  ;;  %v8719_v21 = vadd.f32 %v4916_v39, %v8690_v36  ;;  %10425 = vst [vmem:[#allocation34_spill] sm:$0xff] %v8724_v42  ;;  %v8727_v43 = vrot.slane %v4341_v6, %v8616_v11  ;;  %v8729_v58 = vrot.slane %v4672_v20, 2  ;;  %v4788_v26 = vrot.slane %v8694_v54, 7 }
 0x4ff   : > { %10421 = vst [vmem:[#allocation30_spill] sm:$0xff] %v8707_v50  ;;  %10422 = vst [vmem:[#allocation31_spill] sm:$0xff] %v8711_v16  ;;  %v4792_v27 = vrot.slane %v8707_v50, 7  ;;  %v8733_v37 = vrot.slane %v4786_v29, 2  ;;  %v8737_v60 = vcombine.high %v8724_v42, %v8724_v42  ;;  %v4794_v28 = vrot.slane %v8724_v42, 7 }
 0x500   : > { %10423 = vst [vmem:[#allocation32_spill] sm:$0xff] %v8714_v55  ;;  %10424 = vst [vmem:[#allocation33_spill] sm:$0xff] %v8719_v21  ;;  %v4948_v33 = vsub.f32 %v4916_v39, %v8690_v36  ;;  %v8741_v52 = vrot.slane %v4790_v2, 2  ;;  %v8745_v20 = vcombine.high %v8727_v43, %v8727_v43  ;;  %v8747_v6 = vrot.slane %v4788_v26, 2 }
 0x501   : > { %10426 = vst [vmem:[#allocation35_spill] sm:$0xff] %v8727_v43  ;;  %10427 = vst [vmem:[#allocation36_spill] sm:$0xff] %v8729_v58  ;;  %v4947_v29 = vsub.f32 %v10169_v34, %v8694_v54  ;;  %v8752_v22 = vrot.slane %v4792_v27, 2  ;;  %v4796_v1 = vrot.slane %v8737_v60, 7  ;;  %v4798_v39 = vrot.slane %v8727_v43, 7 }
 0x502   : > { %10428 = vst [vmem:[#allocation37_spill] sm:$0xff] %v8733_v37  ;;  %10429 = vst [vmem:[#allocation38_spill] sm:$0xff] %v8737_v60  ;;  %v3828_v40 = vpop.f32.mrb[208].mxu1  ;;  %v4136_v4 = vpop.f32.mrb[184].mxu0  ;;  %v4949_v2 = vsub.f32 %v10171_v62, %v8707_v50  ;;  %v8763_v34 = vrot.slane %v4794_v28, 2  ;;  %v4950_v27 = vsub.f32 %v10172_v10, %v8724_v42  ;;  %v4800_v55 = vrot.slane %v8745_v20, 7 }
 0x503   : > { %10430 = vst [vmem:[#allocation39_spill] sm:$0xff] %v8741_v52  ;;  %10431 = vst [vmem:[#allocation40_spill] sm:$0xff] %v8745_v20  ;;  %v8760_v25 = vadd.f32 %v3828_v40, %v8586_v38  ;;  %v4223_v26 = vadd.f32 %v4136_v4, %v8649_v9  ;;  %v3830_v23 = vpop.f32.mrb[209].mxu1  ;;  %v4138_v31 = vpop.f32.mrb[185].mxu0  ;;  %v10435_v62 = vsub.f32 0.0, %v8642_v35  ;;  %v10436_v38 = vsub.f32 0.0, %v8638_v44 }
 0x504   : > { %10432 = vst [vmem:[#allocation41_spill] sm:$0xff] %v8747_v6  ;;  %10433 = vst [vmem:[#allocation42_spill] sm:$0xff] %v8752_v22  ;;  %v3831_v15 = vpop.f32.mrb[210].mxu1  ;;  %v4139_v21 = vpop.f32.mrb[186].mxu0  ;;  %v10437_v31 = vsub.f32 0.0, %v8664_v0  ;;  %v8783_v56 = vrot.slane %v4796_v1, 2  ;;  %v4979_v19 = vadd.f32 %v4947_v29, %v8668_v3  ;;  %v4981_v41 = vadd.f32 %v4949_v2, %v8676_v24 }
 0x505   : > { %10434 = vst [vmem:[#allocation43_spill] sm:$0xff] %v8763_v34  ;;  %v4951_v16 = vsub.f32 %v10435_v62, %v8737_v60  ;;  %v4952_v9 = vsub.f32 %v10436_v38, %v8727_v43  ;;  %v4246_v28 = vadd.f32 %v8609_v59, %v4223_v26  ;;  %v8780_v40 = vadd.f32 %v3831_v15, %v8588_v45  ;;  %v3833_v10 = vpop.f32.mrb[211].mxu1  ;;  %v4141_v14 = vpop.f32.mrb[187].mxu0 }
 0x506   : > { %v4953_v23 = vsub.f32 %v10437_v31, %v8745_v20  ;;  %v4224_v4 = vadd.f32 %v4139_v21, %v8659_v61  ;;  %10438 = vst [vmem:[#allocation44_spill] sm:$0xff] %v8783_v56  ;;  %v4978_v62 = vadd.f32 %v4946_v8, %v8651_v12  ;;  %v4980_v38 = vadd.f32 %v4948_v33, %v8670_v49 }
 0x507   : > { %v4262_v31 = vmax.f32 %v4246_v28, 0.0  ;;  %v4982_v45 = vadd.f32 %v4950_v27, %v8673_v5  ;;  %v4983_v15 = vadd.f32 %v4951_v16, %v8685_v32  ;;  %v8792_v61 = vrot.slane %v4798_v39, 2 }
 0x508   : > { %v4247_v26 = vadd.f32 %v8609_v59, %v4224_v4  ;;  %v8794_v14 = vrot.slane %v4800_v55, 2  ;;  %v4984_v10 = vadd.f32 %v4952_v9, %v8683_v7  ;;  %v4985_v8 = vadd.f32 %v4953_v23, %v8729_v58 }
 0x509   : > { %10439 = vst [vmem:[#allocation45_spill] sm:$0xff] %v8792_v61  ;;  %v4358_v1 = vcombine.high %v4262_v31, %v4262_v31  ;;  %v8799_v21 = vrot.slane %v4262_v31, %v8616_v11  ;;  %v5010_v29 = vadd.f32 %v4978_v62, %v8733_v37  ;;  %v5011_v16 = vadd.f32 %v4979_v19, %v8747_v6 }
 0x50a   : > { %10440 = vst [vmem:[#allocation46_spill] sm:$0xff] %v8794_v14  ;;  %v4263_v33 = vmax.f32 %v4247_v26, 0.0  ;;  %v3836_v2 = vpop.f32.mrb[212].mxu1  ;;  %v4144_v27 = vpop.f32.mrb[188].mxu0  ;;  %v5012_v55 = vadd.f32 %v4980_v38, %v8741_v52  ;;  %v5013_v39 = vadd.f32 %v4981_v41, %v8752_v22  ;;  %v8806_v9 = vadd.f32 %v4982_v45, %v8763_v34 }
 0x50b   : > { %10441 = vst [vmem:[#allocation47_spill] sm:$0xff] %v8799_v21  ;;  %v8809_v23 = vrot.slane %v4358_v1, %v8616_v11  ;;  %v8813_v28 = vcombine.high %v8799_v21, %v8799_v21  ;;  %v4674_v4 = vrot.slane %v8799_v21, 7  ;;  %v3837_v62 = vpop.f32.mrb[213].mxu1  ;;  %v4145_v31 = vpop.f32.mrb[189].mxu0  ;;  %v8817_v19 = vadd.f32 %v4983_v15, %v8783_v56 }
 0x50c   : > { %v4375_v38 = vcombine.high %v4263_v33, %v4263_v33  ;;  %v8821_v26 = vrot.slane %v4263_v33, %v8616_v11  ;;  %v3838_v45 = vpop.f32.mrb[214].mxu1  ;;  %v4146_v1 = vpop.f32.mrb[190].mxu0  ;;  %v5016_v2 = vadd.f32 %v4984_v10, %v8792_v61  ;;  %v5017_v31 = vadd.f32 %v4985_v8, %v8794_v14 }
 0x50d   : > { %10442 = vst [vmem:[#allocation48_spill] sm:$0xff] %v8809_v23  ;;  %10443 = vst [vmem:[#allocation49_spill] sm:$0xff] %v8813_v28  ;;  %v8826_v27 = vcombine.high %v8809_v23, %v8809_v23  ;;  %v4676_v62 = vrot.slane %v8813_v28, 7  ;;  %v4678_v15 = vrot.slane %v8809_v23, 7  ;;  %v3839_v41 = vpop.f32.mrb[215].mxu1  ;;  %v4147_v17 = vpop.f32.mrb[191].mxu0  ;;  %v5468_v1 = vrot.slane %v5010_v29, %v8644_v47 }
 0x50e   : > { %10444 = vst [vmem:[#allocation50_spill] sm:$0xff] %v8821_v26  ;;  %v8831_v33 = vrot.slane %v4674_v4, 2  ;;  %v8835_v10 = vrot.slane %v4375_v38, %v8616_v11  ;;  %v8845_v8 = vcombine.high %v8821_v26, %v8821_v26  ;;  %v4682_v41 = vrot.slane %v8821_v26, 7 }
 0x50f   : > { %10445 = vst [vmem:[#allocation51_spill] sm:$0xff] %v8826_v27  ;;  %v8838_v21 = vrot.slane %v4676_v62, 2  ;;  %v8840_v57 = vrot.slane %v4678_v15, 2  ;;  %v5472_v29 = vrot.slane %v5011_v16, %v8644_v47  ;;  %v5476_v15 = vrot.slane %v5012_v55, %v8644_v47 }
 0x510   : > { %10446 = vst [vmem:[#allocation52_spill] sm:$0xff] %v8831_v33  ;;  %10447 = vst [vmem:[#allocation53_spill] sm:$0xff] %v8835_v10  ;;  %v8850_v4 = vcombine.high %v8835_v10, %v8835_v10  ;;  %v4686_v38 = vrot.slane %v8835_v10, 7  ;;  %v5480_v45 = vrot.slane %v5013_v39, %v8644_v47  ;;  %v5484_v59 = vrot.slane %v8806_v9, %v8644_v47 }
 0x511   : > { %10448 = vst [vmem:[#allocation54_spill] sm:$0xff] %v8838_v21  ;;  %10449 = vst [vmem:[#allocation55_spill] sm:$0xff] %v8840_v57  ;;  %v5488_v17 = vrot.slane %v8817_v19, %v8644_v47  ;;  %v5492_v57 = vrot.slane %v5016_v2, %v8644_v47  ;;  %v5496_v21 = vrot.slane %v5017_v31, %v8644_v47 }
 0x512   : > { %10450 = vst [vmem:[#allocation56_spill] sm:$0xff] %v8845_v8  ;;  %10451 = vst [vmem:[#allocation57_spill] sm:$0xff] %v8850_v4  ;;  %v3842_v28 = vpop.f32.mrb[216].mxu1  ;;  %v4150_v16 = vpop.f32.mrb[192].mxu0  ;;  %v5593_v33 = vsel %vm5394_vm4, %v5472_v29, %v5468_v1  ;;  %v5139_v62 = vsub.f32 %v8630_v30, %v8694_v54  ;;  %v5140_v55 = vsub.f32 %v8623_v53, %v8690_v36 }
 0x513   : > { %v5141_v39 = vsub.f32 %v8634_v13, %v8707_v50  ;;  %v3844_v9 = vpop.f32.mrb[217].mxu1  ;;  %v4152_v26 = vpop.f32.mrb[193].mxu0  ;;  %v5594_v19 = vsel %vm5396_vm9, %v5476_v15, %v5593_v33  ;;  %v5142_v2 = vsub.f32 %v8626_v51, %v8724_v42  ;;  %v5143_v31 = vsub.f32 %v8642_v35, %v8737_v60 }
 0x514   : > { %v5144_v1 = vsub.f32 %v8638_v44, %v8727_v43  ;;  %v3845_v29 = vpop.f32.mrb[218].mxu1  ;;  %v4153_v23 = vpop.f32.mrb[194].mxu0  ;;  %v5595_v53 = vsel %vm5398_vm14, %v5480_v45, %v5594_v19  ;;  %v5145_v36 = vsub.f32 %v8664_v0, %v8745_v20  ;;  %v10452_v26 = vsub.f32 %v8620_v63, %v8680_v46 }
 0x515   : > { %v5171_v15 = vsub.f32 %v5139_v62, %v8668_v3  ;;  %v3847_v9 = vpop.f32.mrb[219].mxu1  ;;  %v4155_v50 = vpop.f32.mrb[195].mxu0  ;;  %v5596_v13 = vsel %vm5400_vm1, %v5484_v59, %v5595_v53  ;;  %v5172_v43 = vsub.f32 %v5140_v55, %v8670_v49  ;;  %v5173_v44 = vsub.f32 %v5141_v39, %v8676_v24 }
 0x516   : > { %v5170_v33 = vsub.f32 %v10452_v26, %v8651_v12  ;;  %v5174_v45 = vsub.f32 %v5142_v2, %v8673_v5  ;;  %v5597_v19 = vsel %vm5402_vm15, %v5488_v17, %v5596_v13  ;;  %v5175_v20 = vsub.f32 %v5143_v31, %v8685_v32 }
 0x517   : > { %v5176_v0 = vsub.f32 %v5144_v1, %v8683_v7  ;;  %v5177_v63 = vsub.f32 %v5145_v36, %v8729_v58  ;;  %v5598_v46 = vsel %vm5404_vm0, %v5492_v57, %v5597_v19  ;;  %v5203_v59 = vadd.f32 %v5171_v15, %v8747_v6 }
 0x518   : > { %v5202_v50 = vadd.f32 %v5170_v33, %v8733_v37  ;;  %v5204_v62 = vadd.f32 %v5172_v43, %v8741_v52  ;;  %v5599_v55 = vsel %vm5406_vm2, %v5496_v21, %v5598_v46  ;;  %v5205_v39 = vadd.f32 %v5173_v44, %v8752_v22 }
 0x519   : > { %v5206_v13 = vadd.f32 %v5174_v45, %v8763_v34  ;;  %v5207_v17 = vadd.f32 %v5175_v20, %v8783_v56  ;;  %v8902_v2 = vrot.slane %v4682_v41, 2  ;;  %5621 = vrot.lane.b32.xlu0 %v5599_v55, %s6847_s20  ;;  %v5208_v57 = vadd.f32 %v5176_v0, %v8792_v61 }
 0x51a   : > { %v5860_v31 = vrot.slane %v5202_v50, %v8644_v47  ;;  %v5864_v1 = vrot.slane %v5203_v59, %v8644_v47  ;;  %v3850_v53 = vpop.f32.mrb[220].mxu1  ;;  %v4158_v43 = vpop.f32.mrb[196].mxu0  ;;  %v8908_v36 = vrot.slane %v4686_v38, 2  ;;  %v5209_v44 = vadd.f32 %v5177_v63, %v8794_v14 }
 0x51b   : > { %10453 = vst [vmem:[#allocation58_spill] sm:$0xff] %v8902_v2  ;;  %v5868_v21 = vrot.slane %v5204_v62, %v8644_v47  ;;  %v5872_v20 = vrot.slane %v5205_v39, %v8644_v47  ;;  %v3851_v41 = vpop.f32.mrb[221].mxu1  ;;  %v4159_v26 = vpop.f32.mrb[197].mxu0  ;;  %v5876_v33 = vrot.slane %v5206_v13, %v8644_v47  ;;  %v5880_v0 = vrot.slane %v5207_v17, %v8644_v47 }
 0x51c   : > { %10454 = vst [vmem:[#allocation59_spill] sm:$0xff] %v8908_v36  ;;  %v5985_v15 = vsel %vm5394_vm4, %v5864_v1, %v5860_v31  ;;  %v3843_v9 = vadd.f32 %v3842_v28, %v8590_v48  ;;  %v3852_v45 = vpop.f32.mrb[222].mxu1  ;;  %v4160_v19 = vpop.f32.mrb[198].mxu0  ;;  %v4225_v63 = vadd.f32 %v4150_v16, %v8760_v25  ;;  %v3846_v46 = vadd.f32 %v3845_v29, %v8592_v18  ;;  %v10455_v31 = vld [vmem:[#allocation13_spill] sm:$0xff] }
 0x51d   : > { %v5986_v38 = vsel %vm5396_vm9, %v5868_v21, %v5985_v15  ;;  %v4226_v50 = vadd.f32 %v4153_v23, %v8780_v40  ;;  %v3853_v59 = vpop.f32.mrb[223].mxu1  ;;  %v4161_v62 = vpop.f32.mrb[199].mxu0  ;;  %v5884_v55 = vrot.slane %v5208_v57, %v8644_v47  ;;  %v4684_v13 = vrot.slane %v8845_v8, 7  ;;  %v10479_v57 = vld [vmem:[#allocation8_spill] sm:$0xff] }
 0x51e   : > { %v5987_v39 = vsel %vm5398_vm14, %v5872_v20, %v5986_v38  ;;  %v4688_v48 = vrot.slane %v8850_v4, 7  ;;  %v5888_v28 = vrot.slane %v5209_v44, %v8644_v47  ;;  %v4248_v25 = vadd.f32 %v10455_v31, %v4225_v63  ;;  %v10462_v62 = vld [vmem:[#allocation7_spill] sm:$0xff] }
 0x51f   : > { %v5988_v17 = vsel %vm5400_vm1, %v5876_v33, %v5987_v39  ;;  %v4249_v18 = vadd.f32 %v10455_v31, %v4226_v50  ;;  %v10456_v23 = vrot.slane %v8826_v27, 7  ;;  %v8934_v29 = vrot.slane %v4684_v13, 2 }
 0x520   : > { %v5989_v40 = vsel %vm5402_vm15, %v5880_v0, %v5988_v17  ;;  %v4264_v53 = vmax.f32 %v4248_v25, 0.0  ;;  %v8938_v44 = vrot.slane %v4688_v48, 2  ;;  %v8950_v50 = vadd.f32 %v8694_v54, %v8630_v30 }
 0x521   : > { %v8932_v16 = vrot.slane %v10456_v23, 2  ;;  %10458 = vst [vmem:[#allocation60_spill] sm:$0xff] %v8934_v29  ;;  %v5990_v1 = vsel %vm5404_vm0, %v5884_v55, %v5989_v40  ;;  %v4265_v43 = vmax.f32 %v4249_v18, 0.0  ;;  %v10465_v18 = vld [vmem:[#allocation47_spill] sm:$0xff] }
 0x522   : > { %10459 = vst [vmem:[#allocation61_spill] sm:$0xff] %v8938_v44  ;;  %v5991_v21 = vsel %vm5406_vm2, %v5888_v28, %v5990_v1  ;;  %v3856_v20 = vpop.f32.mrb[224].mxu1  ;;  %v4164_v41 = vpop.f32.mrb[200].mxu0  ;;  %v4392_v15 = vcombine.high %v4264_v53, %v4264_v53  ;;  %v8946_v45 = vrot.slane %v4264_v53, %v8616_v11  ;;  %10460 = vst [vmem:[#allocation62_spill] sm:$0xff] %v8950_v50  ;;  %v10467_v53 = vsub.f32 0.0, %v10465_v18 }
 0x523   : > { %10457 = vst [vmem:[#allocation13_spill] sm:$0xff] %v8932_v16  ;;  %6013 = vrot.lane.b32.xlu0 %v5991_v21, %s6847_s20  ;;  %v4409_v19 = vcombine.high %v4265_v43, %v4265_v43  ;;  %v3858_v38 = vpop.f32.mrb[225].mxu1  ;;  %v4166_v63 = vpop.f32.mrb[201].mxu0  ;;  %v8953_v59 = vrot.slane %v4265_v43, %v8616_v11  ;;  %v8956_v55 = vadd.f32 %v3856_v20, %v10462_v62 }
 0x524   : > { %v4227_v39 = vadd.f32 %v4164_v41, %v3843_v9  ;;  %v3859_v13 = vpop.f32.mrb[226].mxu1  ;;  %v4167_v48 = vpop.f32.mrb[202].mxu0  ;;  %v8960_v28 = vadd.f32 %v8724_v42, %v8626_v51  ;;  %v8963_v17 = vrot.slane %v4392_v15, %v8616_v11  ;;  %v8967_v25 = vcombine.high %v8946_v45, %v8946_v45  ;;  %v10472_v63 = vld [vmem:[#allocation48_spill] sm:$0xff] }
 0x525   : > { %10461 = vst [vmem:[#allocation63_spill] sm:$0xff] %v8953_v59  ;;  %v4634_v40 = vadd.f32 %v8946_v45, %v10465_v18  ;;  %v3861_v23 = vpop.f32.mrb[227].mxu1  ;;  %v4169_v1 = vpop.f32.mrb[203].mxu0  ;;  %v8973_v9 = vadd.f32 %v8737_v60, %v8642_v35  ;;  %v8978_v43 = vsub.f32 %v10467_v53, %v8946_v45  ;;  %v10468_v21 = vmov %v10467_v53  ;;  %v10482_v35 = vld [vmem:[#allocation35_spill] sm:$0xff] }
 0x526   : > { %10463 = vst [vmem:[#allocation7_spill] sm:$0xff] %v8960_v28  ;;  %10464 = vst [vmem:[#allocation64_spill] sm:$0xff] %v8967_v25  ;;  %v8983_v20 = vadd.f32 %v10468_v21, %v8946_v45  ;;  %v8988_v15 = vrot.slane %v4409_v19, %v8616_v11  ;;  %v8992_v38 = vcombine.high %v8963_v17, %v8963_v17  ;;  %v10474_v23 = vld [vmem:[#allocation52_spill] sm:$0xff]  ;;  %v4802_v53 = vrot.slane %v8946_v45, 7 }
 0x527   : > { %10466 = vst [vmem:[#allocation47_spill] sm:$0xff] %v8973_v9  ;;  %v8996_v62 = vadd.f32 %v8963_v17, %v10472_v63  ;;  %v8999_v1 = vadd.f32 %v10474_v23, %v4634_v40  ;;  %v4806_v21 = vrot.slane %v8963_v17, 7  ;;  %v10476_v41 = vsub.f32 0.0, %v10472_v63 }
 0x528   : > { %10469 = vst [vmem:[#allocation65_spill] sm:$0xff] %v8983_v20  ;;  %10470 = vst [vmem:[#allocation66_spill] sm:$0xff] %v8988_v15  ;;  %v9012_v33 = vcombine.high %v8953_v59, %v8953_v59  ;;  %v4810_v26 = vrot.slane %v8953_v59, 7  ;;  %v4250_v40 = vadd.f32 %v10455_v31, %v4227_v39  ;;  %v4804_v0 = vrot.slane %v8967_v25, 7 }
 0x529   : > { %10471 = vst [vmem:[#allocation67_spill] sm:$0xff] %v8992_v38  ;;  %10473 = vst [vmem:[#allocation48_spill] sm:$0xff] %v8996_v62  ;;  %v9006_v19 = vadd.f32 %v10476_v41, %v8963_v17  ;;  %v4228_v62 = vadd.f32 %v4167_v48, %v3846_v46  ;;  %v9021_v41 = vcombine.high %v8988_v15, %v8988_v15  ;;  %v4808_v20 = vrot.slane %v8992_v38, 7 }
 0x52a   : > { %10475 = vst [vmem:[#allocation68_spill] sm:$0xff] %v8999_v1  ;;  %10478 = vst [vmem:[#allocation70_spill] sm:$0xff] %v9012_v33  ;;  %v9017_v1 = vadd.f32 %v3859_v13, %v10479_v57  ;;  %v3864_v12 = vpop.f32.mrb[228].mxu1  ;;  %v4172_v22 = vpop.f32.mrb[204].mxu0  ;;  %v9029_v51 = vrot.slane %v4802_v53, 2  ;;  %v4266_v39 = vmax.f32 %v4250_v40, 0.0  ;;  %v4986_v5 = vadd.f32 %v8978_v43, %v10474_v23 }
 0x52b   : > { %10477 = vst [vmem:[#allocation69_spill] sm:$0xff] %v9006_v19  ;;  %10480 = vst [vmem:[#allocation8_spill] sm:$0xff] %v9021_v41  ;;  %v10481_v19 = vld [vmem:[#allocation18_spill] sm:$0xff]  ;;  %v4251_v57 = vadd.f32 %v10455_v31, %v4228_v62  ;;  %v3865_v46 = vpop.f32.mrb[229].mxu1  ;;  %v4173_v12 = vpop.f32.mrb[205].mxu0  ;;  %v4812_v22 = vrot.slane %v9012_v33, 7 }
 0x52c   : > { %v9027_v60 = vadd.f32 %v10482_v35, %v10481_v19  ;;  %10484 = vst [vmem:[#allocation72_spill] sm:$0xff] %v9029_v51  ;;  %v9033_v13 = vrot.slane %v4806_v21, 2  ;;  %v3866_v48 = vpop.f32.mrb[230].mxu1  ;;  %v4174_v42 = vpop.f32.mrb[206].mxu0  ;;  %v9035_v24 = vrot.slane %v4810_v26, 2  ;;  %v4814_v30 = vrot.slane %v8988_v15, 7 }
 0x52d   : > { %v4816_v19 = vrot.slane %v9021_v41, 7  ;;  %v4426_v35 = vcombine.high %v4266_v39, %v4266_v39  ;;  %v9040_v53 = vrot.slane %v4266_v39, %v8616_v11  ;;  %v4267_v40 = vmax.f32 %v4251_v57, 0.0  ;;  %v3867_v46 = vpop.f32.mrb[231].mxu1  ;;  %v4175_v12 = vpop.f32.mrb[207].mxu0 }
 0x52e   : > { %10483 = vst [vmem:[#allocation71_spill] sm:$0xff] %v9027_v60  ;;  %10485 = vst [vmem:[#allocation73_spill] sm:$0xff] %v9033_v13  ;;  %v9042_v62 = vrot.slane %v4804_v0, 2  ;;  %v9044_v54 = vrot.slane %v4808_v20, 2  ;;  %v9046_v21 = vrot.slane %v4812_v22, 2  ;;  %v9048_v42 = vrot.slane %v4814_v30, 2 }
 0x52f   : > { %10486 = vst [vmem:[#allocation74_spill] sm:$0xff] %v9035_v24  ;;  %10487 = vst [vmem:[#allocation75_spill] sm:$0xff] %v9040_v53  ;;  %v10492_v26 = vsub.f32 0.0, %v10472_v63  ;;  %v9054_v14 = vrot.slane %v4426_v35, %v8616_v11  ;;  %v9058_v39 = vcombine.high %v9040_v53, %v9040_v53  ;;  %v4690_v0 = vrot.slane %v9040_v53, 7  ;;  %v10497_v46 = vld [vmem:[#allocation49_spill] sm:$0xff] }
 0x530   : > { %10488 = vst [vmem:[#allocation76_spill] sm:$0xff] %v9042_v62  ;;  %10489 = vst [vmem:[#allocation77_spill] sm:$0xff] %v9044_v54  ;;  %v9061_v57 = vrot.slane %v4816_v19, 2  ;;  %v4443_v22 = vcombine.high %v4267_v40, %v4267_v40  ;;  %v9065_v30 = vrot.slane %v4267_v40, %v8616_v11  ;;  %v10498_v12 = vsub.f32 0.0, %v10497_v46 }
 0x531   : > { %10490 = vst [vmem:[#allocation78_spill] sm:$0xff] %v9046_v21  ;;  %10491 = vst [vmem:[#allocation79_spill] sm:$0xff] %v9048_v42  ;;  %v4956_v48 = vsub.f32 %v10492_v26, %v8963_v17  ;;  %v9072_v35 = vcombine.high %v9054_v14, %v9054_v14  ;;  %v4692_v61 = vrot.slane %v9058_v39, 7  ;;  %v4694_v56 = vrot.slane %v9054_v14, 7 }
 0x532   : > { %10493 = vst [vmem:[#allocation80_spill] sm:$0xff] %v9054_v14  ;;  %10494 = vst [vmem:[#allocation81_spill] sm:$0xff] %v9058_v39  ;;  %v4955_v26 = vsub.f32 %v10498_v12, %v8967_v25  ;;  %v10500_v19 = vsub.f32 0.0, %v8826_v27  ;;  %v9079_v34 = vrot.slane %v4690_v0, 2  ;;  %v9083_v52 = vrot.slane %v4443_v22, %v8616_v11  ;;  %v10503_v12 = vld [vmem:[#allocation50_spill] sm:$0xff]  ;;  %v9088_v37 = vpop.f32.mrb[232].mxu1 }
 0x533   : > { %10495 = vst [vmem:[#allocation82_spill] sm:$0xff] %v9061_v57  ;;  %10496 = vst [vmem:[#allocation83_spill] sm:$0xff] %v9065_v30  ;;  %v10504_v6 = vsub.f32 0.0, %v10503_v12  ;;  %v9090_v7 = vpop.f32.mrb[208].mxu0  ;;  %v9092_v60 = vrot.slane %v4692_v61, 2  ;;  %v9094_v32 = vrot.slane %v4694_v56, 2  ;;  %v5018_v43 = vadd.f32 %v4986_v5, %v9029_v51 }
 0x534   : > { %10499 = vst [vmem:[#allocation84_spill] sm:$0xff] %v9072_v35  ;;  %v4957_v20 = vsub.f32 %v10500_v19, %v8992_v38  ;;  %10501 = vst [vmem:[#allocation85_spill] sm:$0xff] %v9079_v34  ;;  %v9099_v19 = vcombine.high %v9065_v30, %v9065_v30  ;;  %v3872_v22 = vpop.f32.mrb[233].mxu1  ;;  %v4180_v40 = vpop.f32.mrb[209].mxu0  ;;  %v10509_v56 = vsub.f32 0.0, %v8845_v8  ;;  %v10511_v9 = vsub.f32 0.0, %v8850_v4 }
 0x535   : > { %10502 = vst [vmem:[#allocation86_spill] sm:$0xff] %v9083_v52  ;;  %v4958_v58 = vsub.f32 %v10504_v6, %v8953_v59  ;;  %10505 = vst [vmem:[#allocation87_spill] sm:$0xff] %v9092_v60  ;;  %v9104_v6 = vcombine.high %v9083_v52, %v9083_v52  ;;  %v9110_v28 = vpop.f32.mrb[234].mxu1  ;;  %v9112_v0 = vpop.f32.mrb[210].mxu0  ;;  %v10510_v40 = vsub.f32 0.0, %v8835_v10  ;;  %v10512_v60 = vld [vmem:[#allocation54_spill] sm:$0xff] }
 0x536   : > { %10506 = vst [vmem:[#allocation88_spill] sm:$0xff] %v9094_v32  ;;  %10507 = vst [vmem:[#allocation89_spill] sm:$0xff] %v9099_v19  ;;  %v4959_v61 = vsub.f32 %v10509_v56, %v9012_v33  ;;  %v4961_v3 = vsub.f32 %v10511_v9, %v9021_v41  ;;  %v3875_v50 = vpop.f32.mrb[235].mxu1  ;;  %v4183_v32 = vpop.f32.mrb[211].mxu0  ;;  %v4987_v39 = vadd.f32 %v4955_v26, %v10512_v60  ;;  %v10513_v34 = vld [vmem:[#allocation55_spill] sm:$0xff] }
 0x537   : > { %10508 = vst [vmem:[#allocation90_spill] sm:$0xff] %v9104_v6  ;;  %v4960_v22 = vsub.f32 %v10510_v40, %v8988_v15  ;;  %v4988_v14 = vadd.f32 %v4956_v48, %v10513_v34  ;;  %v4989_v49 = vadd.f32 %v4957_v20, %v8932_v16  ;;  %v4990_v53 = vadd.f32 %v4958_v58, %v8902_v2 }
 0x538   : > { %v4991_v40 = vadd.f32 %v4959_v61, %v8934_v29  ;;  %v4993_v9 = vadd.f32 %v4961_v3, %v8938_v44  ;;  %v5019_v32 = vadd.f32 %v4987_v39, %v9042_v62 }
 0x539   : > { %v4992_v35 = vadd.f32 %v4960_v22, %v8908_v36  ;;  %v5020_v50 = vadd.f32 %v4988_v14, %v9033_v13  ;;  %v5021_v26 = vadd.f32 %v4989_v49, %v9044_v54  ;;  %v5022_v48 = vadd.f32 %v4990_v53, %v9035_v24 }
 0x53a   : > { %v5023_v20 = vadd.f32 %v4991_v40, %v9046_v21  ;;  %v5025_v61 = vadd.f32 %v4993_v9, %v9061_v57  ;;  %v5500_v22 = vrot.slane %v5018_v43, %v8644_v47  ;;  %v5504_v3 = vrot.slane %v5019_v32, %v8644_v47  ;;  %v3878_v56 = vpop.f32.mrb[236].mxu1  ;;  %v4186_v14 = vpop.f32.mrb[212].mxu0 }
 0x53b   : > { %v5024_v58 = vadd.f32 %v4992_v35, %v9048_v42  ;;  %v5508_v5 = vrot.slane %v5020_v50, %v8644_v47  ;;  %v5512_v39 = vrot.slane %v5021_v26, %v8644_v47  ;;  %v5516_v49 = vrot.slane %v5022_v48, %v8644_v47  ;;  %v3879_v11 = vpop.f32.mrb[237].mxu1  ;;  %v4187_v9 = vpop.f32.mrb[213].mxu0 }
 0x53c   : > { %v5520_v53 = vrot.slane %v5023_v20, %v8644_v47  ;;  %v5528_v35 = vrot.slane %v5025_v61, %v8644_v47  ;;  %v5600_v43 = vsel %vm5394_vm4, %v5504_v3, %v5500_v22  ;;  %v5147_v32 = vsub.f32 %v10497_v46, %v8967_v25  ;;  %v3880_v26 = vpop.f32.mrb[238].mxu1  ;;  %v4188_v48 = vpop.f32.mrb[214].mxu0 }
 0x53d   : > { %v5524_v40 = vrot.slane %v5024_v58, %v8644_v47  ;;  %v5148_v50 = vsub.f32 %v10472_v63, %v8963_v17  ;;  %v5149_v56 = vsub.f32 %v8826_v27, %v8992_v38  ;;  %v5601_v20 = vsel %vm5396_vm9, %v5508_v5, %v5600_v43  ;;  %v3881_v22 = vpop.f32.mrb[239].mxu1  ;;  %v4189_v3 = vpop.f32.mrb[215].mxu0  ;;  %v10564_v25 = vld [vmem:[#allocation88_spill] sm:$0xff] }
 0x53e   : > { %v5150_v58 = vsub.f32 %v10503_v12, %v8953_v59  ;;  %v5151_v11 = vsub.f32 %v8845_v8, %v9012_v33  ;;  %v5152_v61 = vsub.f32 %v8835_v10, %v8988_v15  ;;  %v5602_v17 = vsel %vm5398_vm14, %v5512_v39, %v5601_v20  ;;  %v10555_v33 = vld [vmem:[#allocation81_spill] sm:$0xff] }
 0x53f   : > { %v5153_v63 = vsub.f32 %v8850_v4, %v9021_v41  ;;  %v10514_v5 = vsub.f32 %v10465_v18, %v8946_v45  ;;  %v5179_v9 = vsub.f32 %v5147_v32, %v10512_v60  ;;  %v5603_v43 = vsel %vm5400_vm1, %v5516_v49, %v5602_v17 }
 0x540   : > { %v5180_v26 = vsub.f32 %v5148_v50, %v10513_v34  ;;  %v5181_v48 = vsub.f32 %v5149_v56, %v8932_v16  ;;  %v5182_v22 = vsub.f32 %v5150_v58, %v8902_v2  ;;  %v5604_v39 = vsel %vm5402_vm15, %v5520_v53, %v5603_v43 }
 0x541   : > { %v5178_v14 = vsub.f32 %v10514_v5, %v10474_v23  ;;  %v5183_v20 = vsub.f32 %v5151_v11, %v8934_v29  ;;  %v5184_v3 = vsub.f32 %v5152_v61, %v8908_v36  ;;  %v5185_v38 = vsub.f32 %v5153_v63, %v8938_v44 }
 0x542   : > { %v5605_v45 = vsel %vm5404_vm0, %v5524_v40, %v5604_v39  ;;  %v5211_v49 = vadd.f32 %v5179_v9, %v9042_v62  ;;  %v5212_v32 = vadd.f32 %v5180_v26, %v9033_v13  ;;  %v5213_v56 = vadd.f32 %v5181_v48, %v9044_v54  ;;  %v3884_v11 = vpop.f32.mrb[240].mxu1  ;;  %v4192_v61 = vpop.f32.mrb[216].mxu0 }
 0x543   : > { %v5210_v18 = vadd.f32 %v5178_v14, %v9029_v51  ;;  %v5606_v50 = vsel %vm5406_vm2, %v5528_v35, %v5605_v45  ;;  %v5214_v53 = vadd.f32 %v5182_v22, %v9035_v24  ;;  %v5215_v58 = vadd.f32 %v5183_v20, %v9046_v21  ;;  %v3886_v14 = vpop.f32.mrb[241].mxu1  ;;  %v4194_v9 = vpop.f32.mrb[217].mxu0 }
 0x544   : > { %v10515_v17 = vrot.slane %v9065_v30, 7  ;;  %5623 = vrot.lane.b32.xlu1 %v5606_v50, %s6847_s20  ;;  %v5216_v40 = vadd.f32 %v5184_v3, %v9048_v42  ;;  %v5896_v35 = vrot.slane %v5211_v49, %v8644_v47  ;;  %v5217_v43 = vadd.f32 %v5185_v38, %v9061_v57  ;;  %v3887_v39 = vpop.f32.mrb[242].mxu1  ;;  %v4195_v20 = vpop.f32.mrb[218].mxu0  ;;  %v10517_v50 = vld [vmem:[#allocation9_spill] sm:$0xff]  ;;  %v10519_v9 = vld [vmem:[#allocation11_spill] sm:$0xff] }
 0x545   : > { %v5892_v5 = vrot.slane %v5210_v18, %v8644_v47  ;;  %v5900_v26 = vrot.slane %v5212_v32, %v8644_v47  ;;  %v5904_v48 = vrot.slane %v5213_v56, %v8644_v47  ;;  %v5908_v22 = vrot.slane %v5214_v53, %v8644_v47  ;;  %v4197_v14 = vpop.f32.mrb[219].mxu0  ;;  %v10518_v56 = vld [vmem:[#allocation10_spill] sm:$0xff] }
 0x546   : > { %v9187_v63 = vrot.slane %v10515_v17, 2  ;;  %v5912_v45 = vrot.slane %v5215_v58, %v8644_v47  ;;  %v5916_v3 = vrot.slane %v5216_v40, %v8644_v47  ;;  %v3871_v49 = vadd.f32 %v9088_v37, %v10517_v50  ;;  %v3889_v17 = vpop.f32.mrb[243].mxu1  ;;  %v10520_v37 = vld [vmem:[#allocation12_spill] sm:$0xff] }
 0x547   : > { %v5992_v18 = vsel %vm5394_vm4, %v5896_v35, %v5892_v5  ;;  %v4229_v32 = vadd.f32 %v9090_v7, %v8956_v55  ;;  %v3874_v53 = vadd.f32 %v9110_v28, %v10518_v56  ;;  %v4230_v58 = vadd.f32 %v9112_v0, %v9017_v1 }
 0x548   : > { %10516 = vst [vmem:[#allocation91_spill] sm:$0xff] %v9187_v63  ;;  %v5993_v38 = vsel %vm5396_vm9, %v5900_v26, %v5992_v18  ;;  %v9211_v5 = vadd.f32 %v3884_v11, %v10519_v9  ;;  %v4231_v35 = vadd.f32 %v4192_v61, %v3871_v49  ;;  %v9214_v50 = vadd.f32 %v3887_v39, %v10520_v37 }
 0x549   : > { %v5994_v40 = vsel %vm5398_vm14, %v5904_v48, %v5993_v38  ;;  %v4252_v18 = vadd.f32 %v10455_v31, %v4229_v32  ;;  %v4253_v7 = vadd.f32 %v10455_v31, %v4230_v58  ;;  %v4232_v55 = vadd.f32 %v4195_v20, %v3874_v53  ;;  %v10523_v53 = vld [vmem:[#allocation14_spill] sm:$0xff] }
 0x54a   : > { %v5995_v26 = vsel %vm5400_vm1, %v5908_v22, %v5994_v40  ;;  %v5920_v28 = vrot.slane %v5217_v43, %v8644_v47  ;;  %v4254_v0 = vadd.f32 %v10455_v31, %v4231_v35  ;;  %v4700_v11 = vrot.slane %v9099_v19, 7  ;;  %v3892_v22 = vpop.f32.mrb[244].mxu1  ;;  %v4200_v17 = vpop.f32.mrb[220].mxu0  ;;  %v10524_v35 = vld [vmem:[#allocation84_spill] sm:$0xff] }
 0x54b   : > { %v5996_v1 = vsel %vm5402_vm15, %v5912_v45, %v5995_v26  ;;  %v4268_v48 = vmax.f32 %v4252_v18, 0.0  ;;  %v4269_v39 = vmax.f32 %v4253_v7, 0.0  ;;  %v4255_v49 = vadd.f32 %v10455_v31, %v4232_v55  ;;  %v3893_v45 = vpop.f32.mrb[245].mxu1  ;;  %v4201_v32 = vpop.f32.mrb[221].mxu0 }
 0x54c   : > { %v5997_v61 = vsel %vm5404_vm0, %v5916_v3, %v5996_v1  ;;  %v10521_v14 = vrot.slane %v9083_v52, 7  ;;  %v4270_v20 = vmax.f32 %v4254_v0, 0.0  ;;  %v4704_v56 = vrot.slane %v9104_v6, 7  ;;  %v3894_v40 = vpop.f32.mrb[246].mxu1  ;;  %v4202_v9 = vpop.f32.mrb[222].mxu0 }
 0x54d   : > { %v5998_v43 = vsel %vm5406_vm2, %v5920_v28, %v5997_v61  ;;  %v4460_v3 = vcombine.high %v4268_v48, %v4268_v48  ;;  %v9233_v58 = vrot.slane %v4268_v48, %v10523_v53  ;;  %v4477_v31 = vcombine.high %v4269_v39, %v4269_v39  ;;  %v3895_v1 = vpop.f32.mrb[247].mxu1  ;;  %v4203_v0 = vpop.f32.mrb[223].mxu0  ;;  %v10529_v48 = vld [vmem:[#allocation75_spill] sm:$0xff]  ;;  %v10536_v9 = vld [vmem:[#allocation85_spill] sm:$0xff] }
 0x54e   : > { %v9227_v38 = vrot.slane %v10521_v14, 2  ;;  %6015 = vrot.lane.b32.xlu1 %v5998_v43, %s6847_s20  ;;  %v10525_v37 = vrot.slane %v10524_v35, 7  ;;  %v9240_v18 = vrot.slane %v4269_v39, %v10523_v53  ;;  %v4494_v7 = vcombine.high %v4270_v20, %v4270_v20 }
 0x54f   : > { %v9243_v55 = vrot.slane %v4270_v20, %v10523_v53  ;;  %v9245_v28 = vrot.slane %v4700_v11, 2  ;;  %v9248_v61 = vrot.slane %v4460_v3, %v10523_v53  ;;  %v4642_v22 = vadd.f32 %v9233_v58, %v10529_v48 }
 0x550   : > { %10522 = vst [vmem:[#allocation9_spill] sm:$0xff] %v9227_v38  ;;  %v9237_v26 = vrot.slane %v10525_v37, 2  ;;  %10527 = vst [vmem:[#allocation11_spill] sm:$0xff] %v9240_v18  ;;  %v4818_v17 = vrot.slane %v9233_v58, 7  ;;  %v4271_v14 = vmax.f32 %v4255_v49, 0.0  ;;  %v10530_v39 = vsub.f32 0.0, %v10529_v48 }
 0x551   : > { %10528 = vst [vmem:[#allocation12_spill] sm:$0xff] %v9245_v28  ;;  %v9265_v32 = vrot.slane %v4704_v56, 2  ;;  %v9269_v3 = vcombine.high %v9233_v58, %v9233_v58  ;;  %v10534_v49 = vld [vmem:[#allocation80_spill] sm:$0xff]  ;;  %v9276_v37 = vadd.f32 %v10536_v9, %v4642_v22  ;;  %v9279_v1 = vrot.slane %v4477_v31, %v10523_v53 }
 0x552   : > { %10526 = vst [vmem:[#allocation10_spill] sm:$0xff] %v9237_v26  ;;  %v9256_v43 = vsub.f32 %v10530_v39, %v9233_v58  ;;  %v10531_v11 = vmov %v10530_v39  ;;  %v9273_v40 = vadd.f32 %v9248_v61, %v10534_v49  ;;  %v9283_v0 = vcombine.high %v9248_v61, %v9248_v61  ;;  %v9303_v57 = vpop.f32.mrb[224].mxu0 }
 0x553   : > { %v9261_v20 = vadd.f32 %v10531_v11, %v9233_v58  ;;  %10533 = vst [vmem:[#allocation75_spill] sm:$0xff] %v9265_v32  ;;  %10537 = vst [vmem:[#allocation85_spill] sm:$0xff] %v9276_v37  ;;  %v4822_v56 = vrot.slane %v9248_v61, 7  ;;  %v10540_v39 = vsub.f32 0.0, %v10534_v49  ;;  %v9296_v22 = vrot.slane %v4494_v7, %v10523_v53  ;;  %v4208_v7 = vpop.f32.mrb[225].mxu0 }
 0x554   : > { %10535 = vst [vmem:[#allocation80_spill] sm:$0xff] %v9273_v40  ;;  %10538 = vst [vmem:[#allocation92_spill] sm:$0xff] %v9279_v1  ;;  %v9293_v40 = vrot.slane %v4818_v17, 2  ;;  %v9300_v31 = vcombine.high %v9243_v55, %v9243_v55  ;;  %v4706_v37 = vrot.slane %v9243_v55, 7  ;;  %v4511_v45 = vcombine.high %v4271_v14, %v4271_v14  ;;  %v9321_v21 = vpop.f32.mrb[226].mxu0 }
 0x555   : > { %10532 = vst [vmem:[#allocation14_spill] sm:$0xff] %v9261_v20  ;;  %10539 = vst [vmem:[#allocation93_spill] sm:$0xff] %v9283_v0  ;;  %v9289_v11 = vadd.f32 %v10540_v39, %v9248_v61  ;;  %v9307_v39 = vcombine.high %v9240_v18, %v9240_v18  ;;  %v9311_v17 = vrot.slane %v4271_v14, %v10523_v53  ;;  %v9313_v20 = vrot.slane %v4822_v56, 2  ;;  %v4211_v56 = vpop.f32.mrb[227].mxu0 }
 0x556   : > { %10542 = vst [vmem:[#allocation95_spill] sm:$0xff] %v9300_v31  ;;  %v9317_v23 = vcombine.high %v9296_v22, %v9296_v22  ;;  %v4708_v54 = vrot.slane %v9300_v31, 7  ;;  %v4710_v42 = vrot.slane %v9296_v22, 7  ;;  %v9323_v16 = vrot.slane %v4706_v37, 2 }
 0x557   : > { %10541 = vst [vmem:[#allocation94_spill] sm:$0xff] %v9289_v11  ;;  %10543 = vst [vmem:[#allocation96_spill] sm:$0xff] %v9307_v39  ;;  %v4826_v11 = vrot.slane %v9240_v18, 7  ;;  %v9328_v7 = vrot.slane %v4511_v45, %v10523_v53  ;;  %v9337_v29 = vcombine.high %v9311_v17, %v9311_v17  ;;  %v4820_v14 = vrot.slane %v9269_v3, 7 }
 0x558   : > { %10544 = vst [vmem:[#allocation97_spill] sm:$0xff] %v9323_v16  ;;  %v9330_v44 = vrot.slane %v4708_v54, 2  ;;  %v9332_v27 = vrot.slane %v4710_v42, 2  ;;  %v9347_v54 = vcombine.high %v9279_v1, %v9279_v1  ;;  %v4824_v36 = vrot.slane %v9283_v0, 7 }
 0x559   : > { %10545 = vst [vmem:[#allocation98_spill] sm:$0xff] %v9328_v7  ;;  %v9342_v24 = vcombine.high %v9328_v7, %v9328_v7  ;;  %v9353_v2 = vrot.slane %v4826_v11, 2  ;;  %v4828_v37 = vrot.slane %v9307_v39, 7  ;;  %v4830_v41 = vrot.slane %v9279_v1, 7 }
 0x55a   : > { %10546 = vst [vmem:[#allocation99_spill] sm:$0xff] %v9330_v44  ;;  %10547 = vst [vmem:[#allocation100_spill] sm:$0xff] %v9332_v27  ;;  %v4832_v45 = vrot.slane %v9347_v54, 7  ;;  %v9358_v4 = vrot.slane %v4820_v14, 2  ;;  %v9360_v13 = vrot.slane %v4824_v36, 2  ;;  %v10556_v14 = vsub.f32 0.0, %v10555_v33 }
 0x55b   : > { %10548 = vst [vmem:[#allocation101_spill] sm:$0xff] %v9342_v24  ;;  %10549 = vst [vmem:[#allocation102_spill] sm:$0xff] %v9347_v54  ;;  %v9364_v62 = vrot.slane %v4828_v37, 2  ;;  %v9366_v51 = vrot.slane %v4830_v41, 2  ;;  %v10557_v36 = vsub.f32 0.0, %v10534_v49  ;;  %v10558_v37 = vsub.f32 0.0, %v10524_v35 }
 0x55c   : > { %10550 = vst [vmem:[#allocation103_spill] sm:$0xff] %v9353_v2  ;;  %10551 = vst [vmem:[#allocation104_spill] sm:$0xff] %v9360_v13  ;;  %v9368_v11 = vrot.slane %v4832_v45, 2  ;;  %v4963_v8 = vsub.f32 %v10556_v14, %v9269_v3  ;;  %v10559_v41 = vsub.f32 0.0, %v9065_v30  ;;  %v10560_v15 = vsub.f32 0.0, %v9099_v19  ;;  %v4214_v16 = vpop.f32.mrb[228].mxu0 }
 0x55d   : > { %10552 = vst [vmem:[#allocation105_spill] sm:$0xff] %v9364_v62  ;;  %10553 = vst [vmem:[#allocation106_spill] sm:$0xff] %v9366_v51  ;;  %v4964_v42 = vsub.f32 %v10557_v36, %v9248_v61  ;;  %v4965_v56 = vsub.f32 %v10558_v37, %v9283_v0  ;;  %v10561_v34 = vsub.f32 0.0, %v9083_v52  ;;  %v4994_v59 = vadd.f32 %v9256_v43, %v10536_v9  ;;  %v10563_v37 = vld [vmem:[#allocation87_spill] sm:$0xff] }
 0x55e   : > { %10554 = vst [vmem:[#allocation107_spill] sm:$0xff] %v9368_v11  ;;  %v4966_v45 = vsub.f32 %v10559_v41, %v9240_v18  ;;  %v4967_v10 = vsub.f32 %v10560_v15, %v9307_v39  ;;  %v10562_v36 = vsub.f32 0.0, %v9104_v6  ;;  %v4995_v60 = vadd.f32 %v4963_v8, %v10563_v37 }
 0x55f   : > { %v4968_v14 = vsub.f32 %v10561_v34, %v9279_v1  ;;  %v4996_v46 = vadd.f32 %v4964_v42, %v10564_v25  ;;  %v4997_v41 = vadd.f32 %v4965_v56, %v9237_v26  ;;  %v5026_v34 = vadd.f32 %v4994_v59, %v9293_v40 }
 0x560   : > { %v4969_v12 = vsub.f32 %v10562_v36, %v9347_v54  ;;  %v4998_v27 = vadd.f32 %v4966_v45, %v9187_v63  ;;  %v4999_v15 = vadd.f32 %v4967_v10, %v9245_v28  ;;  %v5027_v31 = vadd.f32 %v4995_v60, %v9358_v4 }
 0x561   : > { %v5000_v44 = vadd.f32 %v4968_v14, %v9227_v38  ;;  %v5028_v36 = vadd.f32 %v4996_v46, %v9313_v20  ;;  %v5029_v8 = vadd.f32 %v4997_v41, %v9360_v13  ;;  %v5532_v10 = vrot.slane %v5026_v34, %v8644_v47 }
 0x562   : > { %v5001_v43 = vadd.f32 %v4969_v12, %v9265_v32  ;;  %v5030_v42 = vadd.f32 %v4998_v27, %v9353_v2  ;;  %v5031_v56 = vadd.f32 %v4999_v15, %v9364_v62  ;;  %v5536_v59 = vrot.slane %v5027_v31, %v8644_v47  ;;  %v4215_v15 = vpop.f32.mrb[229].mxu0 }
 0x563   : > { %v5032_v45 = vadd.f32 %v5000_v44, %v9366_v51  ;;  %v5540_v12 = vrot.slane %v5028_v36, %v8644_v47  ;;  %v5544_v60 = vrot.slane %v5029_v8, %v8644_v47  ;;  %v5155_v44 = vsub.f32 %v10555_v33, %v9269_v3  ;;  %v4216_v36 = vpop.f32.mrb[230].mxu0 }
 0x564   : > { %v5033_v14 = vadd.f32 %v5001_v43, %v9368_v11  ;;  %v5548_v46 = vrot.slane %v5030_v42, %v8644_v47  ;;  %v5552_v41 = vrot.slane %v5031_v56, %v8644_v47  ;;  %v5607_v43 = vsel %vm5394_vm4, %v5536_v59, %v5532_v10 }
 0x565   : > { %v5556_v27 = vrot.slane %v5032_v45, %v8644_v47  ;;  %v5156_v31 = vsub.f32 %v10534_v49, %v9248_v61  ;;  %v5157_v16 = vsub.f32 %v10524_v35, %v9283_v0  ;;  %v5608_v8 = vsel %vm5396_vm9, %v5540_v12, %v5607_v43 }
 0x566   : > { %v5560_v34 = vrot.slane %v5033_v14, %v8644_v47  ;;  %v5158_v42 = vsub.f32 %v9065_v30, %v9240_v18  ;;  %v5159_v56 = vsub.f32 %v9099_v19, %v9307_v39  ;;  %v5160_v45 = vsub.f32 %v9083_v52, %v9279_v1  ;;  %v4217_v14 = vpop.f32.mrb[231].mxu0 }
 0x567   : > { %v5609_v10 = vsel %vm5398_vm14, %v5544_v60, %v5608_v8  ;;  %v5161_v61 = vsub.f32 %v9104_v6, %v9347_v54  ;;  %v10565_v49 = vsub.f32 %v10529_v48, %v9233_v58  ;;  %v5187_v12 = vsub.f32 %v5155_v44, %v10563_v37 }
 0x568   : > { %v5610_v15 = vsel %vm5400_vm1, %v5548_v46, %v5609_v10  ;;  %v5188_v43 = vsub.f32 %v5156_v31, %v10564_v25  ;;  %v5189_v36 = vsub.f32 %v5157_v16, %v9237_v26  ;;  %v5190_v14 = vsub.f32 %v5158_v42, %v9187_v63  ;;  %v10602_v26 = vld [vmem:[#allocation100_spill] sm:$0xff] }
 0x569   : > { %v5186_v59 = vsub.f32 %v10565_v49, %v10536_v9  ;;  %v5611_v60 = vsel %vm5402_vm15, %v5552_v41, %v5610_v15  ;;  %v5191_v8 = vsub.f32 %v5159_v56, %v9245_v28  ;;  %v5192_v54 = vsub.f32 %v5160_v45, %v9227_v38 }
 0x56a   : > { %v5193_v6 = vsub.f32 %v5161_v61, %v9265_v32  ;;  %v5612_v58 = vsel %vm5404_vm0, %v5556_v27, %v5611_v60  ;;  %v5219_v46 = vadd.f32 %v5187_v12, %v9358_v4  ;;  %v5220_v44 = vadd.f32 %v5188_v43, %v9313_v20  ;;  %v10588_v32 = vld [vmem:[#allocation95_spill] sm:$0xff] }
 0x56b   : > { %v5218_v48 = vadd.f32 %v5186_v59, %v9293_v40  ;;  %v5613_v31 = vsel %vm5406_vm2, %v5560_v34, %v5612_v58  ;;  %v5221_v16 = vadd.f32 %v5189_v36, %v9360_v13  ;;  %v5222_v41 = vadd.f32 %v5190_v14, %v9353_v2 }
 0x56c   : > { %v5223_v42 = vadd.f32 %v5191_v8, %v9364_v62  ;;  %5625 = vrot.lane.b32.xlu0 %v5613_v31, %s6847_s20  ;;  %v5224_v56 = vadd.f32 %v5192_v54, %v9366_v51  ;;  %v5225_v27 = vadd.f32 %v5193_v6, %v9368_v11  ;;  %v5928_v10 = vrot.slane %v5219_v46, %v8644_v47 }
 0x56d   : > { %v5924_v45 = vrot.slane %v5218_v48, %v8644_v47  ;;  %v10566_v61 = vrot.slane %v9311_v17, 7  ;;  %v10568_v34 = vrot.slane %v9328_v7, 7  ;;  %v5932_v12 = vrot.slane %v5220_v44, %v8644_v47  ;;  %v6749_v44 = vld [vmem:[%s10167_s6] ss:$0 sm:$0xff] }
 0x56e   : > { %v5936_v15 = vrot.slane %v5221_v16, %v8644_v47  ;;  %v5940_v54 = vrot.slane %v5222_v41, %v8644_v47  ;;  %v5944_v6 = vrot.slane %v5223_v42, %v8644_v47  ;;  %v4233_v36 = vadd.f32 %v9303_v57, %v9211_v5 }
 0x56f   : > { %v9463_v49 = vrot.slane %v10566_v61, 2  ;;  %v9467_v59 = vrot.slane %v10568_v34, 2  ;;  %v5999_v43 = vsel %vm5394_vm4, %v5928_v10, %v5924_v45  ;;  %v5948_v14 = vrot.slane %v5224_v56, %v8644_v47 }
 0x570   : > { %v6000_v60 = vsel %vm5396_vm9, %v5932_v12, %v5999_v43  ;;  %v4234_v8 = vadd.f32 %v9321_v21, %v9214_v50  ;;  %v4716_v58 = vrot.slane %v9337_v29, 7  ;;  %v5952_v48 = vrot.slane %v5225_v27, %v8644_v47 }
 0x571   : > { %10567 = vst [vmem:[#allocation81_spill] sm:$0xff] %v9463_v49  ;;  %10569 = vst [vmem:[#allocation87_spill] sm:$0xff] %v9467_v59  ;;  %v6001_v46 = vsel %vm5398_vm14, %v5936_v15, %v6000_v60  ;;  %v4256_v31 = vadd.f32 %v6749_v44, %v4233_v36  ;;  %v4720_v57 = vrot.slane %v9342_v24, 7  ;;  %v10570_v41 = vrot.slane %v9317_v23, 7 }
 0x572   : > { %v6002_v5 = vsel %vm5400_vm1, %v5940_v54, %v6001_v46  ;;  %v4257_v16 = vadd.f32 %v6749_v44, %v4234_v8  ;;  %v9494_v27 = vrot.slane %v4716_v58, 2  ;;  %v10574_v8 = vld [vmem:[#allocation40_spill] sm:$0xff]  ;;  %v10575_v46 = vld [vmem:[#allocation62_spill] sm:$0xff]  ;;  %v10589_v62 = vsub.f32 0.0, %v10588_v32 }
 0x573   : > { %v9490_v42 = vrot.slane %v10570_v41, 2  ;;  %v6003_v50 = vsel %vm5402_vm15, %v5944_v6, %v6002_v5  ;;  %v4272_v56 = vmax.f32 %v4256_v31, 0.0  ;;  %v9498_v34 = vrot.slane %v4720_v57, 2  ;;  %v10576_v44 = vld [vmem:[#allocation22_spill] sm:$0xff] }
 0x574   : > { %10571 = vst [vmem:[#allocation88_spill] sm:$0xff] %v9494_v27  ;;  %v6004_v10 = vsel %vm5404_vm0, %v5948_v14, %v6003_v50  ;;  %v4273_v61 = vmax.f32 %v4257_v16, 0.0  ;;  %v10573_v14 = vld [vmem:[#allocation21_spill] sm:$0xff]  ;;  %v9516_v31 = vadd.f32 %v10576_v44, %v10575_v46  ;;  %v10577_v41 = vsub.f32 0.0, %v9243_v55 }
 0x575   : > { %10572 = vst [vmem:[#allocation108_spill] sm:$0xff] %v9498_v34  ;;  %v6005_v15 = vsel %vm5406_vm2, %v5952_v48, %v6004_v10  ;;  %v4528_v54 = vcombine.high %v4272_v56, %v4272_v56  ;;  %v9503_v43 = vrot.slane %v4272_v56, %v10523_v53  ;;  %v9512_v58 = vadd.f32 %v10574_v8, %v10573_v14 }
 0x576   : > { %6017 = vrot.lane.b32.xlu0 %v6005_v15, %s6847_s20  ;;  %v4545_v36 = vcombine.high %v4273_v61, %v4273_v61  ;;  %v9508_v60 = vrot.slane %v4273_v61, %v10523_v53  ;;  %v10578_v56 = vmov %v10577_v41  ;;  %v10584_v61 = vsub.f32 0.0, %v9296_v22 }
 0x577   : > { %v9519_v48 = vrot.slane %v4528_v54, %v10523_v53  ;;  %v9523_v57 = vcombine.high %v9503_v43, %v9503_v43  ;;  %v4650_v5 = vadd.f32 %v9503_v43, %v9243_v55  ;;  %v4834_v16 = vrot.slane %v9503_v43, 7 }
 0x578   : > { %v4970_v50 = vsub.f32 %v10577_v41, %v9503_v43  ;;  %v9534_v10 = vadd.f32 %v10578_v56, %v9503_v43  ;;  %v9539_v15 = vrot.slane %v4545_v36, %v10523_v53  ;;  %v10582_v41 = vld [vmem:[#allocation97_spill] sm:$0xff]  ;;  %v9564_v45 = vcombine.high %v9508_v60, %v9508_v60 }
 0x579   : > { %v9543_v54 = vcombine.high %v9519_v48, %v9519_v48  ;;  %v9547_v46 = vadd.f32 %v9519_v48, %v9296_v22  ;;  %v9550_v6 = vadd.f32 %v10582_v41, %v4650_v5  ;;  %v9552_v12 = vrot.slane %v4834_v16, 2 }
 0x57a   : > { %10579 = vst [vmem:[#allocation21_spill] sm:$0xff] %v9534_v10  ;;  %10580 = vst [vmem:[#allocation40_spill] sm:$0xff] %v9539_v15  ;;  %v4838_v56 = vrot.slane %v9519_v48, 7  ;;  %v9558_v53 = vadd.f32 %v10584_v61, %v9519_v48  ;;  %v4842_v21 = vrot.slane %v9508_v60, 7  ;;  %v9569_v5 = vcombine.high %v9539_v15, %v9539_v15 }
 0x57b   : > { %10581 = vst [vmem:[#allocation62_spill] sm:$0xff] %v9547_v46  ;;  %10583 = vst [vmem:[#allocation22_spill] sm:$0xff] %v9550_v6  ;;  %v4836_v16 = vrot.slane %v9523_v57, 7  ;;  %v4840_v11 = vrot.slane %v9543_v54, 7  ;;  %v4844_v61 = vrot.slane %v9564_v45, 7  ;;  %v4846_v36 = vrot.slane %v9539_v15, 7 }
 0x57c   : > { %10585 = vst [vmem:[#allocation97_spill] sm:$0xff] %v9558_v53  ;;  %10586 = vst [vmem:[#allocation109_spill] sm:$0xff] %v9564_v45  ;;  %v9573_v51 = vrot.slane %v4838_v56, 2  ;;  %v4971_v10 = vsub.f32 %v10589_v62, %v9523_v57  ;;  %v9584_v2 = vrot.slane %v4842_v21, 2  ;;  %v4848_v28 = vrot.slane %v9569_v5, 7 }
 0x57d   : > { %10587 = vst [vmem:[#allocation110_spill] sm:$0xff] %v9569_v5  ;;  %v9580_v38 = vrot.slane %v4836_v16, 2  ;;  %v9582_v53 = vrot.slane %v4840_v11, 2  ;;  %v9587_v1 = vrot.slane %v4844_v61, 2  ;;  %v9589_v56 = vrot.slane %v4846_v36, 2 }
 0x57e   : > { %10591 = vst [vmem:[#allocation111_spill] sm:$0xff] %v9584_v2  ;;  %v10594_v52 = vsub.f32 0.0, %v9296_v22  ;;  %v10595_v63 = vsub.f32 0.0, %v9317_v23  ;;  %v9597_v16 = vrot.slane %v4848_v28, 2  ;;  %v10597_v11 = vsub.f32 0.0, %v9311_v17  ;;  %v10601_v28 = vld [vmem:[#allocation99_spill] sm:$0xff] }
 0x57f   : > { %10590 = vst [vmem:[#allocation95_spill] sm:$0xff] %v9582_v53  ;;  %10592 = vst [vmem:[#allocation112_spill] sm:$0xff] %v9587_v1  ;;  %v10598_v61 = vsub.f32 0.0, %v9337_v29  ;;  %v10599_v36 = vsub.f32 0.0, %v9328_v7  ;;  %v5003_v46 = vadd.f32 %v4971_v10, %v10601_v28 }
 0x580   : > { %10593 = vst [vmem:[#allocation113_spill] sm:$0xff] %v9589_v56  ;;  %v4972_v13 = vsub.f32 %v10594_v52, %v9519_v48  ;;  %v4973_v62 = vsub.f32 %v10595_v63, %v9543_v54  ;;  %10596 = vst [vmem:[#allocation114_spill] sm:$0xff] %v9597_v16  ;;  %v4974_v21 = vsub.f32 %v10597_v11, %v9508_v60  ;;  %v10600_v52 = vsub.f32 0.0, %v9342_v24 }
 0x581   : > { %v4975_v39 = vsub.f32 %v10598_v61, %v9564_v45  ;;  %v4976_v19 = vsub.f32 %v10599_v36, %v9539_v15  ;;  %v5002_v63 = vadd.f32 %v4970_v50, %v10582_v41 }
 0x582   : > { %v4977_v6 = vsub.f32 %v10600_v52, %v9569_v5  ;;  %v5004_v18 = vadd.f32 %v4972_v13, %v10602_v26  ;;  %v5005_v11 = vadd.f32 %v4973_v62, %v9490_v42  ;;  %v5006_v30 = vadd.f32 %v4974_v21, %v9463_v49 }
 0x583   : > { %v5007_v61 = vadd.f32 %v4975_v39, %v9494_v27  ;;  %v5008_v0 = vadd.f32 %v4976_v19, %v9467_v59  ;;  %v5034_v35 = vadd.f32 %v5002_v63, %v9552_v12  ;;  %v5035_v52 = vadd.f32 %v5003_v46, %v9580_v38 }
 0x584   : > { %v5009_v36 = vadd.f32 %v4977_v6, %v9498_v34  ;;  %v5036_v50 = vadd.f32 %v5004_v18, %v9573_v51  ;;  %v5037_v10 = vadd.f32 %v5005_v11, %v9582_v53  ;;  %v5038_v13 = vadd.f32 %v5006_v30, %v9584_v2 }
 0x585   : > { %v5039_v62 = vadd.f32 %v5007_v61, %v9587_v1  ;;  %v5040_v21 = vadd.f32 %v5008_v0, %v9589_v56  ;;  %v5564_v19 = vrot.slane %v5034_v35, %v8644_v47  ;;  %v5568_v6 = vrot.slane %v5035_v52, %v8644_v47 }
 0x586   : > { %v5041_v39 = vadd.f32 %v5009_v36, %v9597_v16  ;;  %v5572_v63 = vrot.slane %v5036_v50, %v8644_v47  ;;  %v5576_v46 = vrot.slane %v5037_v10, %v8644_v47  ;;  %v5580_v18 = vrot.slane %v5038_v13, %v8644_v47 }
 0x587   : > { %v5584_v11 = vrot.slane %v5039_v62, %v8644_v47  ;;  %v5588_v30 = vrot.slane %v5040_v21, %v8644_v47  ;;  %v5614_v0 = vsel %vm5394_vm4, %v5568_v6, %v5564_v19  ;;  %v5163_v36 = vsub.f32 %v10588_v32, %v9523_v57 }
 0x588   : > { %v5592_v61 = vrot.slane %v5041_v39, %v8644_v47  ;;  %v5164_v35 = vsub.f32 %v9296_v22, %v9519_v48  ;;  %v5615_v52 = vsel %vm5396_vm9, %v5572_v63, %v5614_v0  ;;  %v5165_v50 = vsub.f32 %v9317_v23, %v9543_v54 }
 0x589   : > { %v5166_v10 = vsub.f32 %v9311_v17, %v9508_v60  ;;  %v5167_v13 = vsub.f32 %v9337_v29, %v9564_v45  ;;  %v5616_v62 = vsel %vm5398_vm14, %v5576_v46, %v5615_v52  ;;  %v5168_v21 = vsub.f32 %v9328_v7, %v9539_v15  ;;  %v10620_v7 = vld [vmem:[#allocation46_spill] sm:$0xff]  ;;  %v10634_v45 = vld [vmem:[#allocation35_spill] sm:$0xff] }
 0x58a   : > { %v5169_v39 = vsub.f32 %v9342_v24, %v9569_v5  ;;  %v10603_v22 = vsub.f32 %v9243_v55, %v9503_v43  ;;  %v5617_v19 = vsel %vm5400_vm1, %v5580_v18, %v5616_v62  ;;  %v5195_v6 = vsub.f32 %v5163_v36, %v10601_v28  ;;  %v10604_v62 = vld [vmem:[#allocation31_spill] sm:$0xff] }
 0x58b   : > { %v5196_v63 = vsub.f32 %v5164_v35, %v10602_v26  ;;  %v5197_v0 = vsub.f32 %v5165_v50, %v9490_v42  ;;  %v5618_v46 = vsel %vm5402_vm15, %v5584_v11, %v5617_v19  ;;  %v5198_v52 = vsub.f32 %v5166_v10, %v9463_v49 }
 0x58c   : > { %v5194_v48 = vsub.f32 %v10603_v22, %v10582_v41  ;;  %v5199_v15 = vsub.f32 %v5167_v13, %v9494_v27  ;;  %v5200_v5 = vsub.f32 %v5168_v21, %v9467_v59  ;;  %v5619_v24 = vsel %vm5404_vm0, %v5588_v30, %v5618_v46  ;;  %v10605_v21 = vld [vmem:[#allocation23_spill] sm:$0xff]  ;;  %v10619_v27 = vld [vmem:[#allocation45_spill] sm:$0xff] }
 0x58d   : > { %v5201_v55 = vsub.f32 %v5169_v39, %v9498_v34  ;;  %v5227_v18 = vadd.f32 %v5195_v6, %v9580_v38  ;;  %v5620_v36 = vsel %vm5406_vm2, %v5592_v61, %v5619_v24  ;;  %v5228_v35 = vadd.f32 %v5196_v63, %v9573_v51  ;;  %v10606_v6 = vld [vmem:[#allocation7_spill] sm:$0xff]  ;;  %v10607_v63 = vld [vmem:[#allocation24_spill] sm:$0xff] }
 0x58e   : > { %v5226_v43 = vadd.f32 %v5194_v48, %v9552_v12  ;;  %v5229_v11 = vadd.f32 %v5197_v0, %v9582_v53  ;;  %v5230_v50 = vadd.f32 %v5198_v52, %v9584_v2  ;;  %5627 = vrot.lane.b32.xlu1 %v5620_v36, %s6847_s20  ;;  %v5231_v10 = vadd.f32 %v5199_v15, %v9587_v1  ;;  %v10608_v0 = vld [vmem:[#allocation47_spill] sm:$0xff]  ;;  %v10611_v36 = vld [vmem:[#allocation26_spill] sm:$0xff]  ;;  %v10618_v2 = vld [vmem:[#allocation44_spill] sm:$0xff] }
 0x58f   : > { %v5232_v30 = vadd.f32 %v5200_v5, %v9589_v56  ;;  %v5233_v13 = vadd.f32 %v5201_v55, %v9597_v16  ;;  %v4756_v39 = vadd.f32 %v10605_v21, %v10604_v62  ;;  %v5960_v24 = vrot.slane %v5227_v18, %v8644_v47  ;;  %v10609_v46 = vld [vmem:[#allocation27_spill] sm:$0xff]  ;;  %v10613_v16 = vld [vmem:[#allocation37_spill] sm:$0xff] }
 0x590   : > { %v5956_v22 = vrot.slane %v5226_v43, %v8644_v47  ;;  %v5964_v61 = vrot.slane %v5228_v35, %v8644_v47  ;;  %v5968_v48 = vrot.slane %v5229_v11, %v8644_v47  ;;  %v5972_v19 = vrot.slane %v5230_v50, %v8644_v47  ;;  %v10610_v55 = vld [vmem:[#allocation71_spill] sm:$0xff]  ;;  %v10612_v43 = vld [vmem:[#allocation32_spill] sm:$0xff]  ;;  %v10615_v50 = vld [vmem:[#allocation41_spill] sm:$0xff] }
 0x591   : > { %v4758_v15 = vadd.f32 %v10607_v63, %v10606_v6  ;;  %v4759_v52 = vadd.f32 %v10609_v46, %v10608_v0  ;;  %v4760_v62 = vadd.f32 %v10611_v36, %v10610_v55  ;;  %v4882_v18 = vadd.f32 %v10613_v16, %v10612_v43  ;;  %v10614_v11 = vld [vmem:[#allocation36_spill] sm:$0xff]  ;;  %v10616_v6 = vld [vmem:[#allocation39_spill] sm:$0xff] }
 0x592   : > { %v6006_v5 = vsel %vm5394_vm4, %v5960_v24, %v5956_v22  ;;  %v4761_v56 = vadd.f32 %v10614_v11, %v9512_v58  ;;  %v4883_v34 = vadd.f32 %v10615_v50, %v9516_v31  ;;  %v4884_v1 = vadd.f32 %v10616_v6, %v4756_v39  ;;  %v10617_v59 = vld [vmem:[#allocation43_spill] sm:$0xff] }
 0x593   : > { %v6007_v35 = vsel %vm5396_vm9, %v5964_v61, %v6006_v5  ;;  %v5976_v22 = vrot.slane %v5231_v10, %v8644_v47  ;;  %v5980_v24 = vrot.slane %v5232_v30, %v8644_v47  ;;  %v5984_v0 = vrot.slane %v5233_v13, %v8644_v47 }
 0x594   : > { %v6008_v55 = vsel %vm5398_vm14, %v5968_v48, %v6007_v35  ;;  %v5269_v61 = vrot.slane %v4882_v18, %v8644_v47  ;;  %v5273_v5 = vrot.slane %v4883_v34, %v8644_v47  ;;  %v5277_v58 = vrot.slane %v4884_v1, %v8644_v47  ;;  %v10621_v35 = vld [vmem:[#allocation17_spill] sm:$0xff]  ;;  %v10622_v18 = vld [vmem:[#allocation30_spill] sm:$0xff] }
 0x595   : > { %v6009_v43 = vsel %vm5400_vm1, %v5972_v19, %v6008_v55  ;;  %v4886_v39 = vadd.f32 %v10617_v59, %v4758_v15  ;;  %v4887_v10 = vadd.f32 %v10618_v2, %v4759_v52  ;;  %v4888_v30 = vadd.f32 %v10619_v27, %v4760_v62 }
 0x596   : > { %v6010_v31 = vsel %vm5402_vm15, %v5976_v22, %v6009_v43  ;;  %v4889_v48 = vadd.f32 %v10620_v7, %v4761_v56  ;;  %v5395_v19 = vsel %vm5394_vm4, %v5273_v5, %v5269_v61  ;;  %v4629_v55 = vadd.f32 %v10622_v18, %v10621_v35  ;;  %v10623_v22 = vld [vmem:[#allocation28_spill] sm:$0xff]  ;;  %v10627_v56 = vld [vmem:[#allocation25_spill] sm:$0xff]  ;;  %v10628_v61 = vld [vmem:[#allocation34_spill] sm:$0xff] }
 0x597   : > { %v6011_v13 = vsel %vm5404_vm0, %v5980_v24, %v6010_v31  ;;  %v5397_v1 = vsel %vm5396_vm9, %v5277_v58, %v5395_v19  ;;  %v10624_v43 = vld [vmem:[#allocation16_spill] sm:$0xff]  ;;  %v10626_v52 = vsub.f32 0.0, %v10621_v35  ;;  %v10629_v5 = vld [vmem:[#allocation15_spill] sm:$0xff]  ;;  %v10637_v35 = vsub.f32 0.0, %v10573_v14  ;;  %v10640_v14 = vld [vmem:[#allocation29_spill] sm:$0xff] }
 0x598   : > { %v6012_v34 = vsel %vm5406_vm2, %v5984_v0, %v6011_v13  ;;  %v10625_v15 = vsub.f32 0.0, %v10624_v43  ;;  %v4757_v24 = vadd.f32 %v10627_v56, %v4629_v55  ;;  %v10630_v31 = vsub.f32 0.0, %v10629_v5  ;;  %v10631_v0 = vld [vmem:[#allocation38_spill] sm:$0xff]  ;;  %v10632_v13 = vld [vmem:[#allocation19_spill] sm:$0xff]  ;;  %v10638_v55 = vld [vmem:[#allocation33_spill] sm:$0xff] }
 0x599   : > { %v5045_v62 = vadd.f32 %v10626_v52, %v10622_v18  ;;  %6019 = vrot.lane.b32.xlu1 %v6012_v34, %s6847_s20  ;;  %v10633_v58 = vsub.f32 0.0, %v10632_v13  ;;  %v10635_v43 = vld [vmem:[#allocation18_spill] sm:$0xff]  ;;  %v5049_v18 = vadd.f32 %v10637_v35, %v10574_v8  ;;  %v5076_v52 = vsub.f32 %v10638_v55, %v10605_v21  ;;  %s293_s20 = sand.u32 1, %s6820_s25   ;;  %v10643_v35 = vld [vmem:[#allocation49_spill] sm:$0xff] }
 0x59a   : > { %v5043_v49 = vadd.f32 %v10625_v15, %v10623_v22  ;;  %v5046_v53 = vadd.f32 %v10630_v31, %v10628_v61  ;;  %v10636_v22 = vsub.f32 0.0, %v10635_v43  ;;  %v10639_v61 = vld [vmem:[#allocation42_spill] sm:$0xff]  ;;  %s6148_s22 = sshll.u32 %s293_s20, 6  ;;  %v5293_v43 = vrot.slane %v4888_v30, %v8644_v47  ;;  %s10109_s18 = scalar_lea.sflag [#allocation5], %s293_s20 }
 0x59b   : > { %v5047_v19 = vadd.f32 %v10633_v58, %v10631_v0  ;;  %v5077_v5 = vsub.f32 %v5045_v62, %v10627_v56  ;;  %v4885_v31 = vadd.f32 %v10639_v61, %v4757_v24  ;;  %v5285_v58 = vrot.slane %v4886_v39, %v8644_v47  ;;  %s9789_s9 = scalar_lea.vmem [#allocation4], %s6148_s22  ;;  %s6850_s22 = smov [#allocation4]  }
 0x59c   : > { %v5048_v15 = vadd.f32 %v10636_v22, %v10634_v45  ;;  %v5075_v34 = vsub.f32 %v5043_v49, %v10576_v44  ;;  %v5078_v13 = vsub.f32 %v5046_v53, %v10607_v63  ;;  %v10641_v49 = vld [vmem:[#allocation20_spill] sm:$0xff]  ;;  %v5108_v62 = vadd.f32 %v5076_v52, %v10616_v6  ;;  %s6058_s27 = sshll.u32 %s9789_s9, 4  ;;  %s6754_s10 = sshll.u32 %s6850_s22, 4  ;;  %s10097_s27 = int_to_ptr.vmem [resolvable:$true] %s6058_s27  ;;  %s6755_s10 = int_to_ptr.vmem [resolvable:$false] %s6754_s10 }
 0x59d   : > { %v5079_v0 = vsub.f32 %v5047_v19, %v10609_v46  ;;  %v10642_v8 = vsub.f32 %v10640_v14, %v10641_v49  ;;  %v5289_v56 = vrot.slane %v4887_v10, %v8644_v47  ;;  %v5281_v53 = vrot.slane %v4885_v31, %v8644_v47  ;;  %v5622_v19 = vpop.permute.xlu0 %5621  ;;  %v10648_v49 = vld [vmem:[#allocation48_spill] sm:$0xff]  ;;  %s6750_s21 = scalar_lea.vmem %s10097_s27, 1024  ;;  %s6756_s13 = scalar_lea.vmem %s6755_s10, 2048 }
 0x59e   : > { %v5080_v45 = vsub.f32 %v5048_v15, %v10611_v36  ;;  %v5107_v21 = vadd.f32 %v5075_v34, %v10615_v50  ;;  %v5081_v63 = vsub.f32 %v5049_v18, %v10614_v11  ;;  %v5109_v46 = vadd.f32 %v5077_v5, %v10639_v61  ;;  %p6751_p0 = scmp.ne.s32.totalorder %s10097_s27, %s6750_s21  ;;  %p6757_p4 = scmp.lt.s32.totalorder %s10097_s27, %s6755_s10 }
 0x59f   : > { %v5106_v44 = vadd.f32 %v10642_v8, %v10613_v16  ;;  %v5110_v36 = vadd.f32 %v5078_v13, %v10617_v59  ;;  %v5111_v39 = vadd.f32 %v5079_v0, %v10618_v2  ;;  %v5399_v50 = vsel %vm5398_vm14, %v5281_v53, %v5397_v1  ;;  %v10644_v1 = vld [vmem:[#allocation64_spill] sm:$0xff]  ;;  %v10649_v8 = vld [vmem:[#allocation55_spill] sm:$0xff]  ;;  %p6758_p5 = scmp.lt.s32.totalorder %s6756_s13, %s6750_s21 }
 0x5a0   : > { %v5112_v24 = vadd.f32 %v5080_v45, %v10619_v27  ;;  %v5672_v16 = vrot.slane %v5107_v21, %v8644_v47  ;;  %v5676_v10 = vrot.slane %v5108_v62, %v8644_v47  ;;  %v5680_v11 = vrot.slane %v5109_v46, %v8644_v47  ;;  %v10646_v45 = vld [vmem:[#allocation50_spill] sm:$0xff]  ;;  %v10650_v53 = vld [vmem:[#allocation56_spill] sm:$0xff]  ;;  %p6752_p1 = pnand %p6751_p0, %p6944_p3 }
 0x5a1   : > { %v5668_v6 = vrot.slane %v5106_v44, %v8644_v47  ;;  %v5297_v59 = vrot.slane %v4889_v48, %v8644_v47  ;;  %v5401_v2 = vsel %vm5400_vm1, %v5285_v58, %v5399_v50  ;;  %v5113_v22 = vadd.f32 %v5081_v63, %v10620_v7  ;;  %v10645_v7 = vld [vmem:[#allocation54_spill] sm:$0xff]  ;;  %v10647_v58 = vld [vmem:[#allocation63_spill] sm:$0xff]  ;;  %v10655_v50 = vld [vmem:[#allocation72_spill] sm:$0xff]  ;;  %p6759_p6 = por %p6758_p5, %p6757_p4 }
 0x5a2   : > { %v5403_v27 = vsel %vm5402_vm15, %v5289_v56, %v5401_v2  ;;  %v4635_v18 = vadd.f32 %v10644_v1, %v10643_v35  ;;  %v5684_v55 = vrot.slane %v5110_v36, %v8644_v47  ;;  %v5688_v52 = vrot.slane %v5111_v39, %v8644_v47  ;;  %v6014_v56 = vpop.permute.xlu0 %6013  ;;  %v10651_v63 = vld [vmem:[#allocation70_spill] sm:$0xff]  ;;  %v10652_v36 = vld [vmem:[#allocation53_spill] sm:$0xff]  ;;  %p6753_p2 = pneg %p6752_p1 }
 0x5a3   : > { %v5793_v15 = vsel %vm5394_vm4, %v5672_v16, %v5668_v6  ;;  %v5405_v34 = vsel %vm5404_vm0, %v5293_v43, %v5403_v27  ;;  %v5692_v5 = vrot.slane %v5112_v24, %v8644_v47  ;;  %v4638_v14 = vadd.f32 %v10647_v58, %v10646_v45  ;;  %v10653_v39 = vld [vmem:[#allocation66_spill] sm:$0xff]  ;;  %v10657_v43 = vld [vmem:[#allocation73_spill] sm:$0xff] }
 0x5a4   : > { %v5794_v30 = vsel %vm5396_vm9, %v5676_v10, %v5793_v15  ;;  %v5407_v48 = vsel %vm5406_vm2, %v5297_v59, %v5405_v34  ;;  %v4763_v31 = vadd.f32 %v10645_v7, %v4635_v18  ;;  %v4764_v44 = vadd.f32 %v10649_v8, %v10648_v49  ;;  %v10656_v10 = vld [vmem:[#allocation76_spill] sm:$0xff]  ;;  %v10658_v27 = vld [vmem:[#allocation57_spill] sm:$0xff]  ;;  %v10660_v34 = vld [vmem:[#allocation58_spill] sm:$0xff]  ;;  %p6760_p7 = pnand %p6759_p6, %p6753_p2 }
 0x5a5   : > { %v5795_v61 = vsel %vm5398_vm14, %v5680_v11, %v5794_v30  ;;  %v6025_v13 = vsel %vm1377_vm7, %v5407_v48, %v5622_v19  ;;  %v5696_v21 = vrot.slane %v5113_v22, %v8644_v47  ;;  %v4639_v46 = vadd.f32 %v10651_v63, %v10650_v53  ;;  %v10654_v19 = vld [vmem:[#allocation68_spill] sm:$0xff]  ;;  %v10663_v49 = vld [vmem:[#allocation51_spill] sm:$0xff] }
 0x5a6   : > { %v5796_v0 = vsel %vm5400_vm1, %v5684_v55, %v5795_v61  ;;  %6033 = vst [vmem:[%s9789_s9] sm:$0xff] %v6025_v13  ;;  %v4640_v24 = vadd.f32 %v10653_v39, %v10652_v36  ;;  %v4890_v6 = vadd.f32 %v10655_v50, %v10654_v19  ;;  %v4891_v11 = vadd.f32 %v10656_v10, %v4763_v31  ;;  %v10659_v22 = vld [vmem:[#allocation8_spill] sm:$0xff]  ;;  %v10662_v31 = vld [vmem:[#allocation59_spill] sm:$0xff] }
 0x5a7   : > { %v5797_v62 = vsel %vm5402_vm15, %v5688_v52, %v5796_v0  ;;  %v4892_v59 = vadd.f32 %v10657_v43, %v4764_v44  ;;  %v4641_v15 = vadd.f32 %v10659_v22, %v10658_v27  ;;  %v4766_v55 = vadd.f32 %v10660_v34, %v4638_v14  ;;  %v10661_v48 = vld [vmem:[#allocation60_spill] sm:$0xff]  ;;  %v10664_v44 = vld [vmem:[#allocation67_spill] sm:$0xff] }
 0x5a8   : > { %v5798_v16 = vsel %vm5404_vm0, %v5692_v5, %v5797_v62  ;;  %v5301_v52 = vrot.slane %v4890_v6, %v8644_v47  ;;  %v5305_v30 = vrot.slane %v4891_v11, %v8644_v47  ;;  %v4767_v5 = vadd.f32 %v10661_v48, %v4639_v46 }
 0x5a9   : > { %v5799_v2 = vsel %vm5406_vm2, %v5696_v21, %v5798_v16  ;;  %v5309_v61 = vrot.slane %v4892_v59, %v8644_v47  ;;  %v4768_v13 = vadd.f32 %v10662_v31, %v4640_v24  ;;  %v4637_v21 = vadd.f32 %v10664_v44, %v10663_v49  ;;  %v10668_v24 = vld [vmem:[#allocation61_spill] sm:$0xff]  ;;  %v10669_v59 = vld [vmem:[#allocation74_spill] sm:$0xff] }
 0x5aa   : > { %v6029_v18 = vsel %vm1377_vm7, %v5799_v2, %v6014_v56  ;;  %v5408_v0 = vsel %vm5394_vm4, %v5305_v30, %v5301_v52  ;;  %v10665_v62 = vsub.f32 0.0, %v10643_v35  ;;  %v10666_v16 = vsub.f32 0.0, %v10663_v49  ;;  %v10671_v35 = vld [vmem:[#allocation78_spill] sm:$0xff] }
 0x5ab   : > { %6034 = vst [vmem:[%s9789_s9 + $0x8] sm:$0xff] %v6029_v18  ;;  %v5409_v56 = vsel %vm5396_vm9, %v5309_v61, %v5408_v0  ;;  %v10667_v46 = vsub.f32 0.0, %v10646_v45  ;;  %v4769_v11 = vadd.f32 %v10668_v24, %v4641_v15  ;;  %v4894_v2 = vadd.f32 %v10669_v59, %v4766_v55  ;;  %v10670_v18 = vld [vmem:[#allocation13_spill] sm:$0xff] }
 0x5ac   : > { %v5051_v14 = vadd.f32 %v10665_v62, %v10644_v1  ;;  %v5053_v19 = vadd.f32 %v10666_v16, %v10664_v44  ;;  %v4765_v52 = vadd.f32 %v10670_v18, %v4637_v21  ;;  %v4895_v1 = vadd.f32 %v10671_v35, %v4767_v5  ;;  %v10672_v61 = vld [vmem:[#allocation69_spill] sm:$0xff]  ;;  %v10673_v44 = vld [vmem:[#allocation79_spill] sm:$0xff]  ;;  %v10677_v21 = vld [vmem:[#allocation52_spill] sm:$0xff] }
 0x5ad   : > { %v5054_v6 = vadd.f32 %v10667_v46, %v10647_v58  ;;  %v5084_v0 = vsub.f32 %v10672_v61, %v10649_v8  ;;  %v4896_v62 = vadd.f32 %v10673_v44, %v4768_v13  ;;  %v10674_v16 = vld [vmem:[#allocation77_spill] sm:$0xff]  ;;  %v10675_v58 = vsub.f32 0.0, %v10650_v53  ;;  %v10679_v13 = vld [vmem:[#allocation82_spill] sm:$0xff] }
 0x5ae   : > { %v5083_v30 = vsub.f32 %v5051_v14, %v10645_v7  ;;  %v5085_v49 = vsub.f32 %v5053_v19, %v10670_v18  ;;  %v4893_v45 = vadd.f32 %v10674_v16, %v4765_v52  ;;  %v10676_v55 = vld [vmem:[#allocation65_spill] sm:$0xff]  ;;  %v4897_v18 = vadd.f32 %v10679_v13, %v4769_v11 }
 0x5af   : > { %v5055_v15 = vadd.f32 %v10675_v58, %v10651_v63  ;;  %v10678_v46 = vsub.f32 %v10676_v55, %v10677_v21  ;;  %v5086_v5 = vsub.f32 %v5054_v6, %v10660_v34  ;;  %v5116_v8 = vadd.f32 %v5084_v0, %v10657_v43 }
 0x5b0   : > { %v5115_v14 = vadd.f32 %v5083_v30, %v10656_v10  ;;  %v5117_v19 = vadd.f32 %v5085_v49, %v10674_v16  ;;  %v5317_v52 = vrot.slane %v4894_v2, %v8644_v47  ;;  %v5313_v53 = vrot.slane %v4893_v45, %v8644_v47 }
 0x5b1   : > { %v5114_v7 = vadd.f32 %v10678_v46, %v10655_v50  ;;  %v10680_v63 = vsub.f32 0.0, %v10652_v36  ;;  %v5321_v50 = vrot.slane %v4895_v1, %v8644_v47  ;;  %v5708_v43 = vrot.slane %v5116_v8, %v8644_v47  ;;  %v10682_v46 = vld [vmem:[#allocation80_spill] sm:$0xff]  ;;  %v10683_v8 = vld [vmem:[#allocation85_spill] sm:$0xff] }
 0x5b2   : > { %v5704_v10 = vrot.slane %v5115_v14, %v8644_v47  ;;  %v5325_v6 = vrot.slane %v4896_v62, %v8644_v47  ;;  %v5410_v11 = vsel %vm5398_vm14, %v5313_v53, %v5409_v56  ;;  %v5087_v2 = vsub.f32 %v5055_v15, %v10661_v48 }
 0x5b3   : > { %v5056_v61 = vadd.f32 %v10680_v63, %v10653_v39  ;;  %v5700_v34 = vrot.slane %v5114_v7, %v8644_v47  ;;  %v5712_v30 = vrot.slane %v5117_v19, %v8644_v47  ;;  %v5411_v0 = vsel %vm5400_vm1, %v5317_v52, %v5410_v11 }
 0x5b4   : > { %v5118_v36 = vadd.f32 %v5086_v5, %v10669_v59  ;;  %v4643_v1 = vadd.f32 %v9269_v3, %v10555_v33  ;;  %v5412_v49 = vsel %vm5402_vm15, %v5321_v50, %v5411_v0  ;;  %v10681_v62 = vsub.f32 0.0, %v10658_v27  ;;  %v10685_v0 = vld [vmem:[#allocation94_spill] sm:$0xff] }
 0x5b5   : > { %v5800_v39 = vsel %vm5394_vm4, %v5704_v10, %v5700_v34  ;;  %v5088_v56 = vsub.f32 %v5056_v61, %v10662_v31  ;;  %v5413_v45 = vsel %vm5404_vm0, %v5325_v6, %v5412_v49  ;;  %v5329_v58 = vrot.slane %v4897_v18, %v8644_v47  ;;  %v10686_v49 = vld [vmem:[#allocation14_spill] sm:$0xff] }
 0x5b6   : > { %v5057_v16 = vadd.f32 %v10681_v62, %v10659_v22  ;;  %v5801_v48 = vsel %vm5396_vm9, %v5708_v43, %v5800_v39  ;;  %v5119_v59 = vadd.f32 %v5087_v2, %v10671_v35  ;;  %v4771_v55 = vadd.f32 %v10563_v37, %v4643_v1  ;;  %v5624_v5 = vpop.permute.xlu1 %5623 }
 0x5b7   : > { %v5802_v15 = vsel %vm5398_vm14, %v5712_v30, %v5801_v48  ;;  %v5716_v21 = vrot.slane %v5118_v36, %v8644_v47  ;;  %v4772_v27 = vadd.f32 %v10564_v25, %v10682_v46  ;;  %v5414_v22 = vsel %vm5406_vm2, %v5329_v58, %v5413_v45  ;;  %v10689_v48 = vld [vmem:[#allocation93_spill] sm:$0xff]  ;;  %v10692_v46 = vld [vmem:[#allocation10_spill] sm:$0xff] }
 0x5b8   : > { %v5089_v31 = vsub.f32 %v5057_v16, %v10668_v24  ;;  %v5120_v7 = vadd.f32 %v5088_v56, %v10673_v44  ;;  %v4898_v35 = vadd.f32 %v9293_v40, %v10683_v8  ;;  %v4899_v19 = vadd.f32 %v9358_v4, %v4771_v55  ;;  %v10691_v55 = vld [vmem:[#allocation11_spill] sm:$0xff] }
 0x5b9   : > { %v5803_v14 = vsel %vm5400_vm1, %v5716_v21, %v5802_v15  ;;  %v4900_v18 = vadd.f32 %v9313_v20, %v4772_v27  ;;  %v6026_v52 = vsel %vm1377_vm7, %v5414_v22, %v5624_v5  ;;  %v5720_v53 = vrot.slane %v5119_v59, %v8644_v47  ;;  %v10690_v15 = vld [vmem:[#allocation83_spill] sm:$0xff]  ;;  %v10693_v22 = vld [vmem:[#allocation62_spill] sm:$0xff] }
 0x5ba   : > { %6035 = vst [vmem:[%s9789_s9 + $0x10] sm:$0xff] %v6026_v52  ;;  %v5333_v63 = vrot.slane %v4898_v35, %v8644_v47  ;;  %v5337_v24 = vrot.slane %v4899_v19, %v8644_v47  ;;  %v5121_v44 = vadd.f32 %v5089_v31, %v10679_v13  ;;  %v5724_v34 = vrot.slane %v5120_v7, %v8644_v47  ;;  %v10694_v7 = vld [vmem:[#allocation22_spill] sm:$0xff]  ;;  %v10695_v35 = vld [vmem:[#allocation89_spill] sm:$0xff]  ;;  %v10696_v19 = vld [vmem:[#allocation96_spill] sm:$0xff] }
 0x5bb   : > { %v5804_v61 = vsel %vm5402_vm15, %v5720_v53, %v5803_v14  ;;  %v5341_v50 = vrot.slane %v4900_v18, %v8644_v47  ;;  %v10684_v43 = vsub.f32 0.0, %v10555_v33  ;;  %v5092_v36 = vsub.f32 %v10685_v0, %v10564_v25  ;;  %v10697_v52 = vld [vmem:[#allocation91_spill] sm:$0xff] }
 0x5bc   : > { %v5415_v10 = vsel %vm5394_vm4, %v5337_v24, %v5333_v63  ;;  %v5805_v2 = vsel %vm5404_vm0, %v5724_v34, %v5804_v61  ;;  %v5728_v13 = vrot.slane %v5121_v44, %v8644_v47  ;;  %v10687_v62 = vsub.f32 %v10686_v49, %v10536_v9  ;;  %v10698_v63 = vld [vmem:[#allocation104_spill] sm:$0xff] }
 0x5bd   : > { %v5059_v6 = vadd.f32 %v10684_v43, %v9269_v3  ;;  %v5416_v11 = vsel %vm5396_vm9, %v5341_v50, %v5415_v10  ;;  %v5124_v16 = vadd.f32 %v5092_v36, %v9313_v20  ;;  %v4651_v9 = vadd.f32 %v9523_v57, %v10588_v32  ;;  %v10703_v36 = vld [vmem:[#allocation12_spill] sm:$0xff] }
 0x5be   : > { %v5806_v39 = vsel %vm5406_vm2, %v5728_v13, %v5805_v2  ;;  %v5122_v33 = vadd.f32 %v10687_v62, %v9293_v40  ;;  %v4646_v21 = vadd.f32 %v10691_v55, %v10690_v15  ;;  %v4780_v31 = vadd.f32 %v10602_v26, %v10693_v22  ;;  %v10701_v2 = vld [vmem:[#allocation86_spill] sm:$0xff] }
 0x5bf   : > { %v5091_v30 = vsub.f32 %v5059_v6, %v10563_v37  ;;  %v10688_v37 = vld [vmem:[#allocation84_spill] sm:$0xff]  ;;  %v5740_v59 = vrot.slane %v5124_v16, %v8644_v47  ;;  %v4779_v20 = vadd.f32 %v10601_v28, %v4651_v9  ;;  %v4906_v5 = vadd.f32 %v9552_v12, %v10694_v7  ;;  %v10710_v9 = vld [vmem:[#allocation21_spill] sm:$0xff] }
 0x5c0   : > { %v6016_v1 = vpop.permute.xlu1 %6015  ;;  %v4645_v45 = vadd.f32 %v10689_v48, %v10688_v37  ;;  %v5732_v25 = vrot.slane %v5122_v33, %v8644_v47  ;;  %v4908_v8 = vadd.f32 %v9573_v51, %v4780_v31  ;;  %v4647_v18 = vadd.f32 %v10696_v19, %v10695_v35  ;;  %v10704_v33 = vld [vmem:[#allocation90_spill] sm:$0xff] }
 0x5c1   : > { %v5123_v3 = vadd.f32 %v5091_v30, %v9358_v4  ;;  %v6030_v56 = vsel %vm1377_vm7, %v5806_v39, %v6016_v1  ;;  %v4907_v14 = vadd.f32 %v9580_v38, %v4779_v20  ;;  %v4774_v53 = vadd.f32 %v10697_v52, %v4646_v21  ;;  %v10702_v30 = vld [vmem:[#allocation92_spill] sm:$0xff] }
 0x5c2   : > { %6036 = vst [vmem:[%s9789_s9 + $0x18] sm:$0xff] %v6030_v56  ;;  %v4773_v27 = vadd.f32 %v10692_v46, %v4645_v45  ;;  %v10699_v44 = vsub.f32 0.0, %v10688_v37  ;;  %v5365_v50 = vrot.slane %v4906_v5, %v8644_v47  ;;  %v5373_v10 = vrot.slane %v4908_v8, %v8644_v47  ;;  %v10706_v56 = vld [vmem:[#allocation103_spill] sm:$0xff]  ;;  %v10707_v37 = vld [vmem:[#allocation97_spill] sm:$0xff] }
 0x5c3   : > { %v5736_v58 = vrot.slane %v5123_v3, %v8644_v47  ;;  %v5369_v34 = vrot.slane %v4907_v14, %v8644_v47  ;;  %v10700_v43 = vsub.f32 0.0, %v10588_v32  ;;  %v4648_v13 = vadd.f32 %v10702_v30, %v10701_v2  ;;  %v10705_v3 = vld [vmem:[#allocation102_spill] sm:$0xff] }
 0x5c4   : > { %v4901_v24 = vadd.f32 %v10698_v63, %v4773_v27  ;;  %v5061_v61 = vadd.f32 %v10699_v44, %v10689_v48  ;;  %v4775_v39 = vadd.f32 %v10703_v36, %v4647_v18  ;;  %v4649_v16 = vadd.f32 %v10705_v3, %v10704_v33  ;;  %v10712_v27 = vld [vmem:[#allocation105_spill] sm:$0xff]  ;;  %v10715_v14 = vld [vmem:[#allocation106_spill] sm:$0xff]  ;;  %v10717_v44 = vld [vmem:[#allocation107_spill] sm:$0xff] }
 0x5c5   : > { %v5807_v40 = vsel %vm5394_vm4, %v5736_v58, %v5732_v25  ;;  %v5067_v6 = vadd.f32 %v10700_v43, %v9523_v57  ;;  %v5422_v0 = vsel %vm5394_vm4, %v5369_v34, %v5365_v50  ;;  %v4902_v32 = vadd.f32 %v10706_v56, %v4774_v53  ;;  %v10709_v58 = vld [vmem:[#allocation9_spill] sm:$0xff] }
 0x5c6   : > { %v5808_v4 = vsel %vm5396_vm9, %v5740_v59, %v5807_v40  ;;  %v5345_v1 = vrot.slane %v4901_v24, %v8644_v47  ;;  %v9955_v49 = vsel %vm5396_vm9, %v5373_v10, %v5422_v0  ;;  %v5093_v57 = vsub.f32 %v5061_v61, %v10692_v46 }
 0x5c7   : > { %v5099_v62 = vsub.f32 %v5067_v6, %v10601_v28  ;;  %v5100_v48 = vsub.f32 %v10707_v37, %v10602_v26  ;;  %v10708_v45 = vsub.f32 0.0, %v10690_v15  ;;  %v4776_v59 = vadd.f32 %v10709_v58, %v4648_v13  ;;  %v10713_v26 = vld [vmem:[#allocation75_spill] sm:$0xff] }
 0x5c8   : > { %v10711_v28 = vsub.f32 %v10710_v9, %v10582_v41  ;;  %v4903_v46 = vadd.f32 %v10712_v27, %v4775_v39  ;;  %v5417_v22 = vsel %vm5398_vm14, %v5345_v1, %v5416_v11  ;;  %v4777_v31 = vadd.f32 %v10713_v26, %v4649_v16 }
 0x5c9   : > { %v5062_v25 = vadd.f32 %v10708_v45, %v10691_v55  ;;  %v5131_v20 = vadd.f32 %v5099_v62, %v9580_v38  ;;  %v5132_v21 = vadd.f32 %v5100_v48, %v9573_v51  ;;  %v5349_v15 = vrot.slane %v4902_v32, %v8644_v47 }
 0x5ca   : > { %v5130_v40 = vadd.f32 %v10711_v28, %v9552_v12  ;;  %v10714_v55 = vsub.f32 0.0, %v10695_v35  ;;  %v5125_v5 = vadd.f32 %v5093_v57, %v10698_v63  ;;  %v4904_v11 = vadd.f32 %v10715_v14, %v4776_v59 }
 0x5cb   : > { %v5094_v12 = vsub.f32 %v5062_v25, %v10697_v52  ;;  %v5768_v51 = vrot.slane %v5131_v20, %v8644_v47  ;;  %v5772_v41 = vrot.slane %v5132_v21, %v8644_v47  ;;  %v5418_v8 = vsel %vm5400_vm1, %v5349_v15, %v5417_v22  ;;  %v10719_v20 = vld [vmem:[#allocation109_spill] sm:$0xff] }
 0x5cc   : > { %v5063_v7 = vadd.f32 %v10714_v55, %v10696_v19  ;;  %v5764_v38 = vrot.slane %v5130_v40, %v8644_v47  ;;  %v5353_v18 = vrot.slane %v4903_v46, %v8644_v47  ;;  %v10716_v35 = vsub.f32 0.0, %v10701_v2  ;;  %v10721_v22 = vld [vmem:[#allocation81_spill] sm:$0xff]  ;;  %v10723_v55 = vld [vmem:[#allocation98_spill] sm:$0xff] }
 0x5cd   : > { %v5744_v63 = vrot.slane %v5125_v5, %v8644_v47  ;;  %v4905_v61 = vadd.f32 %v10717_v44, %v4777_v31  ;;  %v5126_v34 = vadd.f32 %v5094_v12, %v10706_v56  ;;  %v5357_v10 = vrot.slane %v4904_v11, %v8644_v47  ;;  %v10725_v12 = vld [vmem:[#allocation88_spill] sm:$0xff]  ;;  %v10727_v11 = vld [vmem:[#allocation101_spill] sm:$0xff] }
 0x5ce   : > { %v5064_v19 = vadd.f32 %v10716_v35, %v10702_v30  ;;  %v5814_v53 = vsel %vm5394_vm4, %v5768_v51, %v5764_v38  ;;  %v5095_v52 = vsub.f32 %v5063_v7, %v10703_v36  ;;  %v5419_v50 = vsel %vm5402_vm15, %v5353_v18, %v5418_v8  ;;  %v10724_v7 = vld [vmem:[#allocation40_spill] sm:$0xff]  ;;  %v10728_v8 = vld [vmem:[#allocation110_spill] sm:$0xff] }
 0x5cf   : > { %v9996_v24 = vsel %vm5396_vm9, %v5772_v41, %v5814_v53  ;;  %v10718_v43 = vsub.f32 0.0, %v10704_v33  ;;  %v5420_v30 = vsel %vm5404_vm0, %v5357_v10, %v5419_v50  ;;  %v5809_v0 = vsel %vm5398_vm14, %v5744_v63, %v5808_v4  ;;  %v10726_v41 = vld [vmem:[#allocation111_spill] sm:$0xff]  ;;  %v10732_v50 = vld [vmem:[#allocation108_spill] sm:$0xff] }
 0x5d0   : > { %v5096_v2 = vsub.f32 %v5064_v19, %v10709_v58  ;;  %v5127_v13 = vadd.f32 %v5095_v52, %v10712_v27  ;;  %v5361_v36 = vrot.slane %v4905_v61, %v8644_v47  ;;  %v5748_v39 = vrot.slane %v5126_v34, %v8644_v47  ;;  %v10720_v27 = vld [vmem:[#allocation95_spill] sm:$0xff]  ;;  %v10731_v52 = vld [vmem:[#allocation112_spill] sm:$0xff] }
 0x5d1   : > { %v5065_v6 = vadd.f32 %v10718_v43, %v10705_v3  ;;  %v4653_v48 = vadd.f32 %v9543_v54, %v9317_v23  ;;  %v4654_v28 = vadd.f32 %v9508_v60, %v9311_v17  ;;  %v4655_v21 = vadd.f32 %v10719_v20, %v9337_v29  ;;  %v10729_v19 = vld [vmem:[#allocation87_spill] sm:$0xff] }
 0x5d2   : > { %v5421_v62 = vsel %vm5406_vm2, %v5361_v36, %v5420_v30  ;;  %v5128_v33 = vadd.f32 %v5096_v2, %v10715_v14  ;;  %v5810_v3 = vsel %vm5400_vm1, %v5748_v39, %v5809_v0  ;;  %v5752_v32 = vrot.slane %v5127_v13, %v8644_v47  ;;  %v10736_v0 = vld [vmem:[#allocation114_spill] sm:$0xff] }
 0x5d3   : > { %v5097_v1 = vsub.f32 %v5065_v6, %v10713_v26  ;;  %v4781_v58 = vadd.f32 %v9490_v42, %v4653_v48  ;;  %v4782_v26 = vadd.f32 %v10721_v22, %v4654_v28  ;;  %v10722_v31 = vsub.f32 0.0, %v9317_v23  ;;  %v10734_v6 = vld [vmem:[#allocation113_spill] sm:$0xff] }
 0x5d4   : > { %v5811_v57 = vsel %vm5402_vm15, %v5752_v32, %v5810_v3  ;;  %v5756_v37 = vrot.slane %v5128_v33, %v8644_v47  ;;  %v4656_v5 = vadd.f32 %v10724_v7, %v10723_v55  ;;  %v4783_v38 = vadd.f32 %v10725_v12, %v4655_v21 }
 0x5d5   : > { %v5129_v4 = vadd.f32 %v5097_v1, %v10717_v44  ;;  %v4909_v46 = vadd.f32 %v10720_v27, %v4781_v58  ;;  %v5069_v15 = vadd.f32 %v10722_v31, %v9543_v54  ;;  %v4910_v14 = vadd.f32 %v10726_v41, %v4782_v26 }
 0x5d6   : > { %v5812_v45 = vsel %vm5404_vm0, %v5756_v37, %v5811_v57  ;;  %v4657_v18 = vadd.f32 %v10728_v8, %v10727_v11  ;;  %v4784_v53 = vadd.f32 %v10729_v19, %v4656_v5  ;;  %v10730_v23 = vsub.f32 0.0, %v9311_v17 }
 0x5d7   : > { %v5760_v25 = vrot.slane %v5129_v4, %v8644_v47  ;;  %v5377_v51 = vrot.slane %v4909_v46, %v8644_v47  ;;  %v5101_v35 = vsub.f32 %v5069_v15, %v9490_v42  ;;  %v4911_v63 = vadd.f32 %v10731_v52, %v4783_v38 }
 0x5d8   : > { %v5070_v54 = vadd.f32 %v10730_v23, %v9508_v60  ;;  %v5381_v61 = vrot.slane %v4910_v14, %v8644_v47  ;;  %v4785_v34 = vadd.f32 %v10732_v50, %v4657_v18  ;;  %v10733_v10 = vsub.f32 0.0, %v9337_v29 }
 0x5d9   : > { %v5813_v59 = vsel %vm5406_vm2, %v5760_v25, %v5812_v45  ;;  %v5424_v44 = vsel %vm5398_vm14, %v5377_v51, %v9955_v49  ;;  %v5133_v42 = vadd.f32 %v5101_v35, %v10720_v27  ;;  %v4912_v2 = vadd.f32 %v10734_v6, %v4784_v53 }
 0x5da   : > { %v5071_v43 = vadd.f32 %v10733_v10, %v10719_v20  ;;  %v5425_v17 = vsel %vm5400_vm1, %v5381_v61, %v5424_v44  ;;  %v5102_v60 = vsub.f32 %v5070_v54, %v10721_v22  ;;  %v5385_v30 = vrot.slane %v4911_v63, %v8644_v47 }
 0x5db   : > { %v10735_v49 = vsub.f32 0.0, %v10723_v55  ;;  %v4913_v36 = vadd.f32 %v10736_v0, %v4785_v34  ;;  %v5776_v1 = vrot.slane %v5133_v42, %v8644_v47  ;;  %v10737_v33 = vsub.f32 0.0, %v10727_v11 }
 0x5dc   : > { %v5426_v39 = vsel %vm5402_vm15, %v5385_v30, %v5425_v17  ;;  %v5103_v29 = vsub.f32 %v5071_v43, %v10725_v12 }
 0x5dd   : > { %v5072_v13 = vadd.f32 %v10735_v49, %v10724_v7  ;;  %v5073_v3 = vadd.f32 %v10737_v33, %v10728_v8  ;;  %v5393_v4 = vrot.slane %v4913_v36, %v8644_v47  ;;  %v5816_v37 = vsel %vm5398_vm14, %v5776_v1, %v9996_v24 }
 0x5de   : > { %v5626_v16 = vpop.permute.xlu0 %5625  ;;  %v5135_v57 = vadd.f32 %v5103_v29, %v10731_v52 }
 0x5df   : > { %v6027_v56 = vsel %vm1377_vm7, %v5421_v62, %v5626_v16  ;;  %v5389_v62 = vrot.slane %v4912_v2, %v8644_v47  ;;  %v5134_v16 = vadd.f32 %v5102_v60, %v10726_v41  ;;  %v5104_v32 = vsub.f32 %v5072_v13, %v10729_v19 }
 0x5e0   : > { %6037 = vst [vmem:[%s9789_s9 + $0x20] sm:$0xff] %v6027_v56  ;;  %v5105_v58 = vsub.f32 %v5073_v3, %v10732_v50 }
 0x5e1   : > { %v5427_v56 = vsel %vm5404_vm0, %v5389_v62, %v5426_v39  ;;  %v5780_v48 = vrot.slane %v5134_v16, %v8644_v47 }
 0x5e2   : > { %v5428_v45 = vsel %vm5406_vm2, %v5393_v4, %v5427_v56  ;;  %v5137_v24 = vadd.f32 %v5105_v58, %v10736_v0 }
 0x5e3   : > { %v5817_v28 = vsel %vm5400_vm1, %v5780_v48, %v5816_v37 }
 0x5e4   : > { %v5792_v46 = vrot.slane %v5137_v24, %v8644_v47 }
 0x5e8   : > { %v6018_v9 = vpop.permute.xlu0 %6017 }
 0x5e9   : > { %v6031_v40 = vsel %vm1377_vm7, %v5813_v59, %v6018_v9  ;;  %v5136_v9 = vadd.f32 %v5104_v32, %v10734_v6 }
 0x5ea   : > { %6038 = vst [vmem:[%s9789_s9 + $0x28] sm:$0xff] %v6031_v40  ;;  %v5784_v40 = vrot.slane %v5135_v57, %v8644_v47 }
 0x5eb   : > { %v5788_v21 = vrot.slane %v5136_v9, %v8644_v47 }
 0x5ec   : > { %v5818_v20 = vsel %vm5402_vm15, %v5784_v40, %v5817_v28 }
 0x5ed   : > { %v5819_v27 = vsel %vm5404_vm0, %v5788_v21, %v5818_v20 }
 0x5ee   : > { %v5820_v22 = vsel %vm5406_vm2, %v5792_v46, %v5819_v27 }
 0x600   : > { %v5628_v25 = vpop.permute.xlu1 %5627 }
 0x601   : > { %v6028_v59 = vsel %vm1377_vm7, %v5428_v45, %v5628_v25 }
 0x602   : > { %6039 = vst [vmem:[%s9789_s9 + $0x30] sm:$0xff] %v6028_v59 }
 0x60b   : > { %v6020_v26 = vpop.permute.xlu1 %6019 }
 0x60c   : > { %v6032_v31 = vsel %vm1377_vm7, %v5820_v22, %v6020_v26 }
 0x60d   : > { %6040 = vst [vmem:[%s9789_s9 + $0x38] sm:$0xff] %v6032_v31 }
 0x60e   : > { %6763 = shalt.err (!%p6760_p7)
}
 0x60f   : > { %s6764_s20 = scalar_lea.hbm %s10103_s23, 1024  ;;  %s6768_s28 = scalar_lea.hbm %s10168_s7, 4096 }
 0x610   : > { %p6765_p9 = scmp.ne.s32.totalorder %s10103_s23, %s6764_s20  ;;  %p6769_p12 = scmp.lt.u32.totalorder %s10103_s23, %s10168_s7 }
 0x611   : > { %p6770_p13 = scmp.lt.u32.totalorder %s6768_s28, %s6764_s20  ;;  %p6772_p1 = scmp.lt.u32.totalorder %s6764_s20, %s10103_s23 }
 0x612   : > { %p6766_p10 = pnand %p6765_p9, %p6944_p3 }
 0x613   : > { %p6771_p0 = por %p6770_p13, %p6769_p12 }
 0x614   : > { %p6767_p11 = pneg %p6766_p10 }
 0x615   : > { %p6773_p2 = por %p6772_p1, %p6771_p0 }
 0x617   : > { %p6774_p4 = pnand %p6773_p2, %p6767_p11 }
 0x619   : > { %6777 = shalt.err (!%p6774_p4)
}
 0x61a   : > { %s6851_s21 = smov 256   ;;  %s6852_s10 = smov 16  }
 0x61b   : > { %6574 = dma.vmem_to_hbm [thread:$0]  (%p6944_p3), %s10097_s27, 1024, %s10103_s23, %s10109_s18, %s6851_s21, %s6851_s21, %s6852_s10  }
 0x61c PF: > { %p6580_p5 = scmp.ge.s32.totalorder %s6844_s8, 2  ;;  %s6073_s13 = sand.u32 1, %s6816_s24  }
 0x61d   : > { %s6074_s20 = scalar_lea.sflag [#allocation5], %s6073_s13 }
 0x61e   : > { %p6577_p6 = pnand %p6580_p5, %p6953_p8 }
 0x620   : > { %6811 = dma.done.wait (!%p6577_p6), %s6074_s20, 1024  }
 0x621   : > { %6813 = vsyncadd (!%p6577_p6), %s6074_s20, 4294966272  ;;  %s20_s8 = sadd.s32 1, %s6844_s8   ;;  %s10738_s24 = smov %s6820_s25 }
 0x622   : > { %p17_p7 = scmp.ge.s32.totalorder %s20_s8, 6   ;;  %s10739_s25 = smov %s6824_s26 }
 0x623   : > { %s10740_s26 = smov %s6962_s19  ;;  %s10741_s27 = smov %s6836_s29 }
 0x624   : > { %s10742_s28 = smov %s6840_s30  ;;  %s10743_s29 = smov %s10746_s11 }
 0x625   : > { %s10744_s30 = smov %s10750_s12  ;;  %19 = sbr.rel (!%p17_p7) target bundleno = 5 (0x5), region = 87 }
 0x62c   :  { %6079 = vsyncpa [#allocation5], 1 }
 0x62d   :  { %6081 = vsyncpa [#allocation5 + $0x1], 1 }

</bundles_post_ra>
